<compile_context>
chip_gen: v7x
topology: tpu7x:2x2x1
jax: 0.10.0
libtpu: 0.0.40
codegen_flags: <defaults>
</compile_context>

<pallas_src>
import functools

import jax
import jax.numpy as jnp
from jax import lax
from jax.experimental import pallas as pl
from jax.experimental.pallas import tpu as pltpu


# ----------------------------------------------------------------------------
# Main kernel: front-end + StackedAttention + conv_fuse + global max (per B-tile)
# ----------------------------------------------------------------------------
def _pct_main_kernel(x_ref,
                     w1_ref, w2_ref, w3_ref, w4_ref, feb_ref, feb3_ref,
                     cb_ref,                      # [3,1,C]: ds2 shift, pt bn1 shift, pt bn2 shift
                     ptw_ref,                     # [2,C,C]: pt conv1/conv2 (BN-folded)
                     wq_ref, wv_ref, bv_ref, wt_ref, bt_ref,
                     fw_ref, fb_ref,
                     o_ref,
                     x_sc, xr_sc, fuse_sc,
                     *, bb, n, use_bf16_exp):
    f32, bf16 = jnp.float32, jnp.bfloat16
    C = ptw_ref.shape[-1]
    N = n

    # ---- front-end: conv1/conv2 + Random_Subsample_Feature stand-ins (pointwise,
    #      BN folded into the weights; only the shift add remains).
    h = jnp.dot(x_ref[...], w1_ref[...], preferred_element_type=f32)
    h = jnp.maximum(h + feb_ref[0], 0.0)
    h = jnp.dot(h.astype(bf16), w2_ref[...], preferred_element_type=f32)
    h = jnp.maximum(h + feb_ref[1], 0.0)
    h = jnp.dot(h.astype(bf16), w3_ref[...], preferred_element_type=f32)
    h = jnp.maximum(h + feb3_ref[...], 0.0)
    h = jnp.dot(h.astype(bf16), w4_ref[...], preferred_element_type=f32)
    f1 = jnp.maximum(h + cb_ref[0], 0.0)                          # [bb*N, C] f32
    f1b = f1.astype(bf16)

    # conv_fuse partial product for feature_1 (rows 4C:5C of the folded fuse weight);
    # the channel concat is realized as row-sliced partial matmuls, no concat copies.
    fuse_sc[...] = jnp.dot(f1b, fw_ref[pl.ds(4 * C, C), :], preferred_element_type=f32)

    # ---- pt_last conv1/conv2 (BN folded)
    y = jnp.dot(f1b, ptw_ref[0], preferred_element_type=f32)
    y = jnp.maximum(y + cb_ref[1], 0.0)
    y = jnp.dot(y.astype(bf16), ptw_ref[1], preferred_element_type=f32)
    y = jnp.maximum(y + cb_ref[2], 0.0)
    x_sc[...] = y                                                 # residual stream, f32

    # ---- 4 stacked offset-attention layers, fully VMEM-resident.
    # TODO(synk): at realistic N/C, move this to a length-4 "arbitrary" grid axis (or
    # lax.fori_loop) to bound live ranges; neutral at the shipped sizes.
    for i in range(4):
        x = x_sc[...]                                             # [bb*N, C] f32
        xb = x.astype(bf16)
        q = jnp.dot(xb, wq_ref[i], preferred_element_type=f32).astype(bf16)   # [bb*N, C/4]
        v = jnp.dot(xb, wv_ref[i], preferred_element_type=f32) + bv_ref[i]    # [bb*N, C]
        vb = v.astype(bf16)

        # attention is per point-cloud: loop the [N, N] math over the bb batch slices.
        for b in range(bb):
            qb = q[b * N:(b + 1) * N]
            # energy = q @ q^T is SYMMETRIC (q_conv/k_conv weight tying, no bias), so the
            # attention matrix is built already transposed -> no [N,N] XLU transpose.
            e = lax.dot_general(qb, qb, (((1,), (1,)), ((), ())),
                                preferred_element_type=f32)       # [N, N] f32
            m = jnp.max(e, axis=0, keepdims=True)                 # [1, N]
            z = e - m
            if use_bf16_exp:
                z = z.astype(bf16)                                # bf16 EUP on v6e/v7x
            p = jnp.exp(z)                                        # softmax(e)^T numerator
            s = jnp.sum(p.astype(f32), axis=0, keepdims=True)     # [1, N] f32
            att_t = p * pl.reciprocal(s, approx=True).astype(p.dtype)   # softmax(e)^T
            colsum = jnp.sum(att_t.astype(f32), axis=1, keepdims=True)  # [N, 1] col sums
            inv_col = pl.reciprocal(colsum + 1e-9, approx=True)
            # x_r (channels-last) = att^T @ v, column renorm folded in afterwards.
            xr_sc[pl.ds(b * N, N), :] = (
                jnp.dot(att_t.astype(bf16), vb[b * N:(b + 1) * N],
                        preferred_element_type=f32) * inv_col)

        # x_r = relu(after_norm(trans_conv(x - x_r)));  x = x + x_r   (BN folded into wt)
        t = (x - xr_sc[...]).astype(bf16)
        tr = jnp.dot(t, wt_ref[i], preferred_element_type=f32) + bt_ref[i]
        x_new = x + jnp.maximum(tr, 0.0)
        x_sc[...] = x_new
        # conv_fuse partial product for x_{i+1} (rows i*C:(i+1)*C of the fuse weight)
        fuse_sc[...] += jnp.dot(x_new.astype(bf16), fw_ref[pl.ds(i * C, C), :],
                                preferred_element_type=f32)

    # ---- conv_fuse shift + LeakyReLU(0.2), then per-cloud max over points
    g = fuse_sc[...] + fb_ref[...]
    g = jnp.where(g > 0, g, 0.2 * g)
    for b in range(bb):
        o_ref[pl.ds(b, 1), :] = jnp.max(g[b * N:(b + 1) * N], axis=0, keepdims=True)


_MAIN_KEYS = ("fe_w1", "fe_w2", "fe_w3", "fe_w4", "fe_b12", "fe_b3", "cb", "pt_w12",
              "sa_wq", "sa_wv", "sa_bv", "sa_wt", "sa_bt", "fuse_w", "fuse_b")


def pct_main(x_flat, pp, *, bb, n, use_bf16_exp):
    """x_flat: [Bp*n, d] bf16 (surviving points, batch-major).  Returns [Bp, 16H] f32."""
    R, d = x_flat.shape
    Bp = R // n
    C = pp["pt_w12"].shape[-1]
    F = pp["fuse_w"].shape[1]

    def wspec(a):
        nd = a.ndim
        return pl.BlockSpec(a.shape, lambda i, _n=nd: (0,) * _n)

    kern = functools.partial(_pct_main_kernel, bb=bb, n=n, use_bf16_exp=use_bf16_exp)
    return pl.pallas_call(
        kern,
        out_shape=jax.ShapeDtypeStruct((Bp, F), jnp.float32),
        grid=(Bp // bb,),
        in_specs=[pl.BlockSpec((bb * n, d), lambda i: (i, 0))]
                 + [wspec(pp[k]) for k in _MAIN_KEYS],
        out_specs=pl.BlockSpec((bb, F), lambda i: (i, 0)),
        scratch_shapes=[pltpu.VMEM((bb * n, C), jnp.float32),   # residual stream
                        pltpu.VMEM((bb * n, C), jnp.float32),   # x_r staging
                        pltpu.VMEM((bb * n, F), jnp.float32)],  # conv_fuse accumulator
        compiler_params=pltpu.CompilerParams(
            dimension_semantics=("parallel",),                  # B-tiles shard across TCs
            vmem_limit_bytes=32 * 1024 * 1024),
    )(x_flat, *[pp[k] for k in _MAIN_KEYS])


# ----------------------------------------------------------------------------
# Head kernel: linear1/bn6/relu -> linear2/bn7/relu -> linear3, batched over all B
# (Dropout = identity in eval mode.)  Output padded to 128 lanes for a dense store.
# ----------------------------------------------------------------------------
def _head_kernel(g_ref, w1_ref, b1_ref, w2_ref, b2_ref, w3_ref, b3_ref, o_ref):
    f32, bf16 = jnp.float32, jnp.bfloat16
    h = jnp.dot(g_ref[...].astype(bf16), w1_ref[...], preferred_element_type=f32)
    h = jnp.maximum(h + b1_ref[...], 0.0)
    h = jnp.dot(h.astype(bf16), w2_ref[...], preferred_element_type=f32)
    h = jnp.maximum(h + b2_ref[...], 0.0)
    o_ref[...] = jnp.dot(h.astype(bf16), w3_ref[...], preferred_element_type=f32) + b3_ref[...]


_HEAD_KEYS = ("h_w1", "h_b1", "h_w2", "h_b2", "h_w3", "h_b3")


def pct_head(gmax, pp):
    Bp, F = gmax.shape
    ncp = pp["h_w3"].shape[1]

    def wspec(a):
        nd = a.ndim
        return pl.BlockSpec(a.shape, lambda i, _n=nd: (0,) * _n)

    return pl.pallas_call(
        _head_kernel,
        out_shape=jax.ShapeDtypeStruct((Bp, ncp), jnp.float32),
        grid=(1,),
        in_specs=[pl.BlockSpec((Bp, F), lambda i: (0, 0))]
                 + [wspec(pp[k]) for k in _HEAD_KEYS],
        out_specs=pl.BlockSpec((Bp, ncp), lambda i: (0, 0)),
    )(gmax, *[pp[k] for k in _HEAD_KEYS])


# ----------------------------------------------------------------------------
# Deterministic parameter construction (mirrors the torch module)
# ----------------------------------------------------------------------------
class _Gen:
    def __init__(self, key):
        self.key, self.i = key, 0

    def nxt(self):
        self.i += 1
        return jax.random.fold_in(self.key, self.i)


def _w(g, shape, scale=0.05):
    return scale * jax.random.normal(g.nxt(), shape, dtype=jnp.float32)


def _bn(g, c, eps=1e-5):
    gamma = 1.0 + 0.1 * jax.random.normal(g.nxt(), (c,), dtype=jnp.float32)
    beta = 0.1 * jax.random.normal(g.nxt(), (c,), dtype=jnp.float32)
    mean = 0.1 * jax.random.normal(g.nxt(), (c,), dtype=jnp.float32)
    var = 1.0 + 0.1 * jax.random.uniform(g.nxt(), (c,), dtype=jnp.float32)
    scale = gamma / jnp.sqrt(var + eps)
    shift = beta - mean * scale
    return scale, shift


def _sa_params(g, c):
    return dict(
        wq=_w(g, (c, c // 4)),               # q_conv (== k_conv, weights tied, no bias)
        wv=_w(g, (c, c)), bv=_w(g, (c,)),    # v_conv (+bias)
        wt=_w(g, (c, c)), bt=_w(g, (c,)),    # trans_conv (+bias)
        bn=_bn(g, c),                        # after_norm
    )


def init_params(key, cfg):
    g = _Gen(key)
    H, nc, d = cfg["init_hidden_dim"], cfg["num_class"], cfg["input_dim"]
    C = 4 * H
    return dict(
        conv1_w=_w(g, (d, H)), bn1=_bn(g, H),
        conv2_w=_w(g, (H, H)), bn2=_bn(g, H),
        ds1_w=_w(g, (H, 2 * H)), ds1_bn=_bn(g, 2 * H),
        ds2_w=_w(g, (2 * H, 4 * H)), ds2_bn=_bn(g, 4 * H),
        pt_last=dict(
            conv1_w=_w(g, (C, C)), bn1=_bn(g, C),
            conv2_w=_w(g, (C, C)), bn2=_bn(g, C),
            sa1=_sa_params(g, C), sa2=_sa_params(g, C),
            sa3=_sa_params(g, C), sa4=_sa_params(g, C),
        ),
        fuse_w=_w(g, (20 * H, 16 * H)), fuse_bn=_bn(g, 16 * H),
        linear1_w=_w(g, (16 * H, 8 * H)), bn6=_bn(g, 8 * H),
        linear2_w=_w(g, (8 * H, 4 * H)), linear2_b=_w(g, (4 * H,)), bn7=_bn(g, 4 * H),
        linear3_w=_w(g, (4 * H, nc)), linear3_b=_w(g, (nc,)),
    )


def pack_params(p):
    """Fold BN scales into the matmul weights (columns) and BN shifts / biases into a
    single per-layer add; stack same-shape bias rows / weights; pad the classifier
    output to a 128-lane multiple; cast matmul operands to bf16."""
    f32, bf16 = jnp.float32, jnp.bfloat16
    row = lambda v: v.reshape(1, -1).astype(f32)
    fold = lambda w, bn: (w * bn[0][None, :]).astype(bf16)       # scale -> weight columns
    pt = p["pt_last"]
    sas = [pt[k] for k in ("sa1", "sa2", "sa3", "sa4")]

    nc = p["linear3_w"].shape[1]
    ncp = ((nc + 127) // 128) * 128
    w3p = jnp.zeros((p["linear3_w"].shape[0], ncp), f32).at[:, :nc].set(p["linear3_w"])
    b3p = jnp.zeros((1, ncp), f32).at[0, :nc].set(p["linear3_b"])

    return dict(
        # front-end (conv1/conv2/ds1/ds2), BN folded
        fe_w1=fold(p["conv1_w"], p["bn1"]),
        fe_w2=fold(p["conv2_w"], p["bn2"]),
        fe_w3=fold(p["ds1_w"], p["ds1_bn"]),
        fe_w4=fold(p["ds2_w"], p["ds2_bn"]),
        fe_b12=jnp.stack([row(p["bn1"][1]), row(p["bn2"][1])]),          # [2,1,H]
        fe_b3=row(p["ds1_bn"][1]),                                       # [1,2H]
        cb=jnp.stack([row(p["ds2_bn"][1]), row(pt["bn1"][1]), row(pt["bn2"][1])]),  # [3,1,C]
        # pt_last entry convs, BN folded, stacked
        pt_w12=jnp.stack([fold(pt["conv1_w"], pt["bn1"]),
                          fold(pt["conv2_w"], pt["bn2"])]),              # [2,C,C]
        # SA layers (stacked along leading axis of size 4); after_norm folded into wt/bt
        sa_wq=jnp.stack([s["wq"] for s in sas]).astype(bf16),
        sa_wv=jnp.stack([s["wv"] for s in sas]).astype(bf16),
        sa_bv=jnp.stack([row(s["bv"]) for s in sas]),
        sa_wt=jnp.stack([s["wt"] * s["bn"][0][None, :] for s in sas]).astype(bf16),
        sa_bt=jnp.stack([row(s["bt"] * s["bn"][0] + s["bn"][1]) for s in sas]),
        # conv_fuse (BN folded)
        fuse_w=fold(p["fuse_w"], p["fuse_bn"]),
        fuse_b=row(p["fuse_bn"][1]),
        # classifier head (BN folded; linear3 padded to 128 lanes)
        h_w1=fold(p["linear1_w"], p["bn6"]), h_b1=row(p["bn6"][1]),
        h_w2=fold(p["linear2_w"], p["bn7"]),
        h_b2=row(p["linear2_b"] * p["bn7"][0] + p["bn7"][1]),
        h_w3=w3p.astype(bf16), h_b3=b3p,
    )


# ----------------------------------------------------------------------------
# Full PCT forward (method = 'random')
# ----------------------------------------------------------------------------
def _choose_bb(B):
    if B <= 8:
        return B, B
    bb = 8
    return bb, ((B + bb - 1) // bb) * bb


def pct_forward(pp, x, *, n2, num_class, use_bf16_exp=True):
    # x: [B, N0, d_points] (same layout as the torch input before its permute).
    B, _, d = x.shape
    # TODO(synk): Random_Subsample_Feature source was not provided; stand-in =
    # deterministic "first npoint points" subsample + pointwise conv + BN + ReLU.
    # Because every front-end op is pointwise, it is only evaluated on survivors.
    bb, Bp = _choose_bb(B)
    x_sub = x[:, :n2, :]
    if Bp != B:
        x_sub = jnp.concatenate(
            [x_sub, jnp.zeros((Bp - B, n2, d), x_sub.dtype)], axis=0)
    x_flat = x_sub.reshape(Bp * n2, d).astype(jnp.bfloat16)

    gmax = pct_main(x_flat, pp, bb=bb, n=n2, use_bf16_exp=use_bf16_exp)  # [Bp, 16H]
    logits = pct_head(gmax, pp)                                          # [Bp, 128]
    return logits[:B, :num_class]


# ----------------------------------------------------------------------------
# Pure-JAX f32 reference of the torch forward (on the unpacked params)
# ----------------------------------------------------------------------------
def pct_reference(params, x, n2):
    bn = lambda t, sb: t * sb[0] + sb[1]
    h = x[:, :n2, :].astype(jnp.float32)
    h = jax.nn.relu(bn(h @ params["conv1_w"], params["bn1"]))
    h = jax.nn.relu(bn(h @ params["conv2_w"], params["bn2"]))
    h = jax.nn.relu(bn(h @ params["ds1_w"], params["ds1_bn"]))
    f1 = jax.nn.relu(bn(h @ params["ds2_w"], params["ds2_bn"]))
    pt = params["pt_last"]
    y = jax.nn.relu(bn(f1 @ pt["conv1_w"], pt["bn1"]))
    y = jax.nn.relu(bn(y @ pt["conv2_w"], pt["bn2"]))
    outs, xc = [], y
    for k in ("sa1", "sa2", "sa3", "sa4"):
        sa = pt[k]
        q = xc @ sa["wq"]
        e = jnp.einsum("bnd,bmd->bnm", q, q)
        att = jax.nn.softmax(e, axis=-1)
        att = att / (1e-9 + jnp.sum(att, axis=1, keepdims=True))
        v = xc @ sa["wv"] + sa["bv"]
        xr = jnp.einsum("bnm,bnc->bmc", att, v)
        t = (xc - xr) @ sa["wt"] + sa["bt"]
        xc = xc + jax.nn.relu(bn(t, sa["bn"]))
        outs.append(xc)
    cat = jnp.concatenate(outs + [f1], axis=-1)
    g = bn(cat @ params["fuse_w"], params["fuse_bn"])
    g = jnp.where(g > 0, g, 0.2 * g)
    gm = jnp.max(g, axis=1)
    h = jax.nn.relu(bn(gm @ params["linear1_w"], params["bn6"]))
    h = jax.nn.relu(bn(h @ params["linear2_w"] + params["linear2_b"], params["bn7"]))
    return h @ params["linear3_w"] + params["linear3_b"]


def _prefer_bf16_exp():
    # bf16 EUP exists on v6e / v7x; keep the softmax exp in f32 on v5 and older.
    try:
        kind = jax.devices()[0].device_kind.lower()
    except Exception:
        return True
    return not any(t in kind for t in ("v2", "v3", "v4", "v5"))


# ----------------------------------------------------------------------------
if __name__ == "__main__":
    cfg = dict(num_class=10, input_dim=3, init_hidden_dim=16, num_points=32,
               method="random")
    B = 2
    n2 = (cfg["num_points"] // 2) // 2          # surviving points after the two subsamples

    params = init_params(jax.random.PRNGKey(42), cfg)
    pp = pack_params(params)
    x = jax.random.normal(jax.random.PRNGKey(0),
                          (B, cfg["num_points"], cfg["input_dim"]),
                          dtype=jnp.float32)

    fwd = jax.jit(functools.partial(pct_forward, n2=n2,
                                    num_class=cfg["num_class"],
                                    use_bf16_exp=_prefer_bf16_exp()))
    logits = fwd(pp, x)
    jax.block_until_ready(logits)

    ref = pct_reference(params, x, n2)
    err = float(jnp.max(jnp.abs(logits - ref)))
    scale = float(jnp.max(jnp.abs(ref)))

    assert logits.shape == (B, cfg["num_class"])
    assert bool(jnp.all(jnp.isfinite(logits)))
    assert err <= 0.1 * scale + 0.03, (err, scale)
    print("KERNEL_OK")
</pallas_src>

<mosaic_0001>
module attributes {stable_mosaic.version = 11 : i64} {
  func.func @_pct_main_kernel(%arg0: i32, %arg1: memref<16x3xbf16, #tpu.memory_space<vmem>>, %arg2: memref<3x16xbf16, #tpu.memory_space<vmem>>, %arg3: memref<16x16xbf16, #tpu.memory_space<vmem>>, %arg4: memref<16x32xbf16, #tpu.memory_space<vmem>>, %arg5: memref<32x64xbf16, #tpu.memory_space<vmem>>, %arg6: memref<2x1x16xf32, #tpu.memory_space<vmem>>, %arg7: memref<1x32xf32, #tpu.memory_space<vmem>>, %arg8: memref<3x1x64xf32, #tpu.memory_space<vmem>>, %arg9: memref<2x64x64xbf16, #tpu.memory_space<vmem>>, %arg10: memref<4x64x16xbf16, #tpu.memory_space<vmem>>, %arg11: memref<4x64x64xbf16, #tpu.memory_space<vmem>>, %arg12: memref<4x1x64xf32, #tpu.memory_space<vmem>>, %arg13: memref<4x64x64xbf16, #tpu.memory_space<vmem>>, %arg14: memref<4x1x64xf32, #tpu.memory_space<vmem>>, %arg15: memref<320x256xbf16, #tpu.memory_space<vmem>>, %arg16: memref<1x256xf32, #tpu.memory_space<vmem>>, %arg17: memref<2x256xf32, #tpu.memory_space<vmem>>, %arg18: memref<16x64xf32, #tpu.memory_space<vmem>>, %arg19: memref<16x64xf32, #tpu.memory_space<vmem>>, %arg20: memref<16x256xf32, #tpu.memory_space<vmem>>) attributes {dimension_semantics = [#tpu.dimension_semantics<parallel>], iteration_bounds = array<i64: 1>, scalar_prefetch = 0 : i64, scratch_operands = 3 : i64, tpu.core_type = #tpu.core_type<tc>, window_params = [{transform_indices = @transform_0, window_bounds = array<i64: 16, 3>}, {pipeline_mode = #tpu.pipeline_mode<synchronous>, transform_indices = @transform_1, window_bounds = array<i64: 3, 16>}, {pipeline_mode = #tpu.pipeline_mode<synchronous>, transform_indices = @transform_2, window_bounds = array<i64: 16, 16>}, {pipeline_mode = #tpu.pipeline_mode<synchronous>, transform_indices = @transform_3, window_bounds = array<i64: 16, 32>}, {pipeline_mode = #tpu.pipeline_mode<synchronous>, transform_indices = @transform_4, window_bounds = array<i64: 32, 64>}, {pipeline_mode = #tpu.pipeline_mode<synchronous>, transform_indices = @transform_5, window_bounds = array<i64: 2, 1, 16>}, {pipeline_mode = #tpu.pipeline_mode<synchronous>, transform_indices = @transform_6, window_bounds = array<i64: 1, 32>}, {pipeline_mode = #tpu.pipeline_mode<synchronous>, transform_indices = @transform_7, window_bounds = array<i64: 3, 1, 64>}, {pipeline_mode = #tpu.pipeline_mode<synchronous>, transform_indices = @transform_8, window_bounds = array<i64: 2, 64, 64>}, {pipeline_mode = #tpu.pipeline_mode<synchronous>, transform_indices = @transform_9, window_bounds = array<i64: 4, 64, 16>}, {pipeline_mode = #tpu.pipeline_mode<synchronous>, transform_indices = @transform_10, window_bounds = array<i64: 4, 64, 64>}, {pipeline_mode = #tpu.pipeline_mode<synchronous>, transform_indices = @transform_11, window_bounds = array<i64: 4, 1, 64>}, {pipeline_mode = #tpu.pipeline_mode<synchronous>, transform_indices = @transform_12, window_bounds = array<i64: 4, 64, 64>}, {pipeline_mode = #tpu.pipeline_mode<synchronous>, transform_indices = @transform_13, window_bounds = array<i64: 4, 1, 64>}, {pipeline_mode = #tpu.pipeline_mode<synchronous>, transform_indices = @transform_14, window_bounds = array<i64: 320, 256>}, {pipeline_mode = #tpu.pipeline_mode<synchronous>, transform_indices = @transform_15, window_bounds = array<i64: 1, 256>}, {transform_indices = @transform_16, window_bounds = array<i64: 2, 256>}]} {
    %c0 = arith.constant 0 : index
    %c0_0 = arith.constant 0 : index
    %0 = vector.load %arg1[%c0, %c0_0] : memref<16x3xbf16, #tpu.memory_space<vmem>>, vector<16x3xbf16>
    %c0_1 = arith.constant 0 : index
    %c0_2 = arith.constant 0 : index
    %1 = vector.load %arg2[%c0_1, %c0_2] : memref<3x16xbf16, #tpu.memory_space<vmem>>, vector<3x16xbf16>
    %cst = arith.constant dense<0.000000e+00> : vector<16x16xf32>
    %2 = tpu.matmul %0, %1, %cst {dimension_numbers = #tpu.dot_dimension_numbers<[1], [0], [0], [1], [0, 0, 1, 1], [], []>} : vector<16x3xbf16>, vector<3x16xbf16>, vector<16x16xf32> -> vector<16x16xf32>
    %c0_3 = arith.constant 0 : index
    %c0_4 = arith.constant 0 : index
    %c0_5 = arith.constant 0 : index
    %3 = vector.load %arg6[%c0_3, %c0_4, %c0_5] : memref<2x1x16xf32, #tpu.memory_space<vmem>>, vector<1x1x16xf32>
    %4 = vector.shape_cast %3 : vector<1x1x16xf32> to vector<1x16xf32>
    %5 = vector.broadcast %4 : vector<1x16xf32> to vector<16x16xf32>
    %6 = arith.addf %2, %5 : vector<16x16xf32>
    %cst_6 = arith.constant 0.000000e+00 : f32
    %7 = vector.broadcast %cst_6 : f32 to vector<16x16xf32>
    %8 = arith.maximumf %6, %7 : vector<16x16xf32>
    %9 = arith.truncf %8 : vector<16x16xf32> to vector<16x16xbf16>
    %c0_7 = arith.constant 0 : index
    %c0_8 = arith.constant 0 : index
    %10 = vector.load %arg3[%c0_7, %c0_8] : memref<16x16xbf16, #tpu.memory_space<vmem>>, vector<16x16xbf16>
    %cst_9 = arith.constant dense<0.000000e+00> : vector<16x16xf32>
    %11 = tpu.matmul %9, %10, %cst_9 {dimension_numbers = #tpu.dot_dimension_numbers<[1], [0], [0], [1], [0, 0, 1, 1], [], []>} : vector<16x16xbf16>, vector<16x16xbf16>, vector<16x16xf32> -> vector<16x16xf32>
    %c1 = arith.constant 1 : index
    %c0_10 = arith.constant 0 : index
    %c0_11 = arith.constant 0 : index
    %12 = vector.load %arg6[%c1, %c0_10, %c0_11] : memref<2x1x16xf32, #tpu.memory_space<vmem>>, vector<1x1x16xf32>
    %13 = vector.shape_cast %12 : vector<1x1x16xf32> to vector<1x16xf32>
    %14 = vector.broadcast %13 : vector<1x16xf32> to vector<16x16xf32>
    %15 = arith.addf %11, %14 : vector<16x16xf32>
    %cst_12 = arith.constant 0.000000e+00 : f32
    %16 = vector.broadcast %cst_12 : f32 to vector<16x16xf32>
    %17 = arith.maximumf %15, %16 : vector<16x16xf32>
    %18 = arith.truncf %17 : vector<16x16xf32> to vector<16x16xbf16>
    %c0_13 = arith.constant 0 : index
    %c0_14 = arith.constant 0 : index
    %19 = vector.load %arg4[%c0_13, %c0_14] : memref<16x32xbf16, #tpu.memory_space<vmem>>, vector<16x32xbf16>
    %cst_15 = arith.constant dense<0.000000e+00> : vector<16x32xf32>
    %20 = tpu.matmul %18, %19, %cst_15 {dimension_numbers = #tpu.dot_dimension_numbers<[1], [0], [0], [1], [0, 0, 1, 1], [], []>} : vector<16x16xbf16>, vector<16x32xbf16>, vector<16x32xf32> -> vector<16x32xf32>
    %c0_16 = arith.constant 0 : index
    %c0_17 = arith.constant 0 : index
    %21 = vector.load %arg7[%c0_16, %c0_17] : memref<1x32xf32, #tpu.memory_space<vmem>>, vector<1x32xf32>
    %22 = vector.broadcast %21 : vector<1x32xf32> to vector<16x32xf32>
    %23 = arith.addf %20, %22 : vector<16x32xf32>
    %cst_18 = arith.constant 0.000000e+00 : f32
    %24 = vector.broadcast %cst_18 : f32 to vector<16x32xf32>
    %25 = arith.maximumf %23, %24 : vector<16x32xf32>
    %26 = arith.truncf %25 : vector<16x32xf32> to vector<16x32xbf16>
    %c0_19 = arith.constant 0 : index
    %c0_20 = arith.constant 0 : index
    %27 = vector.load %arg5[%c0_19, %c0_20] : memref<32x64xbf16, #tpu.memory_space<vmem>>, vector<32x64xbf16>
    %cst_21 = arith.constant dense<0.000000e+00> : vector<16x64xf32>
    %28 = tpu.matmul %26, %27, %cst_21 {dimension_numbers = #tpu.dot_dimension_numbers<[1], [0], [0], [1], [0, 0, 1, 1], [], []>} : vector<16x32xbf16>, vector<32x64xbf16>, vector<16x64xf32> -> vector<16x64xf32>
    %c0_22 = arith.constant 0 : index
    %c0_23 = arith.constant 0 : index
    %c0_24 = arith.constant 0 : index
    %29 = vector.load %arg8[%c0_22, %c0_23, %c0_24] : memref<3x1x64xf32, #tpu.memory_space<vmem>>, vector<1x1x64xf32>
    %30 = vector.shape_cast %29 : vector<1x1x64xf32> to vector<1x64xf32>
    %31 = vector.broadcast %30 : vector<1x64xf32> to vector<16x64xf32>
    %32 = arith.addf %28, %31 : vector<16x64xf32>
    %cst_25 = arith.constant 0.000000e+00 : f32
    %33 = vector.broadcast %cst_25 : f32 to vector<16x64xf32>
    %34 = arith.maximumf %32, %33 : vector<16x64xf32>
    %35 = arith.truncf %34 : vector<16x64xf32> to vector<16x64xbf16>
    %c256 = arith.constant 256 : index
    %c0_26 = arith.constant 0 : index
    %36 = vector.load %arg15[%c256, %c0_26] : memref<320x256xbf16, #tpu.memory_space<vmem>>, vector<64x256xbf16>
    %cst_27 = arith.constant dense<0.000000e+00> : vector<16x256xf32>
    %37 = tpu.matmul %35, %36, %cst_27 {dimension_numbers = #tpu.dot_dimension_numbers<[1], [0], [0], [1], [0, 0, 1, 1], [], []>} : vector<16x64xbf16>, vector<64x256xbf16>, vector<16x256xf32> -> vector<16x256xf32>
    %c0_28 = arith.constant 0 : index
    %c0_29 = arith.constant 0 : index
    %38 = vector.load %arg20[%c0_28, %c0_29] : memref<16x256xf32, #tpu.memory_space<vmem>>, vector<16x256xf32>
    tpu.vector_store %arg20[%c0_28, %c0_29], %37 {strides = array<i32>} : memref<16x256xf32, #tpu.memory_space<vmem>>, vector<16x256xf32>,
    %c0_30 = arith.constant 0 : index
    %c0_31 = arith.constant 0 : index
    %c0_32 = arith.constant 0 : index
    %39 = vector.load %arg9[%c0_30, %c0_31, %c0_32] : memref<2x64x64xbf16, #tpu.memory_space<vmem>>, vector<1x64x64xbf16>
    %40 = vector.shape_cast %39 : vector<1x64x64xbf16> to vector<64x64xbf16>
    %cst_33 = arith.constant dense<0.000000e+00> : vector<16x64xf32>
    %41 = tpu.matmul %35, %40, %cst_33 {dimension_numbers = #tpu.dot_dimension_numbers<[1], [0], [0], [1], [0, 0, 1, 1], [], []>} : vector<16x64xbf16>, vector<64x64xbf16>, vector<16x64xf32> -> vector<16x64xf32>
    %c1_34 = arith.constant 1 : index
    %c0_35 = arith.constant 0 : index
    %c0_36 = arith.constant 0 : index
    %42 = vector.load %arg8[%c1_34, %c0_35, %c0_36] : memref<3x1x64xf32, #tpu.memory_space<vmem>>, vector<1x1x64xf32>
    %43 = vector.shape_cast %42 : vector<1x1x64xf32> to vector<1x64xf32>
    %44 = vector.broadcast %43 : vector<1x64xf32> to vector<16x64xf32>
    %45 = arith.addf %41, %44 : vector<16x64xf32>
    %cst_37 = arith.constant 0.000000e+00 : f32
    %46 = vector.broadcast %cst_37 : f32 to vector<16x64xf32>
    %47 = arith.maximumf %45, %46 : vector<16x64xf32>
    %48 = arith.truncf %47 : vector<16x64xf32> to vector<16x64xbf16>
    %c1_38 = arith.constant 1 : index
    %c0_39 = arith.constant 0 : index
    %c0_40 = arith.constant 0 : index
    %49 = vector.load %arg9[%c1_38, %c0_39, %c0_40] : memref<2x64x64xbf16, #tpu.memory_space<vmem>>, vector<1x64x64xbf16>
    %50 = vector.shape_cast %49 : vector<1x64x64xbf16> to vector<64x64xbf16>
    %cst_41 = arith.constant dense<0.000000e+00> : vector<16x64xf32>
    %51 = tpu.matmul %48, %50, %cst_41 {dimension_numbers = #tpu.dot_dimension_numbers<[1], [0], [0], [1], [0, 0, 1, 1], [], []>} : vector<16x64xbf16>, vector<64x64xbf16>, vector<16x64xf32> -> vector<16x64xf32>
    %c2 = arith.constant 2 : index
    %c0_42 = arith.constant 0 : index
    %c0_43 = arith.constant 0 : index
    %52 = vector.load %arg8[%c2, %c0_42, %c0_43] : memref<3x1x64xf32, #tpu.memory_space<vmem>>, vector<1x1x64xf32>
    %53 = vector.shape_cast %52 : vector<1x1x64xf32> to vector<1x64xf32>
    %54 = vector.broadcast %53 : vector<1x64xf32> to vector<16x64xf32>
    %55 = arith.addf %51, %54 : vector<16x64xf32>
    %cst_44 = arith.constant 0.000000e+00 : f32
    %56 = vector.broadcast %cst_44 : f32 to vector<16x64xf32>
    %57 = arith.maximumf %55, %56 : vector<16x64xf32>
    %c0_45 = arith.constant 0 : index
    %c0_46 = arith.constant 0 : index
    %58 = vector.load %arg18[%c0_45, %c0_46] : memref<16x64xf32, #tpu.memory_space<vmem>>, vector<16x64xf32>
    tpu.vector_store %arg18[%c0_45, %c0_46], %57 {strides = array<i32>} : memref<16x64xf32, #tpu.memory_space<vmem>>, vector<16x64xf32>,
    %c0_47 = arith.constant 0 : index
    %c0_48 = arith.constant 0 : index
    %59 = vector.load %arg18[%c0_47, %c0_48] : memref<16x64xf32, #tpu.memory_space<vmem>>, vector<16x64xf32>
    %60 = arith.truncf %59 : vector<16x64xf32> to vector<16x64xbf16>
    %c0_49 = arith.constant 0 : index
    %c0_50 = arith.constant 0 : index
    %c0_51 = arith.constant 0 : index
    %61 = vector.load %arg10[%c0_49, %c0_50, %c0_51] : memref<4x64x16xbf16, #tpu.memory_space<vmem>>, vector<1x64x16xbf16>
    %62 = vector.shape_cast %61 : vector<1x64x16xbf16> to vector<64x16xbf16>
    %cst_52 = arith.constant dense<0.000000e+00> : vector<16x16xf32>
    %63 = tpu.matmul %60, %62, %cst_52 {dimension_numbers = #tpu.dot_dimension_numbers<[1], [0], [0], [1], [0, 0, 1, 1], [], []>} : vector<16x64xbf16>, vector<64x16xbf16>, vector<16x16xf32> -> vector<16x16xf32>
    %64 = arith.truncf %63 : vector<16x16xf32> to vector<16x16xbf16>
    %c0_53 = arith.constant 0 : index
    %c0_54 = arith.constant 0 : index
    %c0_55 = arith.constant 0 : index
    %65 = vector.load %arg11[%c0_53, %c0_54, %c0_55] : memref<4x64x64xbf16, #tpu.memory_space<vmem>>, vector<1x64x64xbf16>
    %66 = vector.shape_cast %65 : vector<1x64x64xbf16> to vector<64x64xbf16>
    %cst_56 = arith.constant dense<0.000000e+00> : vector<16x64xf32>
    %67 = tpu.matmul %60, %66, %cst_56 {dimension_numbers = #tpu.dot_dimension_numbers<[1], [0], [0], [1], [0, 0, 1, 1], [], []>} : vector<16x64xbf16>, vector<64x64xbf16>, vector<16x64xf32> -> vector<16x64xf32>
    %c0_57 = arith.constant 0 : index
    %c0_58 = arith.constant 0 : index
    %c0_59 = arith.constant 0 : index
    %68 = vector.load %arg12[%c0_57, %c0_58, %c0_59] : memref<4x1x64xf32, #tpu.memory_space<vmem>>, vector<1x1x64xf32>
    %69 = vector.shape_cast %68 : vector<1x1x64xf32> to vector<1x64xf32>
    %70 = vector.broadcast %69 : vector<1x64xf32> to vector<16x64xf32>
    %71 = arith.addf %67, %70 : vector<16x64xf32>
    %72 = arith.truncf %71 : vector<16x64xf32> to vector<16x64xbf16>
    %73 = vector.extract_strided_slice %64 {offsets = [0, 0], sizes = [8, 16], strides = [1, 1]} : vector<16x16xbf16> to vector<8x16xbf16>
    %cst_60 = arith.constant dense<0.000000e+00> : vector<8x8xf32>
    %74 = tpu.matmul %73, %73, %cst_60 {dimension_numbers = #tpu.dot_dimension_numbers<[1], [1], [0], [0], [0, 0, 1, 0], [], []>} : vector<8x16xbf16>, vector<8x16xbf16>, vector<8x8xf32> -> vector<8x8xf32>
    %cst_61 = arith.constant dense<0xFF800000> : vector<8xf32>
    %75 = vector.multi_reduction <maximumf>, %74, %cst_61 [0] : vector<8x8xf32> to vector<8xf32>
    %76 = vector.shape_cast %75 : vector<8xf32> to vector<1x8xf32>
    %77 = vector.broadcast %76 : vector<1x8xf32> to vector<8x8xf32>
    %78 = arith.subf %74, %77 : vector<8x8xf32>
    %79 = arith.truncf %78 : vector<8x8xf32> to vector<8x8xbf16>
    %80 = math.exp %79 : vector<8x8xbf16>
    %81 = arith.extf %80 : vector<8x8xbf16> to vector<8x8xf32>
    %cst_62 = arith.constant dense<0.000000e+00> : vector<8xf32>
    %82 = vector.multi_reduction <add>, %81, %cst_62 [0] : vector<8x8xf32> to vector<8xf32>
    %83 = vector.shape_cast %82 : vector<8xf32> to vector<1x8xf32>
    %84 = tpu.reciprocal %83 {approx = true} : vector<1x8xf32> -> vector<1x8xf32>
    %85 = arith.truncf %84 : vector<1x8xf32> to vector<1x8xbf16>
    %86 = vector.broadcast %85 : vector<1x8xbf16> to vector<8x8xbf16>
    %87 = arith.mulf %80, %86 : vector<8x8xbf16>
    %88 = arith.extf %87 : vector<8x8xbf16> to vector<8x8xf32>
    %cst_63 = arith.constant dense<0.000000e+00> : vector<8xf32>
    %89 = vector.multi_reduction <add>, %88, %cst_63 [1] : vector<8x8xf32> to vector<8xf32>
    %90 = vector.shape_cast %89 : vector<8xf32> to vector<8x1xf32>
    %cst_64 = arith.constant 9.99999971E-10 : f32
    %91 = vector.broadcast %cst_64 : f32 to vector<8x1xf32>
    %92 = arith.addf %90, %91 : vector<8x1xf32>
    %93 = tpu.reciprocal %92 {approx = true} : vector<8x1xf32> -> vector<8x1xf32>
    %94 = vector.extract_strided_slice %72 {offsets = [0, 0], sizes = [8, 64], strides = [1, 1]} : vector<16x64xbf16> to vector<8x64xbf16>
    %cst_65 = arith.constant dense<0.000000e+00> : vector<8x64xf32>
    %95 = tpu.matmul %87, %94, %cst_65 {dimension_numbers = #tpu.dot_dimension_numbers<[1], [0], [0], [1], [0, 0, 1, 1], [], []>} : vector<8x8xbf16>, vector<8x64xbf16>, vector<8x64xf32> -> vector<8x64xf32>
    %96 = vector.broadcast %93 : vector<8x1xf32> to vector<8x64xf32>
    %97 = arith.mulf %95, %96 : vector<8x64xf32>
    %c0_66 = arith.constant 0 : index
    %c0_67 = arith.constant 0 : index
    %98 = vector.load %arg19[%c0_66, %c0_67] : memref<16x64xf32, #tpu.memory_space<vmem>>, vector<8x64xf32>
    tpu.vector_store %arg19[%c0_66, %c0_67], %97 {strides = array<i32>} : memref<16x64xf32, #tpu.memory_space<vmem>>, vector<8x64xf32>,
    %99 = vector.extract_strided_slice %64 {offsets = [8, 0], sizes = [8, 16], strides = [1, 1]} : vector<16x16xbf16> to vector<8x16xbf16>
    %cst_68 = arith.constant dense<0.000000e+00> : vector<8x8xf32>
    %100 = tpu.matmul %99, %99, %cst_68 {dimension_numbers = #tpu.dot_dimension_numbers<[1], [1], [0], [0], [0, 0, 1, 0], [], []>} : vector<8x16xbf16>, vector<8x16xbf16>, vector<8x8xf32> -> vector<8x8xf32>
    %cst_69 = arith.constant dense<0xFF800000> : vector<8xf32>
    %101 = vector.multi_reduction <maximumf>, %100, %cst_69 [0] : vector<8x8xf32> to vector<8xf32>
    %102 = vector.shape_cast %101 : vector<8xf32> to vector<1x8xf32>
    %103 = vector.broadcast %102 : vector<1x8xf32> to vector<8x8xf32>
    %104 = arith.subf %100, %103 : vector<8x8xf32>
    %105 = arith.truncf %104 : vector<8x8xf32> to vector<8x8xbf16>
    %106 = math.exp %105 : vector<8x8xbf16>
    %107 = arith.extf %106 : vector<8x8xbf16> to vector<8x8xf32>
    %cst_70 = arith.constant dense<0.000000e+00> : vector<8xf32>
    %108 = vector.multi_reduction <add>, %107, %cst_70 [0] : vector<8x8xf32> to vector<8xf32>
    %109 = vector.shape_cast %108 : vector<8xf32> to vector<1x8xf32>
    %110 = tpu.reciprocal %109 {approx = true} : vector<1x8xf32> -> vector<1x8xf32>
    %111 = arith.truncf %110 : vector<1x8xf32> to vector<1x8xbf16>
    %112 = vector.broadcast %111 : vector<1x8xbf16> to vector<8x8xbf16>
    %113 = arith.mulf %106, %112 : vector<8x8xbf16>
    %114 = arith.extf %113 : vector<8x8xbf16> to vector<8x8xf32>
    %cst_71 = arith.constant dense<0.000000e+00> : vector<8xf32>
    %115 = vector.multi_reduction <add>, %114, %cst_71 [1] : vector<8x8xf32> to vector<8xf32>
    %116 = vector.shape_cast %115 : vector<8xf32> to vector<8x1xf32>
    %cst_72 = arith.constant 9.99999971E-10 : f32
    %117 = vector.broadcast %cst_72 : f32 to vector<8x1xf32>
    %118 = arith.addf %116, %117 : vector<8x1xf32>
    %119 = tpu.reciprocal %118 {approx = true} : vector<8x1xf32> -> vector<8x1xf32>
    %120 = vector.extract_strided_slice %72 {offsets = [8, 0], sizes = [8, 64], strides = [1, 1]} : vector<16x64xbf16> to vector<8x64xbf16>
    %cst_73 = arith.constant dense<0.000000e+00> : vector<8x64xf32>
    %121 = tpu.matmul %113, %120, %cst_73 {dimension_numbers = #tpu.dot_dimension_numbers<[1], [0], [0], [1], [0, 0, 1, 1], [], []>} : vector<8x8xbf16>, vector<8x64xbf16>, vector<8x64xf32> -> vector<8x64xf32>
    %122 = vector.broadcast %119 : vector<8x1xf32> to vector<8x64xf32>
    %123 = arith.mulf %121, %122 : vector<8x64xf32>
    %c8 = arith.constant 8 : index
    %c0_74 = arith.constant 0 : index
    %124 = vector.load %arg19[%c8, %c0_74] : memref<16x64xf32, #tpu.memory_space<vmem>>, vector<8x64xf32>
    tpu.vector_store %arg19[%c8, %c0_74], %123 {strides = array<i32>} : memref<16x64xf32, #tpu.memory_space<vmem>>, vector<8x64xf32>,
    %c0_75 = arith.constant 0 : index
    %c0_76 = arith.constant 0 : index
    %125 = vector.load %arg19[%c0_75, %c0_76] : memref<16x64xf32, #tpu.memory_space<vmem>>, vector<16x64xf32>
    %126 = arith.subf %59, %125 : vector<16x64xf32>
    %127 = arith.truncf %126 : vector<16x64xf32> to vector<16x64xbf16>
    %c0_77 = arith.constant 0 : index
    %c0_78 = arith.constant 0 : index
    %c0_79 = arith.constant 0 : index
    %128 = vector.load %arg13[%c0_77, %c0_78, %c0_79] : memref<4x64x64xbf16, #tpu.memory_space<vmem>>, vector<1x64x64xbf16>
    %129 = vector.shape_cast %128 : vector<1x64x64xbf16> to vector<64x64xbf16>
    %cst_80 = arith.constant dense<0.000000e+00> : vector<16x64xf32>
    %130 = tpu.matmul %127, %129, %cst_80 {dimension_numbers = #tpu.dot_dimension_numbers<[1], [0], [0], [1], [0, 0, 1, 1], [], []>} : vector<16x64xbf16>, vector<64x64xbf16>, vector<16x64xf32> -> vector<16x64xf32>
    %c0_81 = arith.constant 0 : index
    %c0_82 = arith.constant 0 : index
    %c0_83 = arith.constant 0 : index
    %131 = vector.load %arg14[%c0_81, %c0_82, %c0_83] : memref<4x1x64xf32, #tpu.memory_space<vmem>>, vector<1x1x64xf32>
    %132 = vector.shape_cast %131 : vector<1x1x64xf32> to vector<1x64xf32>
    %133 = vector.broadcast %132 : vector<1x64xf32> to vector<16x64xf32>
    %134 = arith.addf %130, %133 : vector<16x64xf32>
    %cst_84 = arith.constant 0.000000e+00 : f32
    %135 = vector.broadcast %cst_84 : f32 to vector<16x64xf32>
    %136 = arith.maximumf %134, %135 : vector<16x64xf32>
    %137 = arith.addf %59, %136 : vector<16x64xf32>
    %c0_85 = arith.constant 0 : index
    %c0_86 = arith.constant 0 : index
    %138 = vector.load %arg18[%c0_85, %c0_86] : memref<16x64xf32, #tpu.memory_space<vmem>>, vector<16x64xf32>
    tpu.vector_store %arg18[%c0_85, %c0_86], %137 {strides = array<i32>} : memref<16x64xf32, #tpu.memory_space<vmem>>, vector<16x64xf32>,
    %c0_87 = arith.constant 0 : index
    %c0_88 = arith.constant 0 : index
    %139 = vector.load %arg20[%c0_87, %c0_88] : memref<16x256xf32, #tpu.memory_space<vmem>>, vector<16x256xf32>
    %140 = arith.truncf %137 : vector<16x64xf32> to vector<16x64xbf16>
    %c0_89 = arith.constant 0 : index
    %c0_90 = arith.constant 0 : index
    %141 = vector.load %arg15[%c0_89, %c0_90] : memref<320x256xbf16, #tpu.memory_space<vmem>>, vector<64x256xbf16>
    %cst_91 = arith.constant dense<0.000000e+00> : vector<16x256xf32>
    %142 = tpu.matmul %140, %141, %cst_91 {dimension_numbers = #tpu.dot_dimension_numbers<[1], [0], [0], [1], [0, 0, 1, 1], [], []>} : vector<16x64xbf16>, vector<64x256xbf16>, vector<16x256xf32> -> vector<16x256xf32>
    %143 = arith.addf %139, %142 : vector<16x256xf32>
    %c0_92 = arith.constant 0 : index
    %c0_93 = arith.constant 0 : index
    %144 = vector.load %arg20[%c0_92, %c0_93] : memref<16x256xf32, #tpu.memory_space<vmem>>, vector<16x256xf32>
    tpu.vector_store %arg20[%c0_92, %c0_93], %143 {strides = array<i32>} : memref<16x256xf32, #tpu.memory_space<vmem>>, vector<16x256xf32>,
    %c0_94 = arith.constant 0 : index
    %c0_95 = arith.constant 0 : index
    %145 = vector.load %arg18[%c0_94, %c0_95] : memref<16x64xf32, #tpu.memory_space<vmem>>, vector<16x64xf32>
    %146 = arith.truncf %145 : vector<16x64xf32> to vector<16x64xbf16>
    %c1_96 = arith.constant 1 : index
    %c0_97 = arith.constant 0 : index
    %c0_98 = arith.constant 0 : index
    %147 = vector.load %arg10[%c1_96, %c0_97, %c0_98] : memref<4x64x16xbf16, #tpu.memory_space<vmem>>, vector<1x64x16xbf16>
    %148 = vector.shape_cast %147 : vector<1x64x16xbf16> to vector<64x16xbf16>
    %cst_99 = arith.constant dense<0.000000e+00> : vector<16x16xf32>
    %149 = tpu.matmul %146, %148, %cst_99 {dimension_numbers = #tpu.dot_dimension_numbers<[1], [0], [0], [1], [0, 0, 1, 1], [], []>} : vector<16x64xbf16>, vector<64x16xbf16>, vector<16x16xf32> -> vector<16x16xf32>
    %150 = arith.truncf %149 : vector<16x16xf32> to vector<16x16xbf16>
    %c1_100 = arith.constant 1 : index
    %c0_101 = arith.constant 0 : index
    %c0_102 = arith.constant 0 : index
    %151 = vector.load %arg11[%c1_100, %c0_101, %c0_102] : memref<4x64x64xbf16, #tpu.memory_space<vmem>>, vector<1x64x64xbf16>
    %152 = vector.shape_cast %151 : vector<1x64x64xbf16> to vector<64x64xbf16>
    %cst_103 = arith.constant dense<0.000000e+00> : vector<16x64xf32>
    %153 = tpu.matmul %146, %152, %cst_103 {dimension_numbers = #tpu.dot_dimension_numbers<[1], [0], [0], [1], [0, 0, 1, 1], [], []>} : vector<16x64xbf16>, vector<64x64xbf16>, vector<16x64xf32> -> vector<16x64xf32>
    %c1_104 = arith.constant 1 : index
    %c0_105 = arith.constant 0 : index
    %c0_106 = arith.constant 0 : index
    %154 = vector.load %arg12[%c1_104, %c0_105, %c0_106] : memref<4x1x64xf32, #tpu.memory_space<vmem>>, vector<1x1x64xf32>
    %155 = vector.shape_cast %154 : vector<1x1x64xf32> to vector<1x64xf32>
    %156 = vector.broadcast %155 : vector<1x64xf32> to vector<16x64xf32>
    %157 = arith.addf %153, %156 : vector<16x64xf32>
    %158 = arith.truncf %157 : vector<16x64xf32> to vector<16x64xbf16>
    %159 = vector.extract_strided_slice %150 {offsets = [0, 0], sizes = [8, 16], strides = [1, 1]} : vector<16x16xbf16> to vector<8x16xbf16>
    %cst_107 = arith.constant dense<0.000000e+00> : vector<8x8xf32>
    %160 = tpu.matmul %159, %159, %cst_107 {dimension_numbers = #tpu.dot_dimension_numbers<[1], [1], [0], [0], [0, 0, 1, 0], [], []>} : vector<8x16xbf16>, vector<8x16xbf16>, vector<8x8xf32> -> vector<8x8xf32>
    %cst_108 = arith.constant dense<0xFF800000> : vector<8xf32>
    %161 = vector.multi_reduction <maximumf>, %160, %cst_108 [0] : vector<8x8xf32> to vector<8xf32>
    %162 = vector.shape_cast %161 : vector<8xf32> to vector<1x8xf32>
    %163 = vector.broadcast %162 : vector<1x8xf32> to vector<8x8xf32>
    %164 = arith.subf %160, %163 : vector<8x8xf32>
    %165 = arith.truncf %164 : vector<8x8xf32> to vector<8x8xbf16>
    %166 = math.exp %165 : vector<8x8xbf16>
    %167 = arith.extf %166 : vector<8x8xbf16> to vector<8x8xf32>
    %cst_109 = arith.constant dense<0.000000e+00> : vector<8xf32>
    %168 = vector.multi_reduction <add>, %167, %cst_109 [0] : vector<8x8xf32> to vector<8xf32>
    %169 = vector.shape_cast %168 : vector<8xf32> to vector<1x8xf32>
    %170 = tpu.reciprocal %169 {approx = true} : vector<1x8xf32> -> vector<1x8xf32>
    %171 = arith.truncf %170 : vector<1x8xf32> to vector<1x8xbf16>
    %172 = vector.broadcast %171 : vector<1x8xbf16> to vector<8x8xbf16>
    %173 = arith.mulf %166, %172 : vector<8x8xbf16>
    %174 = arith.extf %173 : vector<8x8xbf16> to vector<8x8xf32>
    %cst_110 = arith.constant dense<0.000000e+00> : vector<8xf32>
    %175 = vector.multi_reduction <add>, %174, %cst_110 [1] : vector<8x8xf32> to vector<8xf32>
    %176 = vector.shape_cast %175 : vector<8xf32> to vector<8x1xf32>
    %cst_111 = arith.constant 9.99999971E-10 : f32
    %177 = vector.broadcast %cst_111 : f32 to vector<8x1xf32>
    %178 = arith.addf %176, %177 : vector<8x1xf32>
    %179 = tpu.reciprocal %178 {approx = true} : vector<8x1xf32> -> vector<8x1xf32>
    %180 = vector.extract_strided_slice %158 {offsets = [0, 0], sizes = [8, 64], strides = [1, 1]} : vector<16x64xbf16> to vector<8x64xbf16>
    %cst_112 = arith.constant dense<0.000000e+00> : vector<8x64xf32>
    %181 = tpu.matmul %173, %180, %cst_112 {dimension_numbers = #tpu.dot_dimension_numbers<[1], [0], [0], [1], [0, 0, 1, 1], [], []>} : vector<8x8xbf16>, vector<8x64xbf16>, vector<8x64xf32> -> vector<8x64xf32>
    %182 = vector.broadcast %179 : vector<8x1xf32> to vector<8x64xf32>
    %183 = arith.mulf %181, %182 : vector<8x64xf32>
    %c0_113 = arith.constant 0 : index
    %c0_114 = arith.constant 0 : index
    %184 = vector.load %arg19[%c0_113, %c0_114] : memref<16x64xf32, #tpu.memory_space<vmem>>, vector<8x64xf32>
    tpu.vector_store %arg19[%c0_113, %c0_114], %183 {strides = array<i32>} : memref<16x64xf32, #tpu.memory_space<vmem>>, vector<8x64xf32>,
    %185 = vector.extract_strided_slice %150 {offsets = [8, 0], sizes = [8, 16], strides = [1, 1]} : vector<16x16xbf16> to vector<8x16xbf16>
    %cst_115 = arith.constant dense<0.000000e+00> : vector<8x8xf32>
    %186 = tpu.matmul %185, %185, %cst_115 {dimension_numbers = #tpu.dot_dimension_numbers<[1], [1], [0], [0], [0, 0, 1, 0], [], []>} : vector<8x16xbf16>, vector<8x16xbf16>, vector<8x8xf32> -> vector<8x8xf32>
    %cst_116 = arith.constant dense<0xFF800000> : vector<8xf32>
    %187 = vector.multi_reduction <maximumf>, %186, %cst_116 [0] : vector<8x8xf32> to vector<8xf32>
    %188 = vector.shape_cast %187 : vector<8xf32> to vector<1x8xf32>
    %189 = vector.broadcast %188 : vector<1x8xf32> to vector<8x8xf32>
    %190 = arith.subf %186, %189 : vector<8x8xf32>
    %191 = arith.truncf %190 : vector<8x8xf32> to vector<8x8xbf16>
    %192 = math.exp %191 : vector<8x8xbf16>
    %193 = arith.extf %192 : vector<8x8xbf16> to vector<8x8xf32>
    %cst_117 = arith.constant dense<0.000000e+00> : vector<8xf32>
    %194 = vector.multi_reduction <add>, %193, %cst_117 [0] : vector<8x8xf32> to vector<8xf32>
    %195 = vector.shape_cast %194 : vector<8xf32> to vector<1x8xf32>
    %196 = tpu.reciprocal %195 {approx = true} : vector<1x8xf32> -> vector<1x8xf32>
    %197 = arith.truncf %196 : vector<1x8xf32> to vector<1x8xbf16>
    %198 = vector.broadcast %197 : vector<1x8xbf16> to vector<8x8xbf16>
    %199 = arith.mulf %192, %198 : vector<8x8xbf16>
    %200 = arith.extf %199 : vector<8x8xbf16> to vector<8x8xf32>
    %cst_118 = arith.constant dense<0.000000e+00> : vector<8xf32>
    %201 = vector.multi_reduction <add>, %200, %cst_118 [1] : vector<8x8xf32> to vector<8xf32>
    %202 = vector.shape_cast %201 : vector<8xf32> to vector<8x1xf32>
    %cst_119 = arith.constant 9.99999971E-10 : f32
    %203 = vector.broadcast %cst_119 : f32 to vector<8x1xf32>
    %204 = arith.addf %202, %203 : vector<8x1xf32>
    %205 = tpu.reciprocal %204 {approx = true} : vector<8x1xf32> -> vector<8x1xf32>
    %206 = vector.extract_strided_slice %158 {offsets = [8, 0], sizes = [8, 64], strides = [1, 1]} : vector<16x64xbf16> to vector<8x64xbf16>
    %cst_120 = arith.constant dense<0.000000e+00> : vector<8x64xf32>
    %207 = tpu.matmul %199, %206, %cst_120 {dimension_numbers = #tpu.dot_dimension_numbers<[1], [0], [0], [1], [0, 0, 1, 1], [], []>} : vector<8x8xbf16>, vector<8x64xbf16>, vector<8x64xf32> -> vector<8x64xf32>
    %208 = vector.broadcast %205 : vector<8x1xf32> to vector<8x64xf32>
    %209 = arith.mulf %207, %208 : vector<8x64xf32>
    %c8_121 = arith.constant 8 : index
    %c0_122 = arith.constant 0 : index
    %210 = vector.load %arg19[%c8_121, %c0_122] : memref<16x64xf32, #tpu.memory_space<vmem>>, vector<8x64xf32>
    tpu.vector_store %arg19[%c8_121, %c0_122], %209 {strides = array<i32>} : memref<16x64xf32, #tpu.memory_space<vmem>>, vector<8x64xf32>,
    %c0_123 = arith.constant 0 : index
    %c0_124 = arith.constant 0 : index
    %211 = vector.load %arg19[%c0_123, %c0_124] : memref<16x64xf32, #tpu.memory_space<vmem>>, vector<16x64xf32>
    %212 = arith.subf %145, %211 : vector<16x64xf32>
    %213 = arith.truncf %212 : vector<16x64xf32> to vector<16x64xbf16>
    %c1_125 = arith.constant 1 : index
    %c0_126 = arith.constant 0 : index
    %c0_127 = arith.constant 0 : index
    %214 = vector.load %arg13[%c1_125, %c0_126, %c0_127] : memref<4x64x64xbf16, #tpu.memory_space<vmem>>, vector<1x64x64xbf16>
    %215 = vector.shape_cast %214 : vector<1x64x64xbf16> to vector<64x64xbf16>
    %cst_128 = arith.constant dense<0.000000e+00> : vector<16x64xf32>
    %216 = tpu.matmul %213, %215, %cst_128 {dimension_numbers = #tpu.dot_dimension_numbers<[1], [0], [0], [1], [0, 0, 1, 1], [], []>} : vector<16x64xbf16>, vector<64x64xbf16>, vector<16x64xf32> -> vector<16x64xf32>
    %c1_129 = arith.constant 1 : index
    %c0_130 = arith.constant 0 : index
    %c0_131 = arith.constant 0 : index
    %217 = vector.load %arg14[%c1_129, %c0_130, %c0_131] : memref<4x1x64xf32, #tpu.memory_space<vmem>>, vector<1x1x64xf32>
    %218 = vector.shape_cast %217 : vector<1x1x64xf32> to vector<1x64xf32>
    %219 = vector.broadcast %218 : vector<1x64xf32> to vector<16x64xf32>
    %220 = arith.addf %216, %219 : vector<16x64xf32>
    %cst_132 = arith.constant 0.000000e+00 : f32
    %221 = vector.broadcast %cst_132 : f32 to vector<16x64xf32>
    %222 = arith.maximumf %220, %221 : vector<16x64xf32>
    %223 = arith.addf %145, %222 : vector<16x64xf32>
    %c0_133 = arith.constant 0 : index
    %c0_134 = arith.constant 0 : index
    %224 = vector.load %arg18[%c0_133, %c0_134] : memref<16x64xf32, #tpu.memory_space<vmem>>, vector<16x64xf32>
    tpu.vector_store %arg18[%c0_133, %c0_134], %223 {strides = array<i32>} : memref<16x64xf32, #tpu.memory_space<vmem>>, vector<16x64xf32>,
    %c0_135 = arith.constant 0 : index
    %c0_136 = arith.constant 0 : index
    %225 = vector.load %arg20[%c0_135, %c0_136] : memref<16x256xf32, #tpu.memory_space<vmem>>, vector<16x256xf32>
    %226 = arith.truncf %223 : vector<16x64xf32> to vector<16x64xbf16>
    %c64 = arith.constant 64 : index
    %c0_137 = arith.constant 0 : index
    %227 = vector.load %arg15[%c64, %c0_137] : memref<320x256xbf16, #tpu.memory_space<vmem>>, vector<64x256xbf16>
    %cst_138 = arith.constant dense<0.000000e+00> : vector<16x256xf32>
    %228 = tpu.matmul %226, %227, %cst_138 {dimension_numbers = #tpu.dot_dimension_numbers<[1], [0], [0], [1], [0, 0, 1, 1], [], []>} : vector<16x64xbf16>, vector<64x256xbf16>, vector<16x256xf32> -> vector<16x256xf32>
    %229 = arith.addf %225, %228 : vector<16x256xf32>
    %c0_139 = arith.constant 0 : index
    %c0_140 = arith.constant 0 : index
    %230 = vector.load %arg20[%c0_139, %c0_140] : memref<16x256xf32, #tpu.memory_space<vmem>>, vector<16x256xf32>
    tpu.vector_store %arg20[%c0_139, %c0_140], %229 {strides = array<i32>} : memref<16x256xf32, #tpu.memory_space<vmem>>, vector<16x256xf32>,
    %c0_141 = arith.constant 0 : index
    %c0_142 = arith.constant 0 : index
    %231 = vector.load %arg18[%c0_141, %c0_142] : memref<16x64xf32, #tpu.memory_space<vmem>>, vector<16x64xf32>
    %232 = arith.truncf %231 : vector<16x64xf32> to vector<16x64xbf16>
    %c2_143 = arith.constant 2 : index
    %c0_144 = arith.constant 0 : index
    %c0_145 = arith.constant 0 : index
    %233 = vector.load %arg10[%c2_143, %c0_144, %c0_145] : memref<4x64x16xbf16, #tpu.memory_space<vmem>>, vector<1x64x16xbf16>
    %234 = vector.shape_cast %233 : vector<1x64x16xbf16> to vector<64x16xbf16>
    %cst_146 = arith.constant dense<0.000000e+00> : vector<16x16xf32>
    %235 = tpu.matmul %232, %234, %cst_146 {dimension_numbers = #tpu.dot_dimension_numbers<[1], [0], [0], [1], [0, 0, 1, 1], [], []>} : vector<16x64xbf16>, vector<64x16xbf16>, vector<16x16xf32> -> vector<16x16xf32>
    %236 = arith.truncf %235 : vector<16x16xf32> to vector<16x16xbf16>
    %c2_147 = arith.constant 2 : index
    %c0_148 = arith.constant 0 : index
    %c0_149 = arith.constant 0 : index
    %237 = vector.load %arg11[%c2_147, %c0_148, %c0_149] : memref<4x64x64xbf16, #tpu.memory_space<vmem>>, vector<1x64x64xbf16>
    %238 = vector.shape_cast %237 : vector<1x64x64xbf16> to vector<64x64xbf16>
    %cst_150 = arith.constant dense<0.000000e+00> : vector<16x64xf32>
    %239 = tpu.matmul %232, %238, %cst_150 {dimension_numbers = #tpu.dot_dimension_numbers<[1], [0], [0], [1], [0, 0, 1, 1], [], []>} : vector<16x64xbf16>, vector<64x64xbf16>, vector<16x64xf32> -> vector<16x64xf32>
    %c2_151 = arith.constant 2 : index
    %c0_152 = arith.constant 0 : index
    %c0_153 = arith.constant 0 : index
    %240 = vector.load %arg12[%c2_151, %c0_152, %c0_153] : memref<4x1x64xf32, #tpu.memory_space<vmem>>, vector<1x1x64xf32>
    %241 = vector.shape_cast %240 : vector<1x1x64xf32> to vector<1x64xf32>
    %242 = vector.broadcast %241 : vector<1x64xf32> to vector<16x64xf32>
    %243 = arith.addf %239, %242 : vector<16x64xf32>
    %244 = arith.truncf %243 : vector<16x64xf32> to vector<16x64xbf16>
    %245 = vector.extract_strided_slice %236 {offsets = [0, 0], sizes = [8, 16], strides = [1, 1]} : vector<16x16xbf16> to vector<8x16xbf16>
    %cst_154 = arith.constant dense<0.000000e+00> : vector<8x8xf32>
    %246 = tpu.matmul %245, %245, %cst_154 {dimension_numbers = #tpu.dot_dimension_numbers<[1], [1], [0], [0], [0, 0, 1, 0], [], []>} : vector<8x16xbf16>, vector<8x16xbf16>, vector<8x8xf32> -> vector<8x8xf32>
    %cst_155 = arith.constant dense<0xFF800000> : vector<8xf32>
    %247 = vector.multi_reduction <maximumf>, %246, %cst_155 [0] : vector<8x8xf32> to vector<8xf32>
    %248 = vector.shape_cast %247 : vector<8xf32> to vector<1x8xf32>
    %249 = vector.broadcast %248 : vector<1x8xf32> to vector<8x8xf32>
    %250 = arith.subf %246, %249 : vector<8x8xf32>
    %251 = arith.truncf %250 : vector<8x8xf32> to vector<8x8xbf16>
    %252 = math.exp %251 : vector<8x8xbf16>
    %253 = arith.extf %252 : vector<8x8xbf16> to vector<8x8xf32>
    %cst_156 = arith.constant dense<0.000000e+00> : vector<8xf32>
    %254 = vector.multi_reduction <add>, %253, %cst_156 [0] : vector<8x8xf32> to vector<8xf32>
    %255 = vector.shape_cast %254 : vector<8xf32> to vector<1x8xf32>
    %256 = tpu.reciprocal %255 {approx = true} : vector<1x8xf32> -> vector<1x8xf32>
    %257 = arith.truncf %256 : vector<1x8xf32> to vector<1x8xbf16>
    %258 = vector.broadcast %257 : vector<1x8xbf16> to vector<8x8xbf16>
    %259 = arith.mulf %252, %258 : vector<8x8xbf16>
    %260 = arith.extf %259 : vector<8x8xbf16> to vector<8x8xf32>
    %cst_157 = arith.constant dense<0.000000e+00> : vector<8xf32>
    %261 = vector.multi_reduction <add>, %260, %cst_157 [1] : vector<8x8xf32> to vector<8xf32>
    %262 = vector.shape_cast %261 : vector<8xf32> to vector<8x1xf32>
    %cst_158 = arith.constant 9.99999971E-10 : f32
    %263 = vector.broadcast %cst_158 : f32 to vector<8x1xf32>
    %264 = arith.addf %262, %263 : vector<8x1xf32>
    %265 = tpu.reciprocal %264 {approx = true} : vector<8x1xf32> -> vector<8x1xf32>
    %266 = vector.extract_strided_slice %244 {offsets = [0, 0], sizes = [8, 64], strides = [1, 1]} : vector<16x64xbf16> to vector<8x64xbf16>
    %cst_159 = arith.constant dense<0.000000e+00> : vector<8x64xf32>
    %267 = tpu.matmul %259, %266, %cst_159 {dimension_numbers = #tpu.dot_dimension_numbers<[1], [0], [0], [1], [0, 0, 1, 1], [], []>} : vector<8x8xbf16>, vector<8x64xbf16>, vector<8x64xf32> -> vector<8x64xf32>
    %268 = vector.broadcast %265 : vector<8x1xf32> to vector<8x64xf32>
    %269 = arith.mulf %267, %268 : vector<8x64xf32>
    %c0_160 = arith.constant 0 : index
    %c0_161 = arith.constant 0 : index
    %270 = vector.load %arg19[%c0_160, %c0_161] : memref<16x64xf32, #tpu.memory_space<vmem>>, vector<8x64xf32>
    tpu.vector_store %arg19[%c0_160, %c0_161], %269 {strides = array<i32>} : memref<16x64xf32, #tpu.memory_space<vmem>>, vector<8x64xf32>,
    %271 = vector.extract_strided_slice %236 {offsets = [8, 0], sizes = [8, 16], strides = [1, 1]} : vector<16x16xbf16> to vector<8x16xbf16>
    %cst_162 = arith.constant dense<0.000000e+00> : vector<8x8xf32>
    %272 = tpu.matmul %271, %271, %cst_162 {dimension_numbers = #tpu.dot_dimension_numbers<[1], [1], [0], [0], [0, 0, 1, 0], [], []>} : vector<8x16xbf16>, vector<8x16xbf16>, vector<8x8xf32> -> vector<8x8xf32>
    %cst_163 = arith.constant dense<0xFF800000> : vector<8xf32>
    %273 = vector.multi_reduction <maximumf>, %272, %cst_163 [0] : vector<8x8xf32> to vector<8xf32>
    %274 = vector.shape_cast %273 : vector<8xf32> to vector<1x8xf32>
    %275 = vector.broadcast %274 : vector<1x8xf32> to vector<8x8xf32>
    %276 = arith.subf %272, %275 : vector<8x8xf32>
    %277 = arith.truncf %276 : vector<8x8xf32> to vector<8x8xbf16>
    %278 = math.exp %277 : vector<8x8xbf16>
    %279 = arith.extf %278 : vector<8x8xbf16> to vector<8x8xf32>
    %cst_164 = arith.constant dense<0.000000e+00> : vector<8xf32>
    %280 = vector.multi_reduction <add>, %279, %cst_164 [0] : vector<8x8xf32> to vector<8xf32>
    %281 = vector.shape_cast %280 : vector<8xf32> to vector<1x8xf32>
    %282 = tpu.reciprocal %281 {approx = true} : vector<1x8xf32> -> vector<1x8xf32>
    %283 = arith.truncf %282 : vector<1x8xf32> to vector<1x8xbf16>
    %284 = vector.broadcast %283 : vector<1x8xbf16> to vector<8x8xbf16>
    %285 = arith.mulf %278, %284 : vector<8x8xbf16>
    %286 = arith.extf %285 : vector<8x8xbf16> to vector<8x8xf32>
    %cst_165 = arith.constant dense<0.000000e+00> : vector<8xf32>
    %287 = vector.multi_reduction <add>, %286, %cst_165 [1] : vector<8x8xf32> to vector<8xf32>
    %288 = vector.shape_cast %287 : vector<8xf32> to vector<8x1xf32>
    %cst_166 = arith.constant 9.99999971E-10 : f32
    %289 = vector.broadcast %cst_166 : f32 to vector<8x1xf32>
    %290 = arith.addf %288, %289 : vector<8x1xf32>
    %291 = tpu.reciprocal %290 {approx = true} : vector<8x1xf32> -> vector<8x1xf32>
    %292 = vector.extract_strided_slice %244 {offsets = [8, 0], sizes = [8, 64], strides = [1, 1]} : vector<16x64xbf16> to vector<8x64xbf16>
    %cst_167 = arith.constant dense<0.000000e+00> : vector<8x64xf32>
    %293 = tpu.matmul %285, %292, %cst_167 {dimension_numbers = #tpu.dot_dimension_numbers<[1], [0], [0], [1], [0, 0, 1, 1], [], []>} : vector<8x8xbf16>, vector<8x64xbf16>, vector<8x64xf32> -> vector<8x64xf32>
    %294 = vector.broadcast %291 : vector<8x1xf32> to vector<8x64xf32>
    %295 = arith.mulf %293, %294 : vector<8x64xf32>
    %c8_168 = arith.constant 8 : index
    %c0_169 = arith.constant 0 : index
    %296 = vector.load %arg19[%c8_168, %c0_169] : memref<16x64xf32, #tpu.memory_space<vmem>>, vector<8x64xf32>
    tpu.vector_store %arg19[%c8_168, %c0_169], %295 {strides = array<i32>} : memref<16x64xf32, #tpu.memory_space<vmem>>, vector<8x64xf32>,
    %c0_170 = arith.constant 0 : index
    %c0_171 = arith.constant 0 : index
    %297 = vector.load %arg19[%c0_170, %c0_171] : memref<16x64xf32, #tpu.memory_space<vmem>>, vector<16x64xf32>
    %298 = arith.subf %231, %297 : vector<16x64xf32>
    %299 = arith.truncf %298 : vector<16x64xf32> to vector<16x64xbf16>
    %c2_172 = arith.constant 2 : index
    %c0_173 = arith.constant 0 : index
    %c0_174 = arith.constant 0 : index
    %300 = vector.load %arg13[%c2_172, %c0_173, %c0_174] : memref<4x64x64xbf16, #tpu.memory_space<vmem>>, vector<1x64x64xbf16>
    %301 = vector.shape_cast %300 : vector<1x64x64xbf16> to vector<64x64xbf16>
    %cst_175 = arith.constant dense<0.000000e+00> : vector<16x64xf32>
    %302 = tpu.matmul %299, %301, %cst_175 {dimension_numbers = #tpu.dot_dimension_numbers<[1], [0], [0], [1], [0, 0, 1, 1], [], []>} : vector<16x64xbf16>, vector<64x64xbf16>, vector<16x64xf32> -> vector<16x64xf32>
    %c2_176 = arith.constant 2 : index
    %c0_177 = arith.constant 0 : index
    %c0_178 = arith.constant 0 : index
    %303 = vector.load %arg14[%c2_176, %c0_177, %c0_178] : memref<4x1x64xf32, #tpu.memory_space<vmem>>, vector<1x1x64xf32>
    %304 = vector.shape_cast %303 : vector<1x1x64xf32> to vector<1x64xf32>
    %305 = vector.broadcast %304 : vector<1x64xf32> to vector<16x64xf32>
    %306 = arith.addf %302, %305 : vector<16x64xf32>
    %cst_179 = arith.constant 0.000000e+00 : f32
    %307 = vector.broadcast %cst_179 : f32 to vector<16x64xf32>
    %308 = arith.maximumf %306, %307 : vector<16x64xf32>
    %309 = arith.addf %231, %308 : vector<16x64xf32>
    %c0_180 = arith.constant 0 : index
    %c0_181 = arith.constant 0 : index
    %310 = vector.load %arg18[%c0_180, %c0_181] : memref<16x64xf32, #tpu.memory_space<vmem>>, vector<16x64xf32>
    tpu.vector_store %arg18[%c0_180, %c0_181], %309 {strides = array<i32>} : memref<16x64xf32, #tpu.memory_space<vmem>>, vector<16x64xf32>,
    %c0_182 = arith.constant 0 : index
    %c0_183 = arith.constant 0 : index
    %311 = vector.load %arg20[%c0_182, %c0_183] : memref<16x256xf32, #tpu.memory_space<vmem>>, vector<16x256xf32>
    %312 = arith.truncf %309 : vector<16x64xf32> to vector<16x64xbf16>
    %c128 = arith.constant 128 : index
    %c0_184 = arith.constant 0 : index
    %313 = vector.load %arg15[%c128, %c0_184] : memref<320x256xbf16, #tpu.memory_space<vmem>>, vector<64x256xbf16>
    %cst_185 = arith.constant dense<0.000000e+00> : vector<16x256xf32>
    %314 = tpu.matmul %312, %313, %cst_185 {dimension_numbers = #tpu.dot_dimension_numbers<[1], [0], [0], [1], [0, 0, 1, 1], [], []>} : vector<16x64xbf16>, vector<64x256xbf16>, vector<16x256xf32> -> vector<16x256xf32>
    %315 = arith.addf %311, %314 : vector<16x256xf32>
    %c0_186 = arith.constant 0 : index
    %c0_187 = arith.constant 0 : index
    %316 = vector.load %arg20[%c0_186, %c0_187] : memref<16x256xf32, #tpu.memory_space<vmem>>, vector<16x256xf32>
    tpu.vector_store %arg20[%c0_186, %c0_187], %315 {strides = array<i32>} : memref<16x256xf32, #tpu.memory_space<vmem>>, vector<16x256xf32>,
    %c0_188 = arith.constant 0 : index
    %c0_189 = arith.constant 0 : index
    %317 = vector.load %arg18[%c0_188, %c0_189] : memref<16x64xf32, #tpu.memory_space<vmem>>, vector<16x64xf32>
    %318 = arith.truncf %317 : vector<16x64xf32> to vector<16x64xbf16>
    %c3 = arith.constant 3 : index
    %c0_190 = arith.constant 0 : index
    %c0_191 = arith.constant 0 : index
    %319 = vector.load %arg10[%c3, %c0_190, %c0_191] : memref<4x64x16xbf16, #tpu.memory_space<vmem>>, vector<1x64x16xbf16>
    %320 = vector.shape_cast %319 : vector<1x64x16xbf16> to vector<64x16xbf16>
    %cst_192 = arith.constant dense<0.000000e+00> : vector<16x16xf32>
    %321 = tpu.matmul %318, %320, %cst_192 {dimension_numbers = #tpu.dot_dimension_numbers<[1], [0], [0], [1], [0, 0, 1, 1], [], []>} : vector<16x64xbf16>, vector<64x16xbf16>, vector<16x16xf32> -> vector<16x16xf32>
    %322 = arith.truncf %321 : vector<16x16xf32> to vector<16x16xbf16>
    %c3_193 = arith.constant 3 : index
    %c0_194 = arith.constant 0 : index
    %c0_195 = arith.constant 0 : index
    %323 = vector.load %arg11[%c3_193, %c0_194, %c0_195] : memref<4x64x64xbf16, #tpu.memory_space<vmem>>, vector<1x64x64xbf16>
    %324 = vector.shape_cast %323 : vector<1x64x64xbf16> to vector<64x64xbf16>
    %cst_196 = arith.constant dense<0.000000e+00> : vector<16x64xf32>
    %325 = tpu.matmul %318, %324, %cst_196 {dimension_numbers = #tpu.dot_dimension_numbers<[1], [0], [0], [1], [0, 0, 1, 1], [], []>} : vector<16x64xbf16>, vector<64x64xbf16>, vector<16x64xf32> -> vector<16x64xf32>
    %c3_197 = arith.constant 3 : index
    %c0_198 = arith.constant 0 : index
    %c0_199 = arith.constant 0 : index
    %326 = vector.load %arg12[%c3_197, %c0_198, %c0_199] : memref<4x1x64xf32, #tpu.memory_space<vmem>>, vector<1x1x64xf32>
    %327 = vector.shape_cast %326 : vector<1x1x64xf32> to vector<1x64xf32>
    %328 = vector.broadcast %327 : vector<1x64xf32> to vector<16x64xf32>
    %329 = arith.addf %325, %328 : vector<16x64xf32>
    %330 = arith.truncf %329 : vector<16x64xf32> to vector<16x64xbf16>
    %331 = vector.extract_strided_slice %322 {offsets = [0, 0], sizes = [8, 16], strides = [1, 1]} : vector<16x16xbf16> to vector<8x16xbf16>
    %cst_200 = arith.constant dense<0.000000e+00> : vector<8x8xf32>
    %332 = tpu.matmul %331, %331, %cst_200 {dimension_numbers = #tpu.dot_dimension_numbers<[1], [1], [0], [0], [0, 0, 1, 0], [], []>} : vector<8x16xbf16>, vector<8x16xbf16>, vector<8x8xf32> -> vector<8x8xf32>
    %cst_201 = arith.constant dense<0xFF800000> : vector<8xf32>
    %333 = vector.multi_reduction <maximumf>, %332, %cst_201 [0] : vector<8x8xf32> to vector<8xf32>
    %334 = vector.shape_cast %333 : vector<8xf32> to vector<1x8xf32>
    %335 = vector.broadcast %334 : vector<1x8xf32> to vector<8x8xf32>
    %336 = arith.subf %332, %335 : vector<8x8xf32>
    %337 = arith.truncf %336 : vector<8x8xf32> to vector<8x8xbf16>
    %338 = math.exp %337 : vector<8x8xbf16>
    %339 = arith.extf %338 : vector<8x8xbf16> to vector<8x8xf32>
    %cst_202 = arith.constant dense<0.000000e+00> : vector<8xf32>
    %340 = vector.multi_reduction <add>, %339, %cst_202 [0] : vector<8x8xf32> to vector<8xf32>
    %341 = vector.shape_cast %340 : vector<8xf32> to vector<1x8xf32>
    %342 = tpu.reciprocal %341 {approx = true} : vector<1x8xf32> -> vector<1x8xf32>
    %343 = arith.truncf %342 : vector<1x8xf32> to vector<1x8xbf16>
    %344 = vector.broadcast %343 : vector<1x8xbf16> to vector<8x8xbf16>
    %345 = arith.mulf %338, %344 : vector<8x8xbf16>
    %346 = arith.extf %345 : vector<8x8xbf16> to vector<8x8xf32>
    %cst_203 = arith.constant dense<0.000000e+00> : vector<8xf32>
    %347 = vector.multi_reduction <add>, %346, %cst_203 [1] : vector<8x8xf32> to vector<8xf32>
    %348 = vector.shape_cast %347 : vector<8xf32> to vector<8x1xf32>
    %cst_204 = arith.constant 9.99999971E-10 : f32
    %349 = vector.broadcast %cst_204 : f32 to vector<8x1xf32>
    %350 = arith.addf %348, %349 : vector<8x1xf32>
    %351 = tpu.reciprocal %350 {approx = true} : vector<8x1xf32> -> vector<8x1xf32>
    %352 = vector.extract_strided_slice %330 {offsets = [0, 0], sizes = [8, 64], strides = [1, 1]} : vector<16x64xbf16> to vector<8x64xbf16>
    %cst_205 = arith.constant dense<0.000000e+00> : vector<8x64xf32>
    %353 = tpu.matmul %345, %352, %cst_205 {dimension_numbers = #tpu.dot_dimension_numbers<[1], [0], [0], [1], [0, 0, 1, 1], [], []>} : vector<8x8xbf16>, vector<8x64xbf16>, vector<8x64xf32> -> vector<8x64xf32>
    %354 = vector.broadcast %351 : vector<8x1xf32> to vector<8x64xf32>
    %355 = arith.mulf %353, %354 : vector<8x64xf32>
    %c0_206 = arith.constant 0 : index
    %c0_207 = arith.constant 0 : index
    %356 = vector.load %arg19[%c0_206, %c0_207] : memref<16x64xf32, #tpu.memory_space<vmem>>, vector<8x64xf32>
    tpu.vector_store %arg19[%c0_206, %c0_207], %355 {strides = array<i32>} : memref<16x64xf32, #tpu.memory_space<vmem>>, vector<8x64xf32>,
    %357 = vector.extract_strided_slice %322 {offsets = [8, 0], sizes = [8, 16], strides = [1, 1]} : vector<16x16xbf16> to vector<8x16xbf16>
    %cst_208 = arith.constant dense<0.000000e+00> : vector<8x8xf32>
    %358 = tpu.matmul %357, %357, %cst_208 {dimension_numbers = #tpu.dot_dimension_numbers<[1], [1], [0], [0], [0, 0, 1, 0], [], []>} : vector<8x16xbf16>, vector<8x16xbf16>, vector<8x8xf32> -> vector<8x8xf32>
    %cst_209 = arith.constant dense<0xFF800000> : vector<8xf32>
    %359 = vector.multi_reduction <maximumf>, %358, %cst_209 [0] : vector<8x8xf32> to vector<8xf32>
    %360 = vector.shape_cast %359 : vector<8xf32> to vector<1x8xf32>
    %361 = vector.broadcast %360 : vector<1x8xf32> to vector<8x8xf32>
    %362 = arith.subf %358, %361 : vector<8x8xf32>
    %363 = arith.truncf %362 : vector<8x8xf32> to vector<8x8xbf16>
    %364 = math.exp %363 : vector<8x8xbf16>
    %365 = arith.extf %364 : vector<8x8xbf16> to vector<8x8xf32>
    %cst_210 = arith.constant dense<0.000000e+00> : vector<8xf32>
    %366 = vector.multi_reduction <add>, %365, %cst_210 [0] : vector<8x8xf32> to vector<8xf32>
    %367 = vector.shape_cast %366 : vector<8xf32> to vector<1x8xf32>
    %368 = tpu.reciprocal %367 {approx = true} : vector<1x8xf32> -> vector<1x8xf32>
    %369 = arith.truncf %368 : vector<1x8xf32> to vector<1x8xbf16>
    %370 = vector.broadcast %369 : vector<1x8xbf16> to vector<8x8xbf16>
    %371 = arith.mulf %364, %370 : vector<8x8xbf16>
    %372 = arith.extf %371 : vector<8x8xbf16> to vector<8x8xf32>
    %cst_211 = arith.constant dense<0.000000e+00> : vector<8xf32>
    %373 = vector.multi_reduction <add>, %372, %cst_211 [1] : vector<8x8xf32> to vector<8xf32>
    %374 = vector.shape_cast %373 : vector<8xf32> to vector<8x1xf32>
    %cst_212 = arith.constant 9.99999971E-10 : f32
    %375 = vector.broadcast %cst_212 : f32 to vector<8x1xf32>
    %376 = arith.addf %374, %375 : vector<8x1xf32>
    %377 = tpu.reciprocal %376 {approx = true} : vector<8x1xf32> -> vector<8x1xf32>
    %378 = vector.extract_strided_slice %330 {offsets = [8, 0], sizes = [8, 64], strides = [1, 1]} : vector<16x64xbf16> to vector<8x64xbf16>
    %cst_213 = arith.constant dense<0.000000e+00> : vector<8x64xf32>
    %379 = tpu.matmul %371, %378, %cst_213 {dimension_numbers = #tpu.dot_dimension_numbers<[1], [0], [0], [1], [0, 0, 1, 1], [], []>} : vector<8x8xbf16>, vector<8x64xbf16>, vector<8x64xf32> -> vector<8x64xf32>
    %380 = vector.broadcast %377 : vector<8x1xf32> to vector<8x64xf32>
    %381 = arith.mulf %379, %380 : vector<8x64xf32>
    %c8_214 = arith.constant 8 : index
    %c0_215 = arith.constant 0 : index
    %382 = vector.load %arg19[%c8_214, %c0_215] : memref<16x64xf32, #tpu.memory_space<vmem>>, vector<8x64xf32>
    tpu.vector_store %arg19[%c8_214, %c0_215], %381 {strides = array<i32>} : memref<16x64xf32, #tpu.memory_space<vmem>>, vector<8x64xf32>,
    %c0_216 = arith.constant 0 : index
    %c0_217 = arith.constant 0 : index
    %383 = vector.load %arg19[%c0_216, %c0_217] : memref<16x64xf32, #tpu.memory_space<vmem>>, vector<16x64xf32>
    %384 = arith.subf %317, %383 : vector<16x64xf32>
    %385 = arith.truncf %384 : vector<16x64xf32> to vector<16x64xbf16>
    %c3_218 = arith.constant 3 : index
    %c0_219 = arith.constant 0 : index
    %c0_220 = arith.constant 0 : index
    %386 = vector.load %arg13[%c3_218, %c0_219, %c0_220] : memref<4x64x64xbf16, #tpu.memory_space<vmem>>, vector<1x64x64xbf16>
    %387 = vector.shape_cast %386 : vector<1x64x64xbf16> to vector<64x64xbf16>
    %cst_221 = arith.constant dense<0.000000e+00> : vector<16x64xf32>
    %388 = tpu.matmul %385, %387, %cst_221 {dimension_numbers = #tpu.dot_dimension_numbers<[1], [0], [0], [1], [0, 0, 1, 1], [], []>} : vector<16x64xbf16>, vector<64x64xbf16>, vector<16x64xf32> -> vector<16x64xf32>
    %c3_222 = arith.constant 3 : index
    %c0_223 = arith.constant 0 : index
    %c0_224 = arith.constant 0 : index
    %389 = vector.load %arg14[%c3_222, %c0_223, %c0_224] : memref<4x1x64xf32, #tpu.memory_space<vmem>>, vector<1x1x64xf32>
    %390 = vector.shape_cast %389 : vector<1x1x64xf32> to vector<1x64xf32>
    %391 = vector.broadcast %390 : vector<1x64xf32> to vector<16x64xf32>
    %392 = arith.addf %388, %391 : vector<16x64xf32>
    %cst_225 = arith.constant 0.000000e+00 : f32
    %393 = vector.broadcast %cst_225 : f32 to vector<16x64xf32>
    %394 = arith.maximumf %392, %393 : vector<16x64xf32>
    %395 = arith.addf %317, %394 : vector<16x64xf32>
    %c0_226 = arith.constant 0 : index
    %c0_227 = arith.constant 0 : index
    %396 = vector.load %arg18[%c0_226, %c0_227] : memref<16x64xf32, #tpu.memory_space<vmem>>, vector<16x64xf32>
    tpu.vector_store %arg18[%c0_226, %c0_227], %395 {strides = array<i32>} : memref<16x64xf32, #tpu.memory_space<vmem>>, vector<16x64xf32>,
    %c0_228 = arith.constant 0 : index
    %c0_229 = arith.constant 0 : index
    %397 = vector.load %arg20[%c0_228, %c0_229] : memref<16x256xf32, #tpu.memory_space<vmem>>, vector<16x256xf32>
    %398 = arith.truncf %395 : vector<16x64xf32> to vector<16x64xbf16>
    %c192 = arith.constant 192 : index
    %c0_230 = arith.constant 0 : index
    %399 = vector.load %arg15[%c192, %c0_230] : memref<320x256xbf16, #tpu.memory_space<vmem>>, vector<64x256xbf16>
    %cst_231 = arith.constant dense<0.000000e+00> : vector<16x256xf32>
    %400 = tpu.matmul %398, %399, %cst_231 {dimension_numbers = #tpu.dot_dimension_numbers<[1], [0], [0], [1], [0, 0, 1, 1], [], []>} : vector<16x64xbf16>, vector<64x256xbf16>, vector<16x256xf32> -> vector<16x256xf32>
    %401 = arith.addf %397, %400 : vector<16x256xf32>
    %c0_232 = arith.constant 0 : index
    %c0_233 = arith.constant 0 : index
    %402 = vector.load %arg20[%c0_232, %c0_233] : memref<16x256xf32, #tpu.memory_space<vmem>>, vector<16x256xf32>
    tpu.vector_store %arg20[%c0_232, %c0_233], %401 {strides = array<i32>} : memref<16x256xf32, #tpu.memory_space<vmem>>, vector<16x256xf32>,
    %c0_234 = arith.constant 0 : index
    %c0_235 = arith.constant 0 : index
    %403 = vector.load %arg20[%c0_234, %c0_235] : memref<16x256xf32, #tpu.memory_space<vmem>>, vector<16x256xf32>
    %c0_236 = arith.constant 0 : index
    %c0_237 = arith.constant 0 : index
    %404 = vector.load %arg16[%c0_236, %c0_237] : memref<1x256xf32, #tpu.memory_space<vmem>>, vector<1x256xf32>
    %405 = vector.broadcast %404 : vector<1x256xf32> to vector<16x256xf32>
    %406 = arith.addf %403, %405 : vector<16x256xf32>
    %cst_238 = arith.constant 0.000000e+00 : f32
    %407 = vector.broadcast %cst_238 : f32 to vector<16x256xf32>
    %408 = arith.cmpf ogt, %406, %407 : vector<16x256xf32>
    %cst_239 = arith.constant 2.000000e-01 : f32
    %409 = vector.broadcast %cst_239 : f32 to vector<16x256xf32>
    %410 = arith.mulf %409, %406 : vector<16x256xf32>
    %411 = arith.select %408, %406, %410 : vector<16x256xi1>, vector<16x256xf32>
    %412 = vector.extract_strided_slice %411 {offsets = [0, 0], sizes = [8, 256], strides = [1, 1]} : vector<16x256xf32> to vector<8x256xf32>
    %cst_240 = arith.constant dense<0xFF800000> : vector<256xf32>
    %413 = vector.multi_reduction <maximumf>, %412, %cst_240 [0] : vector<8x256xf32> to vector<256xf32>
    %414 = vector.shape_cast %413 : vector<256xf32> to vector<1x256xf32>
    %c0_241 = arith.constant 0 : index
    %c0_242 = arith.constant 0 : index
    %415 = vector.load %arg17[%c0_241, %c0_242] : memref<2x256xf32, #tpu.memory_space<vmem>>, vector<1x256xf32>
    tpu.vector_store %arg17[%c0_241, %c0_242], %414 {strides = array<i32>} : memref<2x256xf32, #tpu.memory_space<vmem>>, vector<1x256xf32>,
    %416 = vector.extract_strided_slice %411 {offsets = [8, 0], sizes = [8, 256], strides = [1, 1]} : vector<16x256xf32> to vector<8x256xf32>
    %cst_243 = arith.constant dense<0xFF800000> : vector<256xf32>
    %417 = vector.multi_reduction <maximumf>, %416, %cst_243 [0] : vector<8x256xf32> to vector<256xf32>
    %418 = vector.shape_cast %417 : vector<256xf32> to vector<1x256xf32>
    %c1_244 = arith.constant 1 : index
    %c0_245 = arith.constant 0 : index
    %419 = vector.load %arg17[%c1_244, %c0_245] : memref<2x256xf32, #tpu.memory_space<vmem>>, vector<1x256xf32>
    tpu.vector_store %arg17[%c1_244, %c0_245], %418 {strides = array<i32>} : memref<2x256xf32, #tpu.memory_space<vmem>>, vector<1x256xf32>,
    return
  }
  func.func @transform_0(%arg0: i32) -> (i32, i32) {
    %c0_i32 = arith.constant 0 : i32
    %c0_i32_0 = arith.constant 0 : i32
    return %arg0, %c0_i32 : i32, i32
  }
  func.func @transform_1(%arg0: i32) -> (i32, i32) {
    %c0_i32 = arith.constant 0 : i32
    %c0_i32_0 = arith.constant 0 : i32
    %c0_i32_1 = arith.constant 0 : i32
    return %c0_i32, %c0_i32_0 : i32, i32
  }
  func.func @transform_2(%arg0: i32) -> (i32, i32) {
    %c0_i32 = arith.constant 0 : i32
    %c0_i32_0 = arith.constant 0 : i32
    %c0_i32_1 = arith.constant 0 : i32
    return %c0_i32, %c0_i32_0 : i32, i32
  }
  func.func @transform_3(%arg0: i32) -> (i32, i32) {
    %c0_i32 = arith.constant 0 : i32
    %c0_i32_0 = arith.constant 0 : i32
    %c0_i32_1 = arith.constant 0 : i32
    return %c0_i32, %c0_i32_0 : i32, i32
  }
  func.func @transform_4(%arg0: i32) -> (i32, i32) {
    %c0_i32 = arith.constant 0 : i32
    %c0_i32_0 = arith.constant 0 : i32
    %c0_i32_1 = arith.constant 0 : i32
    return %c0_i32, %c0_i32_0 : i32, i32
  }
  func.func @transform_5(%arg0: i32) -> (i32, i32, i32) {
    %c0_i32 = arith.constant 0 : i32
    %c0_i32_0 = arith.constant 0 : i32
    %c0_i32_1 = arith.constant 0 : i32
    %c0_i32_2 = arith.constant 0 : i32
    return %c0_i32, %c0_i32_0, %c0_i32_1 : i32, i32, i32
  }
  func.func @transform_6(%arg0: i32) -> (i32, i32) {
    %c0_i32 = arith.constant 0 : i32
    %c0_i32_0 = arith.constant 0 : i32
    %c0_i32_1 = arith.constant 0 : i32
    return %c0_i32, %c0_i32_0 : i32, i32
  }
  func.func @transform_7(%arg0: i32) -> (i32, i32, i32) {
    %c0_i32 = arith.constant 0 : i32
    %c0_i32_0 = arith.constant 0 : i32
    %c0_i32_1 = arith.constant 0 : i32
    %c0_i32_2 = arith.constant 0 : i32
    return %c0_i32, %c0_i32_0, %c0_i32_1 : i32, i32, i32
  }
  func.func @transform_8(%arg0: i32) -> (i32, i32, i32) {
    %c0_i32 = arith.constant 0 : i32
    %c0_i32_0 = arith.constant 0 : i32
    %c0_i32_1 = arith.constant 0 : i32
    %c0_i32_2 = arith.constant 0 : i32
    return %c0_i32, %c0_i32_0, %c0_i32_1 : i32, i32, i32
  }
  func.func @transform_9(%arg0: i32) -> (i32, i32, i32) {
    %c0_i32 = arith.constant 0 : i32
    %c0_i32_0 = arith.constant 0 : i32
    %c0_i32_1 = arith.constant 0 : i32
    %c0_i32_2 = arith.constant 0 : i32
    return %c0_i32, %c0_i32_0, %c0_i32_1 : i32, i32, i32
  }
  func.func @transform_10(%arg0: i32) -> (i32, i32, i32) {
    %c0_i32 = arith.constant 0 : i32
    %c0_i32_0 = arith.constant 0 : i32
    %c0_i32_1 = arith.constant 0 : i32
    %c0_i32_2 = arith.constant 0 : i32
    return %c0_i32, %c0_i32_0, %c0_i32_1 : i32, i32, i32
  }
  func.func @transform_11(%arg0: i32) -> (i32, i32, i32) {
    %c0_i32 = arith.constant 0 : i32
    %c0_i32_0 = arith.constant 0 : i32
    %c0_i32_1 = arith.constant 0 : i32
    %c0_i32_2 = arith.constant 0 : i32
    return %c0_i32, %c0_i32_0, %c0_i32_1 : i32, i32, i32
  }
  func.func @transform_12(%arg0: i32) -> (i32, i32, i32) {
    %c0_i32 = arith.constant 0 : i32
    %c0_i32_0 = arith.constant 0 : i32
    %c0_i32_1 = arith.constant 0 : i32
    %c0_i32_2 = arith.constant 0 : i32
    return %c0_i32, %c0_i32_0, %c0_i32_1 : i32, i32, i32
  }
  func.func @transform_13(%arg0: i32) -> (i32, i32, i32) {
    %c0_i32 = arith.constant 0 : i32
    %c0_i32_0 = arith.constant 0 : i32
    %c0_i32_1 = arith.constant 0 : i32
    %c0_i32_2 = arith.constant 0 : i32
    return %c0_i32, %c0_i32_0, %c0_i32_1 : i32, i32, i32
  }
  func.func @transform_14(%arg0: i32) -> (i32, i32) {
    %c0_i32 = arith.constant 0 : i32
    %c0_i32_0 = arith.constant 0 : i32
    %c0_i32_1 = arith.constant 0 : i32
    return %c0_i32, %c0_i32_0 : i32, i32
  }
  func.func @transform_15(%arg0: i32) -> (i32, i32) {
    %c0_i32 = arith.constant 0 : i32
    %c0_i32_0 = arith.constant 0 : i32
    %c0_i32_1 = arith.constant 0 : i32
    return %c0_i32, %c0_i32_0 : i32, i32
  }
  func.func @transform_16(%arg0: i32) -> (i32, i32) {
    %c0_i32 = arith.constant 0 : i32
    %c0_i32_0 = arith.constant 0 : i32
    return %arg0, %c0_i32 : i32, i32
  }
}

module attributes {stable_mosaic.version = 11 : i64} {
  func.func @_head_kernel(%arg0: i32, %arg1: memref<2x256xf32, #tpu.memory_space<vmem>>, %arg2: memref<256x128xbf16, #tpu.memory_space<vmem>>, %arg3: memref<1x128xf32, #tpu.memory_space<vmem>>, %arg4: memref<128x64xbf16, #tpu.memory_space<vmem>>, %arg5: memref<1x64xf32, #tpu.memory_space<vmem>>, %arg6: memref<64x128xbf16, #tpu.memory_space<vmem>>, %arg7: memref<1x128xf32, #tpu.memory_space<vmem>>, %arg8: memref<2x128xf32, #tpu.memory_space<vmem>>) attributes {dimension_semantics = [#tpu.dimension_semantics<arbitrary>], iteration_bounds = array<i64: 1>, scalar_prefetch = 0 : i64, scratch_operands = 0 : i64, tpu.core_type = #tpu.core_type<tc>, window_params = [{pipeline_mode = #tpu.pipeline_mode<synchronous>, transform_indices = @transform_0, window_bounds = array<i64: 2, 256>}, {pipeline_mode = #tpu.pipeline_mode<synchronous>, transform_indices = @transform_1, window_bounds = array<i64: 256, 128>}, {pipeline_mode = #tpu.pipeline_mode<synchronous>, transform_indices = @transform_2, window_bounds = array<i64: 1, 128>}, {pipeline_mode = #tpu.pipeline_mode<synchronous>, transform_indices = @transform_3, window_bounds = array<i64: 128, 64>}, {pipeline_mode = #tpu.pipeline_mode<synchronous>, transform_indices = @transform_4, window_bounds = array<i64: 1, 64>}, {pipeline_mode = #tpu.pipeline_mode<synchronous>, transform_indices = @transform_5, window_bounds = array<i64: 64, 128>}, {pipeline_mode = #tpu.pipeline_mode<synchronous>, transform_indices = @transform_6, window_bounds = array<i64: 1, 128>}, {pipeline_mode = #tpu.pipeline_mode<synchronous>, transform_indices = @transform_7, window_bounds = array<i64: 2, 128>}]} {
    %c0 = arith.constant 0 : index
    %c0_0 = arith.constant 0 : index
    %0 = vector.load %arg1[%c0, %c0_0] : memref<2x256xf32, #tpu.memory_space<vmem>>, vector<2x256xf32>
    %1 = arith.truncf %0 : vector<2x256xf32> to vector<2x256xbf16>
    %c0_1 = arith.constant 0 : index
    %c0_2 = arith.constant 0 : index
    %2 = vector.load %arg2[%c0_1, %c0_2] : memref<256x128xbf16, #tpu.memory_space<vmem>>, vector<256x128xbf16>
    %cst = arith.constant dense<0.000000e+00> : vector<2x128xf32>
    %3 = tpu.matmul %1, %2, %cst {dimension_numbers = #tpu.dot_dimension_numbers<[1], [0], [0], [1], [0, 0, 1, 1], [], []>} : vector<2x256xbf16>, vector<256x128xbf16>, vector<2x128xf32> -> vector<2x128xf32>
    %c0_3 = arith.constant 0 : index
    %c0_4 = arith.constant 0 : index
    %4 = vector.load %arg3[%c0_3, %c0_4] : memref<1x128xf32, #tpu.memory_space<vmem>>, vector<1x128xf32>
    %5 = vector.broadcast %4 : vector<1x128xf32> to vector<2x128xf32>
    %6 = arith.addf %3, %5 : vector<2x128xf32>
    %cst_5 = arith.constant 0.000000e+00 : f32
    %7 = vector.broadcast %cst_5 : f32 to vector<2x128xf32>
    %8 = arith.maximumf %6, %7 : vector<2x128xf32>
    %9 = arith.truncf %8 : vector<2x128xf32> to vector<2x128xbf16>
    %c0_6 = arith.constant 0 : index
    %c0_7 = arith.constant 0 : index
    %10 = vector.load %arg4[%c0_6, %c0_7] : memref<128x64xbf16, #tpu.memory_space<vmem>>, vector<128x64xbf16>
    %cst_8 = arith.constant dense<0.000000e+00> : vector<2x64xf32>
    %11 = tpu.matmul %9, %10, %cst_8 {dimension_numbers = #tpu.dot_dimension_numbers<[1], [0], [0], [1], [0, 0, 1, 1], [], []>} : vector<2x128xbf16>, vector<128x64xbf16>, vector<2x64xf32> -> vector<2x64xf32>
    %c0_9 = arith.constant 0 : index
    %c0_10 = arith.constant 0 : index
    %12 = vector.load %arg5[%c0_9, %c0_10] : memref<1x64xf32, #tpu.memory_space<vmem>>, vector<1x64xf32>
    %13 = vector.broadcast %12 : vector<1x64xf32> to vector<2x64xf32>
    %14 = arith.addf %11, %13 : vector<2x64xf32>
    %cst_11 = arith.constant 0.000000e+00 : f32
    %15 = vector.broadcast %cst_11 : f32 to vector<2x64xf32>
    %16 = arith.maximumf %14, %15 : vector<2x64xf32>
    %17 = arith.truncf %16 : vector<2x64xf32> to vector<2x64xbf16>
    %c0_12 = arith.constant 0 : index
    %c0_13 = arith.constant 0 : index
    %18 = vector.load %arg6[%c0_12, %c0_13] : memref<64x128xbf16, #tpu.memory_space<vmem>>, vector<64x128xbf16>
    %cst_14 = arith.constant dense<0.000000e+00> : vector<2x128xf32>
    %19 = tpu.matmul %17, %18, %cst_14 {dimension_numbers = #tpu.dot_dimension_numbers<[1], [0], [0], [1], [0, 0, 1, 1], [], []>} : vector<2x64xbf16>, vector<64x128xbf16>, vector<2x128xf32> -> vector<2x128xf32>
    %c0_15 = arith.constant 0 : index
    %c0_16 = arith.constant 0 : index
    %20 = vector.load %arg7[%c0_15, %c0_16] : memref<1x128xf32, #tpu.memory_space<vmem>>, vector<1x128xf32>
    %21 = vector.broadcast %20 : vector<1x128xf32> to vector<2x128xf32>
    %22 = arith.addf %19, %21 : vector<2x128xf32>
    %c0_17 = arith.constant 0 : index
    %c0_18 = arith.constant 0 : index
    %23 = vector.load %arg8[%c0_17, %c0_18] : memref<2x128xf32, #tpu.memory_space<vmem>>, vector<2x128xf32>
    tpu.vector_store %arg8[%c0_17, %c0_18], %22 {strides = array<i32>} : memref<2x128xf32, #tpu.memory_space<vmem>>, vector<2x128xf32>,
    return
  }
  func.func @transform_0(%arg0: i32) -> (i32, i32) {
    %c0_i32 = arith.constant 0 : i32
    %c0_i32_0 = arith.constant 0 : i32
    %c0_i32_1 = arith.constant 0 : i32
    return %c0_i32, %c0_i32_0 : i32, i32
  }
  func.func @transform_1(%arg0: i32) -> (i32, i32) {
    %c0_i32 = arith.constant 0 : i32
    %c0_i32_0 = arith.constant 0 : i32
    %c0_i32_1 = arith.constant 0 : i32
    return %c0_i32, %c0_i32_0 : i32, i32
  }
  func.func @transform_2(%arg0: i32) -> (i32, i32) {
    %c0_i32 = arith.constant 0 : i32
    %c0_i32_0 = arith.constant 0 : i32
    %c0_i32_1 = arith.constant 0 : i32
    return %c0_i32, %c0_i32_0 : i32, i32
  }
  func.func @transform_3(%arg0: i32) -> (i32, i32) {
    %c0_i32 = arith.constant 0 : i32
    %c0_i32_0 = arith.constant 0 : i32
    %c0_i32_1 = arith.constant 0 : i32
    return %c0_i32, %c0_i32_0 : i32, i32
  }
  func.func @transform_4(%arg0: i32) -> (i32, i32) {
    %c0_i32 = arith.constant 0 : i32
    %c0_i32_0 = arith.constant 0 : i32
    %c0_i32_1 = arith.constant 0 : i32
    return %c0_i32, %c0_i32_0 : i32, i32
  }
  func.func @transform_5(%arg0: i32) -> (i32, i32) {
    %c0_i32 = arith.constant 0 : i32
    %c0_i32_0 = arith.constant 0 : i32
    %c0_i32_1 = arith.constant 0 : i32
    return %c0_i32, %c0_i32_0 : i32, i32
  }
  func.func @transform_6(%arg0: i32) -> (i32, i32) {
    %c0_i32 = arith.constant 0 : i32
    %c0_i32_0 = arith.constant 0 : i32
    %c0_i32_1 = arith.constant 0 : i32
    return %c0_i32, %c0_i32_0 : i32, i32
  }
  func.func @transform_7(%arg0: i32) -> (i32, i32) {
    %c0_i32 = arith.constant 0 : i32
    %c0_i32_0 = arith.constant 0 : i32
    %c0_i32_1 = arith.constant 0 : i32
    return %c0_i32, %c0_i32_0 : i32, i32
  }
}

</mosaic_0001>

<bundles_post_ra>
// kernel: pct_forward.3
= control target key start
LH: loop header
LB: loop body
LE: loop exit
PB: predicated region body
PF: predicated region fallthrough
CT: control target
= control target key end

     0   :  { %v586_v2 = vmov 0.0   ;;  %s751_s0 = inlined_call_operand.vmem [shape: f32[2,256], index: 0, kind: input, shape index: {}]   ;;  %s752_s1 = inlined_call_operand.vmem [shape: bf16[256,128], index: 1, kind: input, shape index: {}]   ;;  %s753_s2 = inlined_call_operand.vmem [shape: f32[1,128], index: 2, kind: input, shape index: {}]   ;;  %s754_s3 = inlined_call_operand.vmem [shape: bf16[128,64], index: 3, kind: input, shape index: {}]   ;;  %s755_s4 = inlined_call_operand.vmem [shape: f32[1,64], index: 4, kind: input, shape index: {}]   ;;  %s756_s5 = inlined_call_operand.vmem [shape: bf16[64,128], index: 5, kind: input, shape index: {}]   ;;  %s757_s6 = inlined_call_operand.vmem [shape: f32[1,128], index: 6, kind: input, shape index: {}]   ;;  %s758_s7 = inlined_call_operand.hbm [shape: f32[2,128], index: 7, kind: output, shape index: {}]  }
   0x1   :  { %v534_v0 = vld [vmem:[%s752_s1 + $0x40] sm:$0xff]   ;;  %499 = vmatprep.subr.bf16.mxu1 %v586_v2  ;;  %v536_v3 = vld [vmem:[%s752_s1 + $0x48] sm:$0xff]   ;;  %v538_v5 = vld [vmem:[%s752_s1 + $0x50] sm:$0xff]  }
   0x2   :  { %v535_v1 = vld [vmem:[%s752_s1] sm:$0xff]   ;;  %463 = vmatprep.subr.bf16.mxu0 %v534_v0  ;;  %v537_v4 = vld [vmem:[%s752_s1 + $0x8] sm:$0xff]   ;;  %v539_v6 = vld [vmem:[%s752_s1 + $0x10] sm:$0xff]  }
   0x3   :  { %464 = vmatpush3.bf16.msra.mxu0 %v535_v1  ;;  %v540_v7 = vld [vmem:[%s752_s1 + $0x58] sm:$0xff]   ;;  %v542_v9 = vld [vmem:[%s752_s1 + $0x60] sm:$0xff]   ;;  %v544_v11 = vld [vmem:[%s752_s1 + $0x68] sm:$0xff]  }
   0x4   :  { %465 = vmatprep.subr.bf16.mxu0 %v536_v3  ;;  %v541_v8 = vld [vmem:[%s752_s1 + $0x18] sm:$0xff]   ;;  %v543_v10 = vld [vmem:[%s752_s1 + $0x20] sm:$0xff]   ;;  %v545_v15 = vld [vmem:[%s752_s1 + $0x28] sm:$0xff]  }
   0x5   :  { %v430_v12 = vld.sshfl [vmem:[%s751_s0] sm:$0x33 pattern:$0x76325410]  ;;  %v551_v17 = vld [vmem:[%s754_s3 + $0x8] sm:$0xff]   ;;  %v546_v18 = vld [vmem:[%s752_s1 + $0x70] sm:$0xff]  }
   0x6   :  { %v37_v13 = vcombine.high %v430_v12, %v430_v12  ;;  %v550_v14 = vld [vmem:[%s754_s3] sm:$0xff]   ;;  %v547_v19 = vld [vmem:[%s752_s1 + $0x30] sm:$0xff]   ;;  %v548_v20 = vld [vmem:[%s752_s1 + $0x78] sm:$0xff]  }
   0x7   :  { %466 = vmatpush3.bf16.msra.mxu0 %v537_v4  ;;  %500 = vmatpush3.bf16.msra.mxu1 %v550_v14  ;;  %v552_v21 = vld [vmem:[%s754_s3 + $0x10] sm:$0xff]  }
   0x8   :  { %467 = vmatprep.subr.bf16.mxu0 %v538_v5  ;;  %v41_v16 = vpack.c.bf16 %v37_v13, %v37_v13  ;;  %501 = vmatprep.subr.bf16.mxu1 %v586_v2 }
   0xa   :  { %209 = vmatprep.mubr.bf16.mxu0 %v41_v16 }
   0xb   :  { %468 = vmatpush3.bf16.msra.mxu0 %v539_v6  ;;  %502 = vmatpush3.bf16.msra.mxu1 %v551_v17 }
   0xc   :  { %469 = vmatprep.subr.bf16.mxu0 %v540_v7  ;;  %503 = vmatprep.subr.bf16.mxu1 %v586_v2 }
   0xf   :  { %470 = vmatpush3.bf16.msra.mxu0 %v541_v8 }
  0x10   :  { %471 = vmatprep.subr.bf16.mxu0 %v542_v9 }
  0x13   :  { %472 = vmatpush3.bf16.msra.mxu0 %v543_v10 }
  0x14   :  { %473 = vmatprep.subr.bf16.mxu0 %v544_v11 }
  0x17   :  { %474 = vmatpush3.bf16.msra.mxu0 %v545_v15 }
  0x18   :  { %475 = vmatprep.subr.bf16.mxu0 %v546_v18 }
  0x19   :  { %12 = vsyncpa [#allocation3], 0  ;;  %v549_v22 = vld [vmem:[%s752_s1 + $0x38] sm:$0xff]   ;;  %504 = vmatpush3.bf16.msra.mxu1 %v552_v21  ;;  %v40_v24 = vpack.c.bf16 %v430_v12, %v430_v12  ;;  %v554_v25 = vld [vmem:[%s754_s3 + $0x20] sm:$0xff]   ;;  %vm587_vm0 = vmmov 0   ;;  %vm371_vm1 = vcmask 523264  }
  0x1a   :  { %v553_v23 = vld [vmem:[%s754_s3 + $0x18] sm:$0xff]   ;;  %505 = vmatprep.subr.bf16.mxu1 %v586_v2  ;;  %v555_v26 = vld [vmem:[%s754_s3 + $0x28] sm:$0xff]   ;;  %v556_v27 = vld [vmem:[%s754_s3 + $0x30] sm:$0xff]   ;;  %515 = vmatprep.mubr.msk.bf16.mxu1 %vm587_vm0, %v586_v2  ;;  %s588_s14 = smov [#allocation2]  }
  0x1b   :  { %476 = vmatpush3.bf16.msra.mxu0 %v547_v19  ;;  %v557_v28 = vld [vmem:[%s754_s3 + $0x38] sm:$0xff]   ;;  %v558_v29 = vld [vmem:[%s756_s5] sm:$0xff]   ;;  %v559_v30 = vld [vmem:[%s756_s5 + $0x8] sm:$0xff]  }
  0x1c   :  { %477 = vmatprep.subr.bf16.mxu0 %v548_v20  ;;  %v431_v32 = vld [vmem:[%s753_s2] ss:$0 sm:$0xff]  ;;  %v560_v40 = vld [vmem:[%s756_s5 + $0x10] sm:$0xff]   ;;  %v561_v41 = vld [vmem:[%s756_s5 + $0x18] sm:$0xff]   ;;  %s422_s5 = sshll.u32 %s588_s14, 4  ;;  %s423_s5 = int_to_ptr.vmem [resolvable:$true] %s422_s5 }
  0x1d   :  { %506 = vmatpush3.bf16.msra.mxu1 %v553_v23  ;;  %v448_v42 = vld [vmem:[%s755_s4] ss:$0 sm:$0xff]  ;;  %s562_s4 = scalar_lea.vmem %s423_s5, 32  ;;  %p567_p1 = scmp.lt.s32.totalorder %s423_s5, %s423_s5 }
  0x1e   :  { %507 = vmatprep.subr.bf16.mxu1 %v586_v2  ;;  %v457_v50 = vld [vmem:[%s757_s6] ss:$0 sm:$0xff]  ;;  %p563_p0 = scmp.ne.s32.totalorder %s423_s5, %s562_s4  ;;  %p568_p2 = scmp.lt.s32.totalorder %s562_s4, %s562_s4 }
  0x1f   :  { %478 = vmatpush3.bf16.msra.mxu0 %v549_v22 }
  0x20   :  { %519 = vmatprep.subr.bf16.mxu0 %v586_v2  ;;  %p569_p3 = por %p568_p2, %p567_p1 }
  0x21   :  { %508 = vmatpush3.bf16.msra.mxu1 %v554_v25 }
  0x22   :  { %210 = vmatmul.mubr.bf16.vlgmr.msra.gmra.mrb[0].mxu0 %v40_v24  ;;  %509 = vmatprep.subr.bf16.mxu1 %v586_v2  ;;  %p570_p4 = pnand %p569_p3, %p563_p0 }
  0x23   :  { %527 = vmatprep.mubr.msk.bf16.mxu0 %vm587_vm0, %v586_v2  ;;  %520 = vmatpush3.bf16.msra.mxu0 %v558_v29 }
  0x24   :  { %521 = vmatprep.subr.bf16.mxu0 %v586_v2 }
  0x25   :  { %510 = vmatpush3.bf16.msra.mxu1 %v555_v26 }
  0x26   :  { %511 = vmatprep.subr.bf16.mxu1 %v586_v2 }
  0x27   :  { %522 = vmatpush3.bf16.msra.mxu0 %v559_v30 }
  0x28   :  { %523 = vmatprep.subr.bf16.mxu0 %v586_v2 }
  0x29   :  { %512 = vmatpush3.bf16.msra.mxu1 %v556_v27 }
  0x2a   :  { %513 = vmatprep.subr.bf16.mxu1 %v586_v2 }
  0x2b   :  { %524 = vmatpush3.bf16.msra.mxu0 %v560_v40 }
  0x2c   :  { %525 = vmatprep.subr.bf16.mxu0 %v586_v2 }
  0x2d   :  { %514 = vmatpush3.bf16.msra.mxu1 %v557_v28 }
  0x2f   :  { %526 = vmatpush3.bf16.msra.mxu0 %v561_v41 }
  0xf5   :  { %v479_v31 = vpop.f32.mrb[0].mxu0 }
  0xf6   :  { %v480_v33 = vpop.f32.mrb[1].mxu0 }
  0xf7   :  { %v481_v34 = vadd.f32 %v480_v33, %v479_v31  ;;  %v482_v35 = vpop.f32.mrb[2].mxu0 }
  0xf8   :  { %v483_v36 = vpop.f32.mrb[3].mxu0 }
  0xf9   :  { %v212_v37 = vadd.f32 %v481_v34, %v431_v32 }
  0xfb   :  { %v217_v38 = vmax.f32 %v212_v37, 0.0 }
  0xfd   :  { %v218_v39 = vpack.c.bf16 %v217_v38, %v217_v38 }
  0xff   :  { %516 = vmatmul.mubr.bf16.vlgmr.msra.gmra.mrb[0].mxu1 %v218_v39 }
 0x1d2   :  { %v324_v43 = vpop.f32.mrb[0].mxu1 }
 0x1d3   :  { %v325_v44 = vadd.f32 %v448_v42, %v324_v43  ;;  %v517_v45 = vpop.f32.mrb[1].mxu1 }
 0x1d4   :  { %v327_v46 = vpop.f32.mrb[2].mxu1 }
 0x1d5   :  { %v330_v47 = vmax.f32 %v325_v44, 0.0  ;;  %v518_v48 = vpop.f32.mrb[3].mxu1 }
 0x1d7   :  { %v331_v49 = vpack.c.bf16 %v330_v47, %v330_v47 }
 0x1d9   :  { %528 = vmatmul.mubr.msk.bf16.vlgmr.msra.gmra.mrb[4].mxu0 %vm371_vm1, %v331_v49 }
 0x2ac   :  { %v409_v51 = vpop.f32.mrb[4].mxu0 }
 0x2ad   :  { %v410_v52 = vadd.f32 %v457_v50, %v409_v51  ;;  %v529_v53 = vpop.f32.mrb[5].mxu0 }
 0x2ae   :  { %v412_v54 = vpop.f32.mrb[6].mxu0 }
 0x2af   :  { %415 = vst [vmem:[#allocation2] sm:$0x3] %v410_v52  ;;  %v530_v55 = vpop.f32.mrb[7].mxu0 }
 0x2b0   :  { %573 = shalt.err (!%p570_p4)
}
 0x2b1   :  { %s574_s6 = scalar_lea.hbm %s758_s7, 32 }
 0x2b2   :  { %p575_p5 = scmp.ne.s32.totalorder %s758_s7, %s574_s6  ;;  %p578_p6 = scmp.lt.u32.totalorder %s574_s6, %s758_s7 }
 0x2b4   :  { %p580_p7 = pnand %p578_p6, %p575_p5 }
 0x2b6   :  { %583 = shalt.err (!%p580_p7)
}
 0x2b7   :  { %425 = dma.vmem_to_hbm [thread:$0]  %s423_s5, 32, %s758_s7, [#allocation3]  }
 0x2b8   :  { %584 = dma.done.wait [#allocation3], 32  }
 0x2b9   :  { %585 = vsyncadd [#allocation3], 4294967264 }
 0x2ba   :  { %429 = vsyncpa [#allocation3], 1 }

// kernel: pct_forward.2
= control target key start
LH: loop header
LB: loop body
LE: loop exit
PB: predicated region body
PF: predicated region fallthrough
CT: control target
= control target key end

     0   :  { %s4936_s0 = inlined_call_operand.vmem [shape: bf16[16,3], index: 0, kind: input, shape index: {}]   ;;  %s4937_s1 = inlined_call_operand.hbm [shape: bf16[3,16], index: 1, kind: input, shape index: {}]   ;;  %s4938_s2 = inlined_call_operand.hbm [shape: bf16[16,16], index: 2, kind: input, shape index: {}]   ;;  %s4939_s3 = inlined_call_operand.hbm [shape: bf16[16,32], index: 3, kind: input, shape index: {}]   ;;  %s4940_s4 = inlined_call_operand.vmem [shape: bf16[32,64], index: 4, kind: input, shape index: {}]   ;;  %s4941_s5 = inlined_call_operand.hbm [shape: f32[2,1,16], index: 5, kind: input, shape index: {}]   ;;  %s4942_s6 = inlined_call_operand.vmem [shape: f32[1,32], index: 6, kind: input, shape index: {}]   ;;  %s4943_s7 = inlined_call_operand.vmem [shape: f32[3,1,64], index: 7, kind: input, shape index: {}]   ;;  %s4944_s8 = inlined_call_operand.vmem [shape: bf16[2,64,64], index: 8, kind: input, shape index: {}]   ;;  %s4945_s9 = inlined_call_operand.vmem [shape: bf16[4,64,16], index: 9, kind: input, shape index: {}]   ;;  %s4946_s10 = inlined_call_operand.vmem [shape: bf16[4,64,64], index: 10, kind: input, shape index: {}]   ;;  %s4947_s11 = inlined_call_operand.hbm [shape: f32[4,1,64], index: 11, kind: input, shape index: {}]   ;;  %s4948_s12 = inlined_call_operand.hbm [shape: bf16[4,64,64], index: 12, kind: input, shape index: {}]   ;;  %s4949_s13 = inlined_call_operand.vmem [shape: f32[4,1,64], index: 13, kind: input, shape index: {}]   ;;  %s4950_s14 = inlined_call_operand.hbm [shape: bf16[320,256], index: 14, kind: input, shape index: {}]   ;;  %s4951_s15 = inlined_call_operand.hbm [shape: f32[1,256], index: 15, kind: input, shape index: {}]   ;;  %s4952_s16 = inlined_call_operand.vmem [shape: f32[2,256], index: 16, kind: output, shape index: {}]  }
   0x1   :  { %4957 = sst [smem:[#allocation23_spill]] %s4936_s0 }
   0x2   :  { %21 = vsyncpa [#allocation6], 0 }
   0x3   :  { %22 = vsyncpa [#allocation8], 0 }
   0x4   :  { %23 = vsyncpa [#allocation11], 0 }
   0x5   :  { %24 = vsyncpa [#allocation14], 0 }
   0x6   :  { %25 = vsyncpa [#allocation17], 0  ;;  %s4254_s21 = smov [#allocation7]   ;;  %s4068_s25 = scalar_lea.hbm %s4938_s2, 128 }
   0x7   :  { %s43_s22 = sshll.u32 %s4254_s21, 4  ;;  %p4069_p0 = scmp.ne.s32.totalorder %s4938_s2, %s4068_s25  ;;  %s44_s22 = int_to_ptr.vmem [resolvable:$true] %s43_s22 }
   0x8   :  { %p4072_p1 = scmp.lt.u32.totalorder %s4068_s25, %s4938_s2 }
   0xa   :  { %p4074_p2 = pnand %p4072_p1, %p4069_p0 }
   0xc   :  { %4077 = shalt.err (!%p4074_p2)
}
   0xd   :  { %s4078_s30 = scalar_lea.vmem %s44_s22, 128  ;;  %p4083_p4 = scmp.lt.s32.totalorder %s44_s22, %s44_s22 }
   0xe   :  { %p4079_p3 = scmp.ne.s32.totalorder %s44_s22, %s4078_s30  ;;  %p4084_p5 = scmp.lt.s32.totalorder %s4078_s30, %s4078_s30 }
  0x10   :  { %p4085_p6 = por %p4084_p5, %p4083_p4 }
  0x12   :  { %p4086_p7 = pnand %p4085_p6, %p4079_p3 }
  0x14   :  { %4089 = shalt.err (!%p4086_p7)
}
  0x15   :  { %s4953_s0 = smov 64   ;;  %s4955_s17 = smov 4  }
  0x16   :  { %49 = dma.hbm_to_vmem [thread:$0]  %s4938_s2, 128, %s44_s22, [#allocation8], %s4953_s0, %s4953_s0, %s4955_s17  }
  0x17   :  { %s4257_s20 = smov [#allocation10]   ;;  %s4090_s25 = scalar_lea.hbm %s4941_s5, 32 }
  0x18   :  { %s69_s21 = sshll.u32 %s4257_s20, 4  ;;  %p4091_p8 = scmp.ne.s32.totalorder %s4941_s5, %s4090_s25  ;;  %s70_s21 = int_to_ptr.vmem [resolvable:$true] %s69_s21 }
  0x19   :  { %p4094_p9 = scmp.lt.u32.totalorder %s4090_s25, %s4941_s5 }
  0x1b   :  { %p4096_p10 = pnand %p4094_p9, %p4091_p8 }
  0x1d   :  { %4099 = shalt.err (!%p4096_p10)
}
  0x1e   :  { %s4100_s30 = scalar_lea.vmem %s70_s21, 32  ;;  %p4105_p12 = scmp.lt.s32.totalorder %s70_s21, %s70_s21 }
  0x1f   :  { %p4101_p11 = scmp.ne.s32.totalorder %s70_s21, %s4100_s30  ;;  %p4106_p13 = scmp.lt.s32.totalorder %s4100_s30, %s4100_s30 }
  0x21   :  { %p4107_p0 = por %p4106_p13, %p4105_p12 }
  0x23   :  { %p4108_p1 = pnand %p4107_p0, %p4101_p11 }
  0x25   :  { %4111 = shalt.err (!%p4108_p1)
}
  0x26   :  { %s4258_s2 = smov 16   ;;  %s4259_s22 = smov 1  }
  0x27   :  { %75 = dma.hbm_to_vmem [thread:$0]  %s4941_s5, 32, %s70_s21, [#allocation11], %s4258_s2, %s4258_s2, %s4259_s22  }
  0x28   :  { %s4260_s20 = smov [#allocation13]   ;;  %s4261_s24 = smov [#allocation5]  }
  0x29   :  { %s103_s23 = sshll.u32 %s4260_s20, 4  ;;  %s34_s25 = sshll.u32 %s4261_s24, 4  ;;  %s104_s23 = int_to_ptr.vmem [resolvable:$true] %s103_s23  ;;  %s35_s25 = int_to_ptr.vmem [resolvable:$true] %s34_s25 }
  0x2a   :  { %s4112_s28 = scalar_lea.hbm %s4948_s12, 2048 }
  0x2b   :  { %p4113_p2 = scmp.ne.s32.totalorder %s4948_s12, %s4112_s28  ;;  %p4116_p3 = scmp.lt.u32.totalorder %s4112_s28, %s4948_s12 }
  0x2d   :  { %p4118_p4 = pnand %p4116_p3, %p4113_p2 }
  0x2f   :  { %4121 = shalt.err (!%p4118_p4)
}
  0x30   :  { %s4122_s5 = scalar_lea.vmem %s104_s23, 2048  ;;  %p4127_p6 = scmp.lt.s32.totalorder %s104_s23, %s104_s23 }
  0x31   :  { %p4123_p5 = scmp.ne.s32.totalorder %s104_s23, %s4122_s5  ;;  %p4128_p7 = scmp.lt.s32.totalorder %s4122_s5, %s4122_s5 }
  0x33   :  { %p4129_p8 = por %p4128_p7, %p4127_p6 }
  0x35   :  { %p4130_p9 = pnand %p4129_p8, %p4123_p5 }
  0x37   :  { %4133 = shalt.err (!%p4130_p9)
}
  0x38   :  { %s4958_s21 = smov 4   ;;  %s4959_s18 = smov 64  }
  0x39   :  { %109 = dma.hbm_to_vmem [thread:$0]  %s4948_s12, 2048, %s104_s23, [#allocation14], %s4959_s18, %s4959_s18, %s4958_s21  }
  0x3a   :  { %s4134_s0 = scalar_lea.hbm %s4937_s1, 32 }
  0x3b   :  { %p4135_p10 = scmp.ne.s32.totalorder %s4937_s1, %s4134_s0  ;;  %p4138_p11 = scmp.lt.u32.totalorder %s4134_s0, %s4937_s1 }
  0x3d   :  { %p4140_p12 = pnand %p4138_p11, %p4135_p10 }
  0x3f   :  { %4143 = shalt.err (!%p4140_p12)
}
  0x40   :  { %s4144_s30 = scalar_lea.vmem %s35_s25, 32  ;;  %p4149_p0 = scmp.lt.s32.totalorder %s35_s25, %s35_s25 }
  0x41   :  { %p4145_p13 = scmp.ne.s32.totalorder %s35_s25, %s4144_s30  ;;  %p4150_p1 = scmp.lt.s32.totalorder %s4144_s30, %s4144_s30 }
  0x43   :  { %p4151_p2 = por %p4150_p1, %p4149_p0 }
  0x45   :  { %p4152_p3 = pnand %p4151_p2, %p4145_p13 }
  0x47   :  { %4155 = shalt.err (!%p4152_p3)
}
  0x48   :  { %37 = dma.hbm_to_vmem [thread:$0]  %s4937_s1, 32, %s35_s25, [#allocation6]  }
  0x49   :  { %s4262_s5 = smov [#allocation9]   ;;  %s4263_s20 = smov [#allocation12]  }
  0x4a   :  { %s55_s19 = sshll.u32 %s4262_s5, 4  ;;  %s91_s24 = sshll.u32 %s4263_s20, 4  ;;  %s56_s19 = int_to_ptr.vmem [resolvable:$true] %s55_s19  ;;  %s4415_s24 = int_to_ptr.vmem [resolvable:$true] %s91_s24 }
  0x4b   :  { %s4156_s17 = scalar_lea.hbm %s4939_s3, 128 }
  0x4c   :  { %p4157_p4 = scmp.ne.s32.totalorder %s4939_s3, %s4156_s17  ;;  %p4160_p5 = scmp.lt.u32.totalorder %s4156_s17, %s4939_s3 }
  0x4e   :  { %p4162_p6 = pnand %p4160_p5, %p4157_p4 }
  0x50   :  { %4165 = shalt.err (!%p4162_p6)
}
  0x51   :  { %s4166_s1 = scalar_lea.vmem %s56_s19, 128  ;;  %p4171_p8 = scmp.lt.s32.totalorder %s56_s19, %s56_s19 }
  0x52   :  { %p4167_p7 = scmp.ne.s32.totalorder %s56_s19, %s4166_s1  ;;  %p4172_p9 = scmp.lt.s32.totalorder %s4166_s1, %s4166_s1 }
  0x54   :  { %p4173_p10 = por %p4172_p9, %p4171_p8 }
  0x56   :  { %p4174_p11 = pnand %p4173_p10, %p4167_p7 }
  0x58   :  { %4177 = shalt.err (!%p4174_p11)
}
  0x59   :  { %61 = dma.hbm_to_vmem [thread:$0]  %s4939_s3, 128, %s56_s19, [#allocation8], %s4959_s18, %s4959_s18, %s4958_s21  }
  0x5a   :  { %s4178_s20 = scalar_lea.hbm %s4947_s11, 64 }
  0x5b   :  { %p4179_p12 = scmp.ne.s32.totalorder %s4947_s11, %s4178_s20  ;;  %p4182_p13 = scmp.lt.u32.totalorder %s4178_s20, %s4947_s11 }
  0x5d   :  { %p4184_p0 = pnand %p4182_p13, %p4179_p12 }
  0x5f   :  { %4187 = shalt.err (!%p4184_p0)
}
  0x60   :  { %s4188_s28 = scalar_lea.vmem %s4415_s24, 64  ;;  %p4193_p2 = scmp.lt.s32.totalorder %s4415_s24, %s4415_s24 }
  0x61   :  { %p4189_p1 = scmp.ne.s32.totalorder %s4415_s24, %s4188_s28  ;;  %p4194_p3 = scmp.lt.s32.totalorder %s4188_s28, %s4188_s28 }
  0x63   :  { %p4195_p4 = por %p4194_p3, %p4193_p2 }
  0x65   :  { %p4196_p5 = pnand %p4195_p4, %p4189_p1 }
  0x67   :  { %4199 = shalt.err (!%p4196_p5)
}
  0x68   :  { %97 = dma.hbm_to_vmem [thread:$0]  %s4947_s11, 64, %s4415_s24, [#allocation11], %s4258_s2, %s4258_s2, %s4259_s22  }
  0x69   :  { %s4264_s18 = smov [#allocation15]   ;;  %s4200_s1 = scalar_lea.hbm %s4950_s14, 5120 }
  0x6a   :  { %s117_s19 = sshll.u32 %s4264_s18, 4  ;;  %p4201_p6 = scmp.ne.s32.totalorder %s4950_s14, %s4200_s1  ;;  %s118_s19 = int_to_ptr.vmem [resolvable:$true] %s117_s19 }
  0x6b   :  { %p4204_p7 = scmp.lt.u32.totalorder %s4200_s1, %s4950_s14 }
  0x6d   :  { %p4206_p8 = pnand %p4204_p7, %p4201_p6 }
  0x6f   :  { %4209 = shalt.err (!%p4206_p8)
}
  0x70   :  { %s4210_s20 = scalar_lea.vmem %s118_s19, 5120  ;;  %p4215_p10 = scmp.lt.s32.totalorder %s118_s19, %s118_s19 }
  0x71   :  { %p4211_p9 = scmp.ne.s32.totalorder %s118_s19, %s4210_s20  ;;  %p4216_p11 = scmp.lt.s32.totalorder %s4210_s20, %s4210_s20 }
  0x73   :  { %p4217_p12 = por %p4216_p11, %p4215_p10 }
  0x75   :  { %p4218_p13 = pnand %p4217_p12, %p4211_p9 }
  0x77   :  { %4221 = shalt.err (!%p4218_p13)
}
  0x78   :  { %s4265_s11 = smov 128   ;;  %s4266_s2 = smov 8  }
  0x79   :  { %123 = dma.hbm_to_vmem [thread:$0]  %s4950_s14, 5120, %s118_s19, [#allocation14], %s4265_s11, %s4265_s11, %s4266_s2  }
  0x7a   :  { %s4267_s26 = smov [#allocation16]   ;;  %s4222_s28 = scalar_lea.hbm %s4951_s15, 32 }
  0x7b   :  { %s130_s0 = sshll.u32 %s4267_s26, 4  ;;  %p4223_p0 = scmp.ne.s32.totalorder %s4951_s15, %s4222_s28  ;;  %s131_s0 = int_to_ptr.vmem [resolvable:$true] %s130_s0 }
  0x7c   :  { %p4226_p1 = scmp.lt.u32.totalorder %s4222_s28, %s4951_s15 }
  0x7e   :  { %p4228_p2 = pnand %p4226_p1, %p4223_p0 }
  0x80   :  { %4231 = shalt.err (!%p4228_p2)
}
  0x81   :  { %s4232_s30 = scalar_lea.vmem %s131_s0, 32  ;;  %p4237_p4 = scmp.lt.s32.totalorder %s131_s0, %s131_s0 }
  0x82   :  { %p4233_p3 = scmp.ne.s32.totalorder %s131_s0, %s4232_s30  ;;  %p4238_p5 = scmp.lt.s32.totalorder %s4232_s30, %s4232_s30 }
  0x84   :  { %p4239_p6 = por %p4238_p5, %p4237_p4 }
  0x86   :  { %p4240_p7 = pnand %p4239_p6, %p4233_p3 }
  0x88   :  { %4243 = shalt.err (!%p4240_p7)
}
  0x89   :  { %133 = dma.hbm_to_vmem [thread:$0]  %s4951_s15, 32, %s131_s0, [#allocation17]  }
  0x8a   :  { %4244 = dma.done.wait [#allocation6], 32  }
  0x8b   :  { %4245 = vsyncadd [#allocation6], 4294967264 }
  0x8c   :  { %4246 = dma.done.wait [#allocation8], 256  }
  0x8d   :  { %4247 = vsyncadd [#allocation8], 4294967040 }
  0x8e   :  { %4248 = dma.done.wait [#allocation11], 96  }
  0x8f   :  { %4249 = vsyncadd [#allocation11], 4294967200 }
  0x90   :  { %4250 = dma.done.wait [#allocation14], 7168  }
  0x91   :  { %4251 = vsyncadd [#allocation14], 4294960128 }
  0x92   :  { %4252 = dma.done.wait [#allocation17], 32  }
  0x93   :  { %4253 = vsyncadd [#allocation17], 4294967264  ;;  %vm178_vm0 = vcmask 1040384   ;;  %v4268_v0 = vmov 0.0   ;;  %vm179_vm1 = vcmask 1041408   ;;  %v4269_v1 = vmov 65535  }
  0x94   :  { %3574 = vmatprep.subr.bf16.mxu0 %v4268_v0  ;;  %3580 = vmatprep.subr.bf16.mxu1 %v4268_v0  ;;  %v180_v2 = vsel %vm178_vm0, 4294967295, %v4269_v1  ;;  %vm4270_vm2 = vmmov 0   ;;  %v161_v4 = vld [vmem:[#allocation5] sm:$0x3]  ;;  %s4960_s25 = sld [smem:[#allocation23_spill]]  ;;  %vm174_vm3 = vcmask 23552  }
  0x95   :  { %3576 = vmatprep.mubr.msk.bf16.mxu0 %vm4270_vm2, %v4268_v0  ;;  %3582 = vmatprep.mubr.msk.bf16.mxu1 %vm4270_vm2, %v4268_v0  ;;  %v181_v3 = vsel %vm179_vm1, %v180_v2, 0  ;;  %v3900_v7 = vld [vmem:[#allocation7] sm:$0xff]   ;;  %v3247_v8 = vld [vmem:[#allocation10] ss:$0 sm:$0xff]  ;;  %vm245_vm4 = vcmask 130048   ;;  %v3901_v18 = vld [vmem:[#allocation9] sm:$0xff]  }
  0x96   :  { %v183_v5 = vand.u32 %v181_v3, %v161_v4  ;;  %3581 = vmatpush3.bf16.msra.mxu1 %v3900_v7  ;;  %v3250_v19 = vld [vmem:[#allocation10 + $0x1] ss:$0 sm:$0xff]  ;;  %v3902_v29 = vld [vmem:[%s4940_s4] sm:$0xff]   ;;  %v3903_v30 = vld [vmem:[%s4940_s4 + $0x8] sm:$0xff]   ;;  %vm378_vm5 = vcmask 261120   ;;  %v4271_v49 = vmov 0  }
  0x97   :  { %3592 = vmatprep.subr.bf16.mxu1 %v4268_v0  ;;  %v3906_v31 = vld [vmem:[#allocation15 + $0x104] ss:$8 sps:$4 sm:$0xff]   ;;  %v3253_v32 = vld [vmem:[%s4942_s6] ss:$0 sm:$0xff]  ;;  %v3909_v43 = vld [vmem:[#allocation15 + $0x114] ss:$8 sps:$4 sm:$0xff]  }
  0x98   :  { %3575 = vmatpush3.bf16.msra.mxu0 %v183_v5  ;;  %v3904_v41 = vld [vmem:[#allocation15 + $0x100] ss:$8 sps:$4 sm:$0xff]   ;;  %v3907_v44 = vld [vmem:[#allocation15 + $0x110] ss:$8 sps:$4 sm:$0xff]   ;;  %v3912_v45 = vld [vmem:[#allocation15 + $0x124] ss:$8 sps:$4 sm:$0xff]  }
  0x99   :  { %3586 = vmatprep.subr.bf16.mxu0 %v4268_v0  ;;  %v3910_v46 = vld [vmem:[#allocation15 + $0x120] ss:$8 sps:$4 sm:$0xff]   ;;  %v3915_v47 = vld [vmem:[#allocation15 + $0x134] ss:$8 sps:$4 sm:$0xff]   ;;  %v3913_v48 = vld [vmem:[#allocation15 + $0x130] ss:$8 sps:$4 sm:$0xff]  }
  0x9a   :  { %v3899_v6 = vld [vmem:[%s4960_s25] sm:$0xff]   ;;  %vm474_vm6 = vcmask 523264   ;;  %v3917_v61 = vld [vmem:[%s4944_s8 + $0x8] sm:$0xff]   ;;  %v3918_v62 = vld [vmem:[%s4944_s8 + $0x10] sm:$0xff]   ;;  %vm935_vm7 = vcmask 1043456   ;;  %vm902_vm8 = vcmask 64512  }
  0x9b   :  { %3577 = vmatmul.mubr.msk.bf16.vlgmr.msra.gmra.mrb[0].mxu0 %vm174_vm3, %v3899_v6  ;;  %v3256_v50 = vld [vmem:[%s4943_s7] ss:$0 sm:$0xff]  ;;  %v3919_v63 = vld [vmem:[%s4944_s8 + $0x18] sm:$0xff]   ;;  %v3921_v2 = vld [vmem:[%s4944_s8 + $0x28] sm:$0xff]  }
  0x9c   :  { %3588 = vmatprep.mubr.msk.bf16.mxu0 %vm4270_vm2, %v4268_v0  ;;  %3587 = vmatpush3.bf16.msra.mxu0 %v3901_v18  ;;  %v3916_v59 = vld [vmem:[%s4944_s8] sm:$0xff]   ;;  %v3922_v3 = vld [vmem:[%s4944_s8 + $0x30] sm:$0xff]   ;;  %v3923_v4 = vld [vmem:[%s4944_s8 + $0x38] sm:$0xff]  }
  0x9d   :  { %3612 = vmatprep.subr.bf16.mxu0 %v4268_v0  ;;  %v3920_v1 = vld [vmem:[%s4944_s8 + $0x20] sm:$0xff]  }
 0x16e   :  { %v219_v9 = vpop.f32.mrb[0].mxu0 }
 0x16f   :  { %v220_v10 = vadd.f32 %v3247_v8, %v219_v9  ;;  %v3578_v11 = vpop.f32.mrb[1].mxu0  ;;  %v3270_v9 = vld [vmem:[%s4943_s7 + $0x1] ss:$0 sm:$0xff] }
 0x170   :  { %v222_v12 = vpop.f32.mrb[2].mxu0 }
 0x171   :  { %v223_v13 = vadd.f32 %v3247_v8, %v222_v12  ;;  %v3579_v14 = vpop.f32.mrb[3].mxu0  ;;  %v226_v15 = vmax.f32 %v220_v10, 0.0 }
 0x173   :  { %v227_v16 = vmax.f32 %v223_v13, 0.0 }
 0x175   :  { %v228_v17 = vpack.c.bf16 %v227_v16, %v226_v15 }
 0x177   :  { %3583 = vmatmul.mubr.msk.bf16.vlgmr.msra.gmra.mrb[0].mxu1 %vm245_vm4, %v228_v17 }
 0x178   :  { %3596 = vmatprep.mubr.msk.bf16.mxu1 %vm4270_vm2, %v4268_v0  ;;  %3593 = vmatpush3.bf16.msra.mxu1 %v3902_v29 }
 0x179   :  { %3594 = vmatprep.subr.bf16.mxu1 %v4268_v0 }
 0x17c   :  { %3595 = vmatpush3.bf16.msra.mxu1 %v3903_v30 }
 0x17d   :  { %478 = vmatprep.subr.bf16.mxu1 %v3906_v31 }
 0x24a   :  { %v283_v20 = vpop.f32.mrb[0].mxu1 }
 0x24b   :  { %v284_v21 = vadd.f32 %v3250_v19, %v283_v20  ;;  %v3584_v22 = vpop.f32.mrb[1].mxu1  ;;  %v3925_v20 = vld [vmem:[%s4946_s10] sm:$0xff]  }
 0x24c   :  { %v286_v23 = vpop.f32.mrb[2].mxu1  ;;  %v3927_v22 = vld [vmem:[%s4946_s10 + $0x8] sm:$0xff]  }
 0x24d   :  { %v287_v24 = vadd.f32 %v3250_v19, %v286_v23  ;;  %v3585_v25 = vpop.f32.mrb[3].mxu1  ;;  %v290_v26 = vmax.f32 %v284_v21, 0.0  ;;  %v3924_v19 = vld [vmem:[%s4945_s9] sm:$0xff]   ;;  %v3926_v21 = vld [vmem:[%s4945_s9 + $0x8] sm:$0xff]   ;;  %v3928_v23 = vld [vmem:[%s4945_s9 + $0x10] sm:$0xff]  }
 0x24e   :  { %v3930_v25 = vld [vmem:[%s4945_s9 + $0x18] sm:$0xff]  }
 0x24f   :  { %v291_v27 = vmax.f32 %v287_v24, 0.0  ;;  %v3929_v24 = vld [vmem:[%s4946_s10 + $0x10] sm:$0xff]  }
 0x251   :  { %v292_v28 = vpack.c.bf16 %v291_v27, %v290_v26  ;;  %v3931_v26 = vld [vmem:[%s4946_s10 + $0x18] sm:$0xff]   ;;  %v3285_v27 = vld [vmem:[%s4943_s7 + $0x2] ss:$0 sm:$0xff] }
 0x253   :  { %3589 = vmatmul.mubr.msk.bf16.vlgmr.msra.gmra.mrb[4].mxu0 %vm245_vm4, %v292_v28 }
 0x254   :  { %3620 = vmatprep.mubr.msk.bf16.mxu0 %vm4270_vm2, %v4268_v0  ;;  %3613 = vmatpush3.bf16.msra.mxu0 %v3920_v1 }
 0x255   :  { %3614 = vmatprep.subr.bf16.mxu0 %v4268_v0 }
 0x258   :  { %3615 = vmatpush3.bf16.msra.mxu0 %v3921_v2 }
 0x259   :  { %3616 = vmatprep.subr.bf16.mxu0 %v4268_v0 }
 0x25c   :  { %3617 = vmatpush3.bf16.msra.mxu0 %v3922_v3 }
 0x25d   :  { %3618 = vmatprep.subr.bf16.mxu0 %v4268_v0 }
 0x260   :  { %3619 = vmatpush3.bf16.msra.mxu0 %v3923_v4 }
 0x261   :  { %3636 = vmatprep.subr.bf16.mxu0 %v4268_v0 }
 0x326   :  { %v345_v33 = vpop.f32.mrb[4].mxu0 }
 0x327   :  { %v346_v34 = vadd.f32 %v3253_v32, %v345_v33  ;;  %v3590_v35 = vpop.f32.mrb[5].mxu0 }
 0x328   :  { %v348_v36 = vpop.f32.mrb[6].mxu0 }
 0x329   :  { %v349_v37 = vadd.f32 %v3253_v32, %v348_v36  ;;  %v3591_v38 = vpop.f32.mrb[7].mxu0  ;;  %v352_v39 = vmax.f32 %v346_v34, 0.0 }
 0x32b   :  { %v353_v40 = vmax.f32 %v349_v37, 0.0 }
 0x32d   :  { %v354_v42 = vpack.c.bf16 %v353_v40, %v352_v39  ;;  %v3296_v40 = vld [vmem:[#allocation12] ss:$0 sm:$0xff] }
 0x32f   :  { %3597 = vmatmul.mubr.msk.bf16.vlgmr.msra.gmra.mrb[4].mxu1 %vm378_vm5, %v354_v42 }
 0x330   :  { %479 = vmatpush1.bf16.msra.mxu1 %v3904_v41  ;;  %510 = vmatprep.mubr.bf16.mxu1 %v4271_v49 }
 0x331   :  { %480 = vmatprep.subr.bf16.mxu1 %v3909_v43 }
 0x334   :  { %481 = vmatpush1.bf16.msra.mxu1 %v3907_v44 }
 0x335   :  { %482 = vmatprep.subr.bf16.mxu1 %v3912_v45 }
 0x338   :  { %483 = vmatpush1.bf16.msra.mxu1 %v3910_v46 }
 0x339   :  { %484 = vmatprep.subr.bf16.mxu1 %v3915_v47 }
 0x33c   :  { %485 = vmatpush1.bf16.msra.mxu1 %v3913_v48 }
 0x33d   :  { %3600 = vmatprep.subr.bf16.mxu1 %v4268_v0 }
 0x402   :  { %v416_v51 = vpop.f32.mrb[4].mxu1 }
 0x403   :  { %v417_v52 = vadd.f32 %v3256_v50, %v416_v51  ;;  %v3598_v53 = vpop.f32.mrb[5].mxu1 }
 0x404   :  { %v419_v54 = vpop.f32.mrb[6].mxu1 }
 0x405   :  { %v420_v55 = vadd.f32 %v3256_v50, %v419_v54  ;;  %v3599_v56 = vpop.f32.mrb[7].mxu1  ;;  %v423_v57 = vmax.f32 %v417_v52, 0.0 }
 0x407   :  { %v424_v58 = vmax.f32 %v420_v55, 0.0 }
 0x409   :  { %v425_v60 = vpack.c.bf16 %v424_v58, %v423_v57 }
 0x40b   :  { %3268 = vmatmul.mubr.msk.bf16.vlgmr.msra.gmra.mrb[8].mxu1 %vm474_vm6, %v425_v60 }
 0x40c   :  { %3601 = vmatpush3.bf16.msra.mxu1 %v3916_v59  ;;  %3608 = vmatprep.mubr.msk.bf16.mxu1 %vm4270_vm2, %v4268_v0 }
 0x40d   :  { %3602 = vmatprep.subr.bf16.mxu1 %v4268_v0 }
 0x410   :  { %3603 = vmatpush3.bf16.msra.mxu1 %v3917_v61 }
 0x411   :  { %3604 = vmatprep.subr.bf16.mxu1 %v4268_v0 }
 0x414   :  { %3605 = vmatpush3.bf16.msra.mxu1 %v3918_v62 }
 0x415   :  { %3606 = vmatprep.subr.bf16.mxu1 %v4268_v0 }
 0x418   :  { %3607 = vmatpush3.bf16.msra.mxu1 %v3919_v63 }
 0x419   :  { %3624 = vmatprep.subr.bf16.mxu1 %v4268_v0 }
 0x41b   :  { %3609 = vmatmul.mubr.msk.bf16.vlgmr.msra.gmra.mrb[12].mxu1 %vm474_vm6, %v425_v60 }
 0x41c   :  { %3632 = vmatprep.mubr.msk.bf16.mxu1 %vm4270_vm2, %v4268_v0  ;;  %3625 = vmatpush3.bf16.msra.mxu1 %v3924_v19 }
 0x41d   :  { %3626 = vmatprep.subr.bf16.mxu1 %v4268_v0 }
 0x420   :  { %3627 = vmatpush3.bf16.msra.mxu1 %v3926_v21 }
 0x421   :  { %3628 = vmatprep.subr.bf16.mxu1 %v4268_v0 }
 0x424   :  { %3629 = vmatpush3.bf16.msra.mxu1 %v3928_v23 }
 0x425   :  { %3630 = vmatprep.subr.bf16.mxu1 %v4268_v0 }
 0x428   :  { %3631 = vmatpush3.bf16.msra.mxu1 %v3930_v25 }
 0x429   :  { %3648 = vmatprep.subr.bf16.mxu1 %v4268_v0 }
 0x4de   :  { %v4549_v5 = vpop.f32.mrb[8].mxu1 }
 0x4df   :  { %v4551_v6 = vpop.f32.mrb[9].mxu1 }
 0x4e0   :  { %v4553_v7 = vpop.f32.mrb[10].mxu1 }
 0x4e1   :  { %v4555_v8 = vpop.f32.mrb[11].mxu1 }
 0x4ee   :  { %v599_v10 = vpop.f32.mrb[12].mxu1 }
 0x4ef   :  { %v600_v11 = vadd.f32 %v3270_v9, %v599_v10  ;;  %v3610_v12 = vpop.f32.mrb[13].mxu1 }
 0x4f0   :  { %v602_v13 = vpop.f32.mrb[14].mxu1 }
 0x4f1   :  { %v603_v14 = vadd.f32 %v3270_v9, %v602_v13  ;;  %v3611_v15 = vpop.f32.mrb[15].mxu1  ;;  %v606_v16 = vmax.f32 %v600_v11, 0.0 }
 0x4f3   :  { %v607_v17 = vmax.f32 %v603_v14, 0.0 }
 0x4f5   :  { %v608_v18 = vpack.c.bf16 %v607_v17, %v606_v16 }
 0x4f7   :  { %3621 = vmatmul.mubr.msk.bf16.vlgmr.msra.gmra.mrb[8].mxu0 %vm474_vm6, %v608_v18 }
 0x4f8   :  { %3644 = vmatprep.mubr.msk.bf16.mxu0 %vm4270_vm2, %v4268_v0  ;;  %3637 = vmatpush3.bf16.msra.mxu0 %v3925_v20 }
 0x4f9   :  { %3638 = vmatprep.subr.bf16.mxu0 %v4268_v0 }
 0x4fc   :  { %3639 = vmatpush3.bf16.msra.mxu0 %v3927_v22 }
 0x4fd   :  { %3640 = vmatprep.subr.bf16.mxu0 %v4268_v0 }
 0x500   :  { %3641 = vmatpush3.bf16.msra.mxu0 %v3929_v24 }
 0x501   :  { %3642 = vmatprep.subr.bf16.mxu0 %v4268_v0 }
 0x504   :  { %3643 = vmatpush3.bf16.msra.mxu0 %v3931_v26 }
 0x505   :  { %3660 = vmatprep.subr.bf16.mxu0 %v4268_v0 }
 0x5ca   :  { %v687_v28 = vpop.f32.mrb[8].mxu0 }
 0x5cb   :  { %v688_v29 = vadd.f32 %v3285_v27, %v687_v28  ;;  %v3622_v30 = vpop.f32.mrb[9].mxu0 }
 0x5cc   :  { %v690_v31 = vpop.f32.mrb[10].mxu0 }
 0x5cd   :  { %v694_v32 = vmax.f32 %v688_v29, 0.0  ;;  %v691_v33 = vadd.f32 %v3285_v27, %v690_v31  ;;  %v3623_v34 = vpop.f32.mrb[11].mxu0 }
 0x5cf   :  { %696 = vst.msk [vmem:[#allocation2] sm:$0xff] %vm474_vm6, %v694_v32  ;;  %v695_v35 = vmax.f32 %v691_v33, 0.0 }
 0x5d1   :  { %697 = vst.msk [vmem:[#allocation2 + $0x8] sm:$0xff] %vm474_vm6, %v695_v35 }
 0x5d6   :  { %v4600_v36 = vld [vmem:[#allocation2] sm:$0xff] }
 0x5d8   :  { %v4602_v37 = vld [vmem:[#allocation2 + $0x8] sm:$0xff] }
 0x5d9   :  { %v700_v38 = vpack.c.bf16 %v4602_v37, %v4600_v36 }
 0x5db   :  { %3633 = vmatmul.mubr.msk.bf16.vlgmr.msra.gmra.mrb[16].mxu1 %vm474_vm6, %v700_v38  ;;  %3645 = vmatmul.mubr.msk.bf16.vlgmr.msra.gmra.mrb[12].mxu0 %vm474_vm6, %v700_v38 }
 0x5dc   :  { %3650 = vmatprep.mubr.msk.bf16.mxu1 %vm4270_vm2, %v4268_v0  ;;  %3662 = vmatprep.mubr.msk.bf16.mxu0 %vm4270_vm2, %v4268_v0 }
 0x6ae   :  { %v770_v39 = vpop.f32.mrb[16].mxu1  ;;  %v851_v41 = vpop.f32.mrb[12].mxu0 }
 0x6af   :  { %v3634_v42 = vpop.f32.mrb[17].mxu1  ;;  %v3646_v43 = vpop.f32.mrb[13].mxu0  ;;  %v852_v46 = vadd.f32 %v3296_v40, %v851_v41 }
 0x6b0   :  { %v773_v44 = vpop.f32.mrb[18].mxu1  ;;  %v854_v45 = vpop.f32.mrb[14].mxu0 }
 0x6b1   :  { %v777_v47 = vpack.c.bf16 %v773_v44, %v770_v39  ;;  %v855_v48 = vadd.f32 %v3296_v40, %v854_v45  ;;  %v3635_v50 = vpop.f32.mrb[19].mxu1  ;;  %v3647_v51 = vpop.f32.mrb[15].mxu0 }
 0x6b3   :  { %v982_v52 = vrot.slane %v777_v47, 4  ;;  %v4612_v53 = vpack.c.bf16 %v855_v48, %v852_v46  ;;  %v860_v54 = vsel %vm245_vm4, %v777_v47, 0 }
 0x6b4   :  { %3649 = vmatpush3.bf16.xpose.msra.mxu1 %v860_v54 }
 0x6b5   :  { %v984_v55 = vsel %vm245_vm4, %v982_v52, 0  ;;  %3654 = vmatprep.subr.bf16.mxu1 %v4268_v0  ;;  %v937_v56 = vsel %vm935_vm7, %v4612_v53, 0 }
 0x6b6   :  { %3661 = vmatpush3.bf16.xpose.msra.mxu0 %v984_v55 }
 0x6b7   :  { %3672 = vmatprep.subr.bf16.mxu0 %v4268_v0 }
 0x6bb   :  { %3651 = vmatmul.mubr.msk.bf16.vlgmr.msra.gmra.mrb[20].mxu1 %vm245_vm4, %v777_v47  ;;  %v1056_v47 = vrot.slane %v4612_v53, 4 }
 0x6bc   :  { %3655 = vmatpush3.bf16.msra.mxu1 %v937_v56  ;;  %3656 = vmatprep.mubr.msk.bf16.mxu1 %vm4270_vm2, %v4268_v0 }
 0x6bd   :  { %3663 = vmatmul.mubr.msk.bf16.vlgmr.msra.gmra.mrb[16].mxu0 %vm245_vm4, %v982_v52  ;;  %3666 = vmatprep.subr.bf16.mxu1 %v4268_v0  ;;  %v1061_v54 = vsel %vm935_vm7, %v1056_v47, 0 }
 0x6be   :  { %3680 = vmatprep.mubr.msk.bf16.mxu0 %vm4270_vm2, %v4268_v0 }
 0x78e   :  { %v896_v57 = vpop.f32.mrb[20].mxu1 }
 0x78f   :  { %v903_v58 = vsel %vm902_vm8, %v896_v57, -inf  ;;  %v3652_v59 = vpop.f32.mrb[21].mxu1 }
 0x790   :  { %v904_v60 = vrot.slane %v903_v58, 4  ;;  %v899_v61 = vpop.f32.mrb[22].mxu1  ;;  %v1020_v62 = vpop.f32.mrb[16].mxu0  ;;  %v3932_v59 = vld [vmem:[#allocation13] sm:$0xff]  }
 0x791   :  { %v1026_v63 = vsel %vm902_vm8, %v1020_v62, -inf  ;;  %v3653_v1 = vpop.f32.mrb[23].mxu1  ;;  %v3664_v2 = vpop.f32.mrb[17].mxu0  ;;  %3673 = vmatpush3.bf16.msra.mxu0 %v3932_v59  ;;  %v3934_v61 = vld [vmem:[#allocation13 + $0x10] sm:$0xff]  }
 0x792   :  { %v905_v3 = vmax.f32 %v903_v58, %v904_v60  ;;  %v1027_v4 = vrot.slane %v1026_v63, 4  ;;  %v1023_v9 = vpop.f32.mrb[18].mxu0  ;;  %3674 = vmatprep.subr.bf16.mxu0 %v4268_v0  ;;  %v3933_v60 = vld [vmem:[#allocation13 + $0x8] sm:$0xff]  }
 0x793   :  { %v3665_v10 = vpop.f32.mrb[19].mxu0 }
 0x794   :  { %v906_v11 = vrot.slane %v905_v3, 2  ;;  %v1028_v12 = vmax.f32 %v1026_v63, %v1027_v4  ;;  %v3938_v63 = vld [vmem:[#allocation15 + $0x4] ss:$8 sps:$4 sm:$0xff]  }
 0x795   :  { %3675 = vmatpush3.bf16.msra.mxu0 %v3933_v60 }
 0x796   :  { %v907_v13 = vmax.f32 %v905_v3, %v906_v11  ;;  %v1029_v14 = vrot.slane %v1028_v12, 2  ;;  %3676 = vmatprep.subr.bf16.mxu0 %v4268_v0 }
 0x798   :  { %v908_v15 = vrot.slane %v907_v13, 1  ;;  %v1030_v16 = vmax.f32 %v1028_v12, %v1029_v14 }
 0x799   :  { %3677 = vmatpush3.bf16.msra.mxu0 %v3934_v61 }
 0x79a   :  { %v909_v17 = vmax.f32 %v907_v13, %v908_v15  ;;  %v1031_v18 = vrot.slane %v1030_v16, 1  ;;  %3678 = vmatprep.subr.bf16.mxu0 %v4268_v0 }
 0x79c   :  { %v910_v19 = vsub.f32 %v896_v57, %v909_v17  ;;  %v1032_v20 = vmax.f32 %v1030_v16, %v1031_v18 }
 0x79e   :  { %v911_v21 = vpack.c.bf16 %v910_v19, %v910_v19  ;;  %v1033_v22 = vsub.f32 %v1020_v62, %v1032_v20  ;;  %v3935_v62 = vld [vmem:[#allocation13 + $0x18] sm:$0xff]  }
 0x79f   :  { %3679 = vmatpush3.bf16.msra.mxu0 %v3935_v62 }
 0x7a0   :  { %v913_v23 = vmul.bf16 1069105081, %v911_v21  ;;  %v1034_v24 = vpack.c.bf16 %v1033_v22, %v1033_v22  ;;  %1255 = vmatprep.subr.bf16.mxu0 %v3938_v63 }
 0x7a2   :  { %4020 = vpow.bf16 %v913_v23  ;;  %v1036_v25 = vmul.bf16 1069105081, %v1034_v24 }
 0x7a4   :  { %4022 = vpow.bf16 %v1036_v25  ;;  %v3936_v25 = vld [vmem:[#allocation15] ss:$8 sps:$4 sm:$0xff]  }
 0x7ad   :  { %v4021_v26 = vpop.eup %4020 }
 0x7ae   :  { %v915_v27 = vunpack.c.l.bf16 %v4021_v26 }
 0x7af   :  { %v4023_v28 = vpop.eup %4022 }
 0x7b0   :  { %v916_v29 = vsel %vm902_vm8, %v915_v27, 0.0  ;;  %v1038_v30 = vunpack.c.l.bf16 %v4023_v28  ;;  %v3941_v27 = vld [vmem:[#allocation15 + $0x14] ss:$8 sps:$4 sm:$0xff]  }
 0x7b1   :  { %v917_v31 = vrot.slane %v916_v29, 4 }
 0x7b2   :  { %v1039_v32 = vsel %vm902_vm8, %v1038_v30, 0.0  ;;  %v3945_v30 = vld [vmem:[%s4945_s9 + $0x20] sm:$0xff]  }
 0x7b3   :  { %v918_v33 = vadd.f32 %v917_v31, %v916_v29  ;;  %v1040_v34 = vrot.slane %v1039_v32, 4  ;;  %v3944_v29 = vld [vmem:[#allocation15 + $0x24] ss:$8 sps:$4 sm:$0xff]   ;;  %v3942_v31 = vld [vmem:[#allocation15 + $0x20] ss:$8 sps:$4 sm:$0xff]  }
 0x7b5   :  { %v919_v35 = vrot.slane %v918_v33, 2  ;;  %v1041_v38 = vadd.f32 %v1040_v34, %v1039_v32  ;;  %v3948_v32 = vld [vmem:[#allocation15 + $0x34] ss:$8 sps:$4 sm:$0xff]   ;;  %v3946_v34 = vld [vmem:[#allocation15 + $0x30] ss:$8 sps:$4 sm:$0xff]  }
 0x7b7   :  { %v920_v39 = vadd.f32 %v919_v35, %v918_v33  ;;  %v1042_v40 = vrot.slane %v1041_v38, 2  ;;  %v3949_v33 = vld [vmem:[%s4945_s9 + $0x28] sm:$0xff]   ;;  %v3950_v35 = vld [vmem:[%s4945_s9 + $0x30] sm:$0xff]  }
 0x7b9   :  { %v921_v41 = vrot.slane %v920_v39, 1  ;;  %v1043_v42 = vadd.f32 %v1042_v40, %v1041_v38  ;;  %v3951_v38 = vld [vmem:[%s4945_s9 + $0x38] sm:$0xff]  }
 0x7bb   :  { %v922_v43 = vadd.f32 %v921_v41, %v920_v39  ;;  %v1044_v44 = vrot.slane %v1043_v42, 1  ;;  %v3306_v39 = vld [vmem:[%s4949_s13] ss:$0 sm:$0xff] }
 0x7bd   :  { %4024 = vrcp.f32 %v922_v43  ;;  %v1045_v45 = vadd.f32 %v1044_v44, %v1043_v42 }
 0x7bf   :  { %4026 = vrcp.f32 %v1045_v45 }
 0x7c7   :  { %v4025_v46 = vpop.eup %4024 }
 0x7c8   :  { %v924_v48 = vpack.c.bf16 %v4025_v46, %v4025_v46 }
 0x7c9   :  { %v4027_v50 = vpop.eup %4026 }
 0x7ca   :  { %v925_v51 = vmul.bf16 %v4021_v26, %v924_v48  ;;  %v1047_v52 = vpack.c.bf16 %v4027_v50, %v4027_v50 }
 0x7cc   :  { %3657 = vmatmul.mubr.msk.bf16.vlgmr.msra.gmra.mrb[24].mxu1 %vm902_vm8, %v925_v51  ;;  %v926_v55 = vunpack.c.l.bf16 %v925_v51  ;;  %v1048_v56 = vmul.bf16 %v4023_v28, %v1047_v52  ;;  %v3939_v28 = vld [vmem:[#allocation15 + $0x10] ss:$8 sps:$4 sm:$0xff]  }
 0x7cd   :  { %3667 = vmatpush3.bf16.msra.mxu1 %v1061_v54  ;;  %3668 = vmatprep.mubr.msk.bf16.mxu1 %vm4270_vm2, %v4268_v0 }
 0x7ce   :  { %v927_v57 = vsel %vm902_vm8, %v926_v55, 0.0  ;;  %v1049_v58 = vunpack.c.l.bf16 %v1048_v56  ;;  %3684 = vmatprep.subr.bf16.mxu1 %v4268_v0 }
 0x7cf   :  { %928 = vadd.xlane.f32.xlu0 %v927_v57  ;;  %v3955_v57 = vld [vmem:[%s4946_s10 + $0x38] sm:$0xff]  }
 0x7d0   :  { %v1050_v53 = vsel %vm902_vm8, %v1049_v58, 0.0 }
 0x7d3   :  { %1051 = vadd.xlane.f32.xlu0 %v1050_v53 }
 0x7d4   :  { %3669 = vmatmul.mubr.msk.bf16.vlgmr.msra.gmra.mrb[28].mxu1 %vm902_vm8, %v1048_v56  ;;  %v3954_v56 = vld [vmem:[%s4946_s10 + $0x30] sm:$0xff]  }
 0x7d5   :  { %3692 = vmatprep.mubr.msk.bf16.mxu1 %vm4270_vm2, %v4268_v0  ;;  %3685 = vmatpush3.bf16.msra.mxu1 %v3945_v30 }
 0x7d6   :  { %3686 = vmatprep.subr.bf16.mxu1 %v4268_v0 }
 0x7d9   :  { %3687 = vmatpush3.bf16.msra.mxu1 %v3949_v33 }
 0x7da   :  { %3688 = vmatprep.subr.bf16.mxu1 %v4268_v0 }
 0x7dd   :  { %3689 = vmatpush3.bf16.msra.mxu1 %v3950_v35 }
 0x7de   :  { %3690 = vmatprep.subr.bf16.mxu1 %v4268_v0 }
 0x7e1   :  { %3691 = vmatpush3.bf16.msra.mxu1 %v3951_v38 }
 0x7e2   :  { %3696 = vmatprep.subr.bf16.mxu1 %v4268_v0 }
 0x85c   :  { %v929_v1 = vpop.xlane.xlu0 %928 }
 0x85d   :  { %v930_v2 = vadd.f32 1e-09, %v929_v1 }
 0x85f   :  { %4028 = vrcp.f32 %v930_v2  ;;  %v3342_v2 = vld [vmem:[#allocation12 + $0x1] ss:$0 sm:$0xff] }
 0x860   :  { %v1052_v3 = vpop.xlane.xlu0 %1051 }
 0x861   :  { %v1053_v4 = vadd.f32 1e-09, %v1052_v3 }
 0x863   :  { %4030 = vrcp.f32 %v1053_v4 }
 0x869   :  { %v4029_v9 = vpop.eup %4028 }
 0x86d   :  { %v4031_v15 = vpop.eup %4030 }
 0x89f   :  { %v973_v10 = vpop.f32.mrb[24].mxu1 }
 0x8a0   :  { %v979_v11 = vmul.f32 %v4029_v9, %v973_v10  ;;  %v3658_v12 = vpop.f32.mrb[25].mxu1 }
 0x8a1   :  { %v976_v13 = vpop.f32.mrb[26].mxu1 }
 0x8a2   :  { %980 = vst.msk [vmem:[#allocation3] sm:$0xff] %vm474_vm6, %v979_v11  ;;  %v3659_v14 = vpop.f32.mrb[27].mxu1 }
 0x8a7   :  { %v1097_v16 = vpop.f32.mrb[28].mxu1 }
 0x8a8   :  { %v1103_v17 = vmul.f32 %v4031_v15, %v1097_v16  ;;  %v3670_v18 = vpop.f32.mrb[29].mxu1 }
 0x8a9   :  { %v1100_v19 = vpop.f32.mrb[30].mxu1  ;;  %v1105_v21 = vld [vmem:[#allocation3] sm:$0xff] }
 0x8aa   :  { %1104 = vst.msk [vmem:[#allocation3 + $0x8] sm:$0xff] %vm474_vm6, %v1103_v17  ;;  %v3671_v20 = vpop.f32.mrb[31].mxu1  ;;  %v1107_v23 = vsub.f32 %v4600_v36, %v1105_v21 }
 0x8b1   :  { %v1106_v22 = vld [vmem:[#allocation3 + $0x8] sm:$0xff] }
 0x8b2   :  { %v1108_v24 = vsub.f32 %v4602_v37, %v1106_v22 }
 0x8b4   :  { %v1109_v26 = vpack.c.bf16 %v1108_v24, %v1107_v23 }
 0x8b6   :  { %3681 = vmatmul.mubr.msk.bf16.vlgmr.msra.gmra.mrb[20].mxu0 %vm474_vm6, %v1109_v26 }
 0x8b7   :  { %1256 = vmatpush1.bf16.msra.mxu0 %v3936_v25  ;;  %1287 = vmatprep.mubr.bf16.mxu0 %v4271_v49 }
 0x8b8   :  { %1257 = vmatprep.subr.bf16.mxu0 %v3941_v27 }
 0x8bb   :  { %1258 = vmatpush1.bf16.msra.mxu0 %v3939_v28 }
 0x8bc   :  { %1259 = vmatprep.subr.bf16.mxu0 %v3944_v29 }
 0x8bf   :  { %1260 = vmatpush1.bf16.msra.mxu0 %v3942_v31 }
 0x8c0   :  { %1261 = vmatprep.subr.bf16.mxu0 %v3948_v32 }
 0x8c3   :  { %1262 = vmatpush1.bf16.msra.mxu0 %v3946_v34 }
 0x8c4   :  { %3708 = vmatprep.subr.bf16.mxu0 %v4268_v0 }
 0x989   :  { %v1186_v40 = vpop.f32.mrb[20].mxu0 }
 0x98a   :  { %v1187_v41 = vadd.f32 %v3306_v39, %v1186_v40  ;;  %v3682_v42 = vpop.f32.mrb[21].mxu0 }
 0x98b   :  { %v1189_v43 = vpop.f32.mrb[22].mxu0 }
 0x98c   :  { %v1193_v44 = vmax.f32 %v1187_v41, 0.0  ;;  %v1190_v45 = vadd.f32 %v3306_v39, %v1189_v43  ;;  %v3683_v46 = vpop.f32.mrb[23].mxu0 }
 0x98e   :  { %v1195_v47 = vadd.f32 %v1193_v44, %v4600_v36  ;;  %v1194_v48 = vmax.f32 %v1190_v45, 0.0  ;;  %v3952_v36 = vld [vmem:[%s4946_s10 + $0x20] sm:$0xff]  }
 0x990   :  { %1197 = vst.msk [vmem:[#allocation2] sm:$0xff] %vm474_vm6, %v1195_v47  ;;  %v1196_v50 = vadd.f32 %v1194_v48, %v4602_v37  ;;  %v3953_v37 = vld [vmem:[%s4946_s10 + $0x28] sm:$0xff]  }
 0x992   :  { %1198 = vst.msk [vmem:[#allocation2 + $0x8] sm:$0xff] %vm474_vm6, %v1196_v50  ;;  %v1203_v51 = vpack.c.bf16 %v1196_v50, %v1195_v47 }
 0x994   :  { %3320 = vmatmul.mubr.msk.bf16.vlgmr.msra.gmra.mrb[24].mxu0 %vm474_vm6, %v1203_v51 }
 0x995   :  { %3710 = vmatprep.mubr.msk.bf16.mxu0 %vm4270_vm2, %v4268_v0 }
 0x997   :  { %v4678_v52 = vld [vmem:[#allocation2] sm:$0xff] }
 0x999   :  { %v4680_v54 = vld [vmem:[#allocation2 + $0x8] sm:$0xff] }
 0x99a   :  { %v1308_v55 = vpack.c.bf16 %v4680_v54, %v4678_v52 }
 0x99c   :  { %3693 = vmatmul.mubr.msk.bf16.vlgmr.msra.gmra.mrb[32].mxu1 %vm474_vm6, %v1308_v55 }
 0x99d   :  { %3697 = vmatpush3.bf16.msra.mxu1 %v3952_v36  ;;  %3704 = vmatprep.mubr.msk.bf16.mxu1 %vm4270_vm2, %v4268_v0 }
 0x99e   :  { %3698 = vmatprep.subr.bf16.mxu1 %v4268_v0 }
 0x9a1   :  { %3699 = vmatpush3.bf16.msra.mxu1 %v3953_v37 }
 0x9a2   :  { %3700 = vmatprep.subr.bf16.mxu1 %v4268_v0 }
 0x9a5   :  { %3701 = vmatpush3.bf16.msra.mxu1 %v3954_v56 }
 0x9a6   :  { %3702 = vmatprep.subr.bf16.mxu1 %v4268_v0 }
 0x9a9   :  { %3703 = vmatpush3.bf16.msra.mxu1 %v3955_v57 }
 0x9aa   :  { %3714 = vmatprep.subr.bf16.mxu1 %v4268_v0 }
 0x9ac   :  { %3705 = vmatmul.mubr.msk.bf16.vlgmr.msra.gmra.mrb[36].mxu1 %vm474_vm6, %v1308_v55 }
 0x9ad   :  { %3716 = vmatprep.mubr.msk.bf16.mxu1 %vm4270_vm2, %v4268_v0 }
 0xa6f   :  { %v1379_v58 = vpop.f32.mrb[32].mxu1 }
 0xa70   :  { %v3694_v53 = vpop.f32.mrb[33].mxu1 }
 0xa71   :  { %v1382_v59 = vpop.f32.mrb[34].mxu1 }
 0xa72   :  { %v1386_v60 = vpack.c.bf16 %v1382_v59, %v1379_v58  ;;  %v3695_v61 = vpop.f32.mrb[35].mxu1 }
 0xa74   :  { %v1471_v62 = vsel %vm245_vm4, %v1386_v60, 0  ;;  %v1591_v63 = vrot.slane %v1386_v60, 4 }
 0xa75   :  { %3709 = vmatpush3.bf16.xpose.msra.mxu0 %v1471_v62 }
 0xa76   :  { %3720 = vmatprep.subr.bf16.mxu0 %v4268_v0  ;;  %v1593_v1 = vsel %vm245_vm4, %v1591_v63, 0 }
 0xa7c   :  { %3711 = vmatmul.mubr.msk.bf16.vlgmr.msra.gmra.mrb[28].mxu0 %vm245_vm4, %v1386_v60 }
 0xa7d   :  { %3721 = vmatpush3.bf16.xpose.msra.mxu0 %v1593_v1  ;;  %3722 = vmatprep.mubr.msk.bf16.mxu0 %vm4270_vm2, %v4268_v0 }
 0xa7e   :  { %3732 = vmatprep.subr.bf16.mxu0 %v4268_v0 }
 0xa7f   :  { %v1462_v3 = vpop.f32.mrb[36].mxu1 }
 0xa80   :  { %v3706_v4 = vpop.f32.mrb[37].mxu1  ;;  %v1463_v10 = vadd.f32 %v3342_v2, %v1462_v3 }
 0xa81   :  { %v1465_v9 = vpop.f32.mrb[38].mxu1 }
 0xa82   :  { %v1466_v11 = vadd.f32 %v3342_v2, %v1465_v9  ;;  %v3707_v12 = vpop.f32.mrb[39].mxu1 }
 0xa84   :  { %v1469_v13 = vpack.c.bf16 %v1466_v11, %v1463_v10  ;;  %3723 = vmatmul.mubr.msk.bf16.vlgmr.msra.gmra.mrb[32].mxu0 %vm245_vm4, %v1591_v63 }
 0xa85   :  { %3740 = vmatprep.mubr.msk.bf16.mxu0 %vm4270_vm2, %v4268_v0 }
 0xa86   :  { %v1546_v14 = vsel %vm935_vm7, %v1469_v13, 0  ;;  %v1665_v2 = vrot.slane %v1469_v13, 4 }
 0xa87   :  { %3715 = vmatpush3.bf16.msra.mxu1 %v1546_v14 }
 0xa88   :  { %3726 = vmatprep.subr.bf16.mxu1 %v4268_v0  ;;  %v1670_v9 = vsel %vm935_vm7, %v1665_v2, 0 }
 0xb4f   :  { %v1507_v15 = vpop.f32.mrb[28].mxu0 }
 0xb50   :  { %v1513_v16 = vsel %vm902_vm8, %v1507_v15, -inf  ;;  %v3712_v17 = vpop.f32.mrb[29].mxu0 }
 0xb51   :  { %v1514_v18 = vrot.slane %v1513_v16, 4  ;;  %v1510_v19 = vpop.f32.mrb[30].mxu0  ;;  %v3956_v17 = vld [vmem:[#allocation13 + $0x20] sm:$0xff]  }
 0xb52   :  { %v3713_v20 = vpop.f32.mrb[31].mxu0  ;;  %3733 = vmatpush3.bf16.msra.mxu0 %v3956_v17  ;;  %v3958_v19 = vld [vmem:[#allocation13 + $0x30] sm:$0xff]  }
 0xb53   :  { %v1515_v21 = vmax.f32 %v1513_v16, %v1514_v18  ;;  %3734 = vmatprep.subr.bf16.mxu0 %v4268_v0  ;;  %v3957_v18 = vld [vmem:[#allocation13 + $0x28] sm:$0xff]   ;;  %v3959_v20 = vld [vmem:[#allocation13 + $0x38] sm:$0xff]  }
 0xb55   :  { %v1516_v22 = vrot.slane %v1515_v21, 2 }
 0xb56   :  { %3735 = vmatpush3.bf16.msra.mxu0 %v3957_v18 }
 0xb57   :  { %v1517_v23 = vmax.f32 %v1515_v21, %v1516_v22  ;;  %v1629_v24 = vpop.f32.mrb[32].mxu0  ;;  %3736 = vmatprep.subr.bf16.mxu0 %v4268_v0  ;;  %v3962_v21 = vld [vmem:[#allocation15 + $0x44] ss:$8 sps:$4 sm:$0xff]  }
 0xb58   :  { %v1635_v25 = vsel %vm902_vm8, %v1629_v24, -inf  ;;  %v3724_v26 = vpop.f32.mrb[33].mxu0 }
 0xb59   :  { %v1518_v27 = vrot.slane %v1517_v23, 1  ;;  %v1636_v28 = vrot.slane %v1635_v25, 4  ;;  %v1632_v29 = vpop.f32.mrb[34].mxu0 }
 0xb5a   :  { %v3725_v30 = vpop.f32.mrb[35].mxu0  ;;  %3737 = vmatpush3.bf16.msra.mxu0 %v3958_v19 }
 0xb5b   :  { %v1519_v31 = vmax.f32 %v1517_v23, %v1518_v27  ;;  %v1637_v32 = vmax.f32 %v1635_v25, %v1636_v28  ;;  %3738 = vmatprep.subr.bf16.mxu0 %v4268_v0 }
 0xb5d   :  { %v1520_v33 = vsub.f32 %v1507_v15, %v1519_v31  ;;  %v1638_v34 = vrot.slane %v1637_v32, 2 }
 0xb5e   :  { %3739 = vmatpush3.bf16.msra.mxu0 %v3959_v20 }
 0xb5f   :  { %v1521_v35 = vpack.c.bf16 %v1520_v33, %v1520_v33  ;;  %v1639_v38 = vmax.f32 %v1637_v32, %v1638_v34  ;;  %1866 = vmatprep.subr.bf16.mxu0 %v3962_v21 }
 0xb61   :  { %v1523_v39 = vmul.bf16 1069105081, %v1521_v35  ;;  %v1640_v40 = vrot.slane %v1639_v38, 1 }
 0xb63   :  { %4032 = vpow.bf16 %v1523_v39  ;;  %v1641_v41 = vmax.f32 %v1639_v38, %v1640_v40 }
 0xb65   :  { %v1642_v42 = vsub.f32 %v1629_v24, %v1641_v41 }
 0xb67   :  { %v1643_v43 = vpack.c.bf16 %v1642_v42, %v1642_v42 }
 0xb69   :  { %v1645_v44 = vmul.bf16 1069105081, %v1643_v43 }
 0xb6b   :  { %4034 = vpow.bf16 %v1645_v44  ;;  %v3960_v44 = vld [vmem:[#allocation15 + $0x40] ss:$8 sps:$4 sm:$0xff]  }
 0xb6e   :  { %v4033_v45 = vpop.eup %4032 }
 0xb6f   :  { %v1525_v46 = vunpack.c.l.bf16 %v4033_v45 }
 0xb71   :  { %v1526_v47 = vsel %vm902_vm8, %v1525_v46, 0.0  ;;  %v3965_v46 = vld [vmem:[#allocation15 + $0x54] ss:$8 sps:$4 sm:$0xff]  }
 0xb72   :  { %v1527_v48 = vrot.slane %v1526_v47, 4 }
 0xb74   :  { %v1528_v50 = vadd.f32 %v1527_v48, %v1526_v47  ;;  %v3963_v47 = vld [vmem:[#allocation15 + $0x50] ss:$8 sps:$4 sm:$0xff]   ;;  %v3968_v48 = vld [vmem:[#allocation15 + $0x64] ss:$8 sps:$4 sm:$0xff]  }
 0xb76   :  { %v4035_v51 = vpop.eup %4034  ;;  %v1529_v36 = vrot.slane %v1528_v50, 2 }
 0xb77   :  { %v1647_v55 = vunpack.c.l.bf16 %v4035_v51 }
 0xb78   :  { %v1530_v37 = vadd.f32 %v1529_v36, %v1528_v50  ;;  %v3969_v50 = vld [vmem:[%s4945_s9 + $0x40] sm:$0xff]   ;;  %v3972_v36 = vld [vmem:[#allocation15 + $0x74] ss:$8 sps:$4 sm:$0xff]  }
 0xb79   :  { %v1648_v56 = vsel %vm902_vm8, %v1647_v55, 0.0  ;;  %v3973_v55 = vld [vmem:[%s4945_s9 + $0x48] sm:$0xff]  }
 0xb7a   :  { %v1649_v57 = vrot.slane %v1648_v56, 4  ;;  %v1531_v58 = vrot.slane %v1530_v37, 1 }
 0xb7c   :  { %v1650_v53 = vadd.f32 %v1649_v57, %v1648_v56  ;;  %v1532_v59 = vadd.f32 %v1531_v58, %v1530_v37  ;;  %v3970_v37 = vld [vmem:[#allocation15 + $0x70] ss:$8 sps:$4 sm:$0xff]   ;;  %v3975_v57 = vld [vmem:[%s4945_s9 + $0x58] sm:$0xff]   ;;  %v3353_v58 = vld [vmem:[%s4949_s13 + $0x1] ss:$0 sm:$0xff] }
 0xb7d   :  { %v3974_v56 = vld [vmem:[%s4945_s9 + $0x50] sm:$0xff]  }
 0xb7e   :  { %v1651_v60 = vrot.slane %v1650_v53, 2  ;;  %4036 = vrcp.f32 %v1532_v59 }
 0xb80   :  { %v1652_v61 = vadd.f32 %v1651_v60, %v1650_v53 }
 0xb82   :  { %v1653_v62 = vrot.slane %v1652_v61, 1 }
 0xb84   :  { %v1654_v63 = vadd.f32 %v1653_v62, %v1652_v61 }
 0xb86   :  { %4038 = vrcp.f32 %v1654_v63 }
 0xb88   :  { %v4037_v1 = vpop.eup %4036 }
 0xb89   :  { %v1534_v3 = vpack.c.bf16 %v4037_v1, %v4037_v1 }
 0xb8b   :  { %v1535_v4 = vmul.bf16 %v4033_v45, %v1534_v3 }
 0xb8d   :  { %3717 = vmatmul.mubr.msk.bf16.vlgmr.msra.gmra.mrb[40].mxu1 %vm902_vm8, %v1535_v4  ;;  %v1536_v10 = vunpack.c.l.bf16 %v1535_v4 }
 0xb8e   :  { %3727 = vmatpush3.bf16.msra.mxu1 %v1670_v9  ;;  %3728 = vmatprep.mubr.msk.bf16.mxu1 %vm4270_vm2, %v4268_v0 }
 0xb8f   :  { %v1537_v11 = vsel %vm902_vm8, %v1536_v10, 0.0  ;;  %3744 = vmatprep.subr.bf16.mxu1 %v4268_v0 }
 0xb90   :  { %v4039_v12 = vpop.eup %4038  ;;  %1538 = vadd.xlane.f32.xlu1 %v1537_v11 }
 0xb91   :  { %v1656_v14 = vpack.c.bf16 %v4039_v12, %v4039_v12 }
 0xb93   :  { %v1657_v15 = vmul.bf16 %v4035_v51, %v1656_v14  ;;  %v3966_v51 = vld [vmem:[#allocation15 + $0x60] ss:$8 sps:$4 sm:$0xff]   ;;  %v3978_v14 = vld [vmem:[%s4946_s10 + $0x50] sm:$0xff]  }
 0xb95   :  { %3729 = vmatmul.mubr.msk.bf16.vlgmr.msra.gmra.mrb[44].mxu1 %vm902_vm8, %v1657_v15  ;;  %v1658_v13 = vunpack.c.l.bf16 %v1657_v15  ;;  %v3979_v15 = vld [vmem:[%s4946_s10 + $0x58] sm:$0xff]  }
 0xb96   :  { %3752 = vmatprep.mubr.msk.bf16.mxu1 %vm4270_vm2, %v4268_v0  ;;  %3745 = vmatpush3.bf16.msra.mxu1 %v3969_v50 }
 0xb97   :  { %v1659_v16 = vsel %vm902_vm8, %v1658_v13, 0.0  ;;  %3746 = vmatprep.subr.bf16.mxu1 %v4268_v0 }
 0xb98   :  { %1660 = vadd.xlane.f32.xlu1 %v1659_v16 }
 0xb9a   :  { %3747 = vmatpush3.bf16.msra.mxu1 %v3973_v55 }
 0xb9b   :  { %3748 = vmatprep.subr.bf16.mxu1 %v4268_v0 }
 0xb9e   :  { %3749 = vmatpush3.bf16.msra.mxu1 %v3974_v56 }
 0xb9f   :  { %3750 = vmatprep.subr.bf16.mxu1 %v4268_v0 }
 0xba2   :  { %3751 = vmatpush3.bf16.msra.mxu1 %v3975_v57 }
 0xba3   :  { %3756 = vmatprep.subr.bf16.mxu1 %v4268_v0 }
 0xc1d   :  { %v1539_v22 = vpop.xlane.xlu1 %1538 }
 0xc1e   :  { %v1540_v23 = vadd.f32 1e-09, %v1539_v22 }
 0xc20   :  { %4040 = vrcp.f32 %v1540_v23  ;;  %v3389_v23 = vld [vmem:[#allocation12 + $0x2] ss:$0 sm:$0xff] }
 0xc25   :  { %v1661_v24 = vpop.xlane.xlu1 %1660 }
 0xc26   :  { %v1662_v25 = vadd.f32 1e-09, %v1661_v24 }
 0xc28   :  { %4042 = vrcp.f32 %v1662_v25 }
 0xc2a   :  { %v4041_v26 = vpop.eup %4040 }
 0xc32   :  { %v4043_v32 = vpop.eup %4042 }
 0xc60   :  { %v1582_v27 = vpop.f32.mrb[40].mxu1 }
 0xc61   :  { %v1588_v28 = vmul.f32 %v4041_v26, %v1582_v27  ;;  %v3718_v29 = vpop.f32.mrb[41].mxu1 }
 0xc62   :  { %v1585_v30 = vpop.f32.mrb[42].mxu1 }
 0xc63   :  { %1589 = vst.msk [vmem:[#allocation3] sm:$0xff] %vm474_vm6, %v1588_v28  ;;  %v3719_v31 = vpop.f32.mrb[43].mxu1 }
 0xc68   :  { %v1706_v33 = vpop.f32.mrb[44].mxu1 }
 0xc69   :  { %v1712_v34 = vmul.f32 %v4043_v32, %v1706_v33  ;;  %v3730_v35 = vpop.f32.mrb[45].mxu1 }
 0xc6a   :  { %v1709_v38 = vpop.f32.mrb[46].mxu1  ;;  %v1714_v40 = vld [vmem:[#allocation3] sm:$0xff] }
 0xc6b   :  { %1713 = vst.msk [vmem:[#allocation3 + $0x8] sm:$0xff] %vm474_vm6, %v1712_v34  ;;  %v3731_v39 = vpop.f32.mrb[47].mxu1  ;;  %v1716_v42 = vsub.f32 %v4678_v52, %v1714_v40 }
 0xc72   :  { %v1715_v41 = vld [vmem:[#allocation3 + $0x8] sm:$0xff] }
 0xc73   :  { %v1717_v43 = vsub.f32 %v4680_v54, %v1715_v41 }
 0xc75   :  { %v1718_v45 = vpack.c.bf16 %v1717_v43, %v1716_v42 }
 0xc77   :  { %3741 = vmatmul.mubr.msk.bf16.vlgmr.msra.gmra.mrb[36].mxu0 %vm474_vm6, %v1718_v45 }
 0xc78   :  { %1867 = vmatpush1.bf16.msra.mxu0 %v3960_v44  ;;  %1898 = vmatprep.mubr.bf16.mxu0 %v4271_v49 }
 0xc79   :  { %1868 = vmatprep.subr.bf16.mxu0 %v3965_v46 }
 0xc7c   :  { %1869 = vmatpush1.bf16.msra.mxu0 %v3963_v47 }
 0xc7d   :  { %1870 = vmatprep.subr.bf16.mxu0 %v3968_v48 }
 0xc80   :  { %1871 = vmatpush1.bf16.msra.mxu0 %v3966_v51 }
 0xc81   :  { %1872 = vmatprep.subr.bf16.mxu0 %v3972_v36 }
 0xc84   :  { %1873 = vmatpush1.bf16.msra.mxu0 %v3970_v37 }
 0xc85   :  { %3768 = vmatprep.subr.bf16.mxu0 %v4268_v0 }
 0xd4a   :  { %v1797_v53 = vpop.f32.mrb[36].mxu0 }
 0xd4b   :  { %v1798_v59 = vadd.f32 %v3353_v58, %v1797_v53  ;;  %v3742_v60 = vpop.f32.mrb[37].mxu0 }
 0xd4c   :  { %v1800_v61 = vpop.f32.mrb[38].mxu0 }
 0xd4d   :  { %v1804_v62 = vmax.f32 %v1798_v59, 0.0  ;;  %v1801_v63 = vadd.f32 %v3353_v58, %v1800_v61  ;;  %v3743_v1 = vpop.f32.mrb[39].mxu0 }
 0xd4f   :  { %v1806_v2 = vadd.f32 %v1804_v62, %v4678_v52  ;;  %v1805_v3 = vmax.f32 %v1801_v63, 0.0  ;;  %v3976_v52 = vld [vmem:[%s4946_s10 + $0x40] sm:$0xff]  }
 0xd51   :  { %1808 = vst.msk [vmem:[#allocation2] sm:$0xff] %vm474_vm6, %v1806_v2  ;;  %v1807_v4 = vadd.f32 %v1805_v3, %v4680_v54  ;;  %v3977_v54 = vld [vmem:[%s4946_s10 + $0x48] sm:$0xff]  }
 0xd53   :  { %1809 = vst.msk [vmem:[#allocation2 + $0x8] sm:$0xff] %vm474_vm6, %v1807_v4  ;;  %v1814_v9 = vpack.c.bf16 %v1807_v4, %v1806_v2 }
 0xd55   :  { %3367 = vmatmul.mubr.msk.bf16.vlgmr.msra.gmra.mrb[24].mxu0 %vm474_vm6, %v1814_v9 }
 0xd56   :  { %3770 = vmatprep.mubr.msk.bf16.mxu0 %vm4270_vm2, %v4268_v0 }
 0xd58   :  { %v4768_v10 = vld [vmem:[#allocation2] sm:$0xff] }
 0xd5a   :  { %v4770_v11 = vld [vmem:[#allocation2 + $0x8] sm:$0xff] }
 0xd5b   :  { %v1919_v12 = vpack.c.bf16 %v4770_v11, %v4768_v10 }
 0xd5d   :  { %3753 = vmatmul.mubr.msk.bf16.vlgmr.msra.gmra.mrb[48].mxu1 %vm474_vm6, %v1919_v12 }
 0xd5e   :  { %3757 = vmatpush3.bf16.msra.mxu1 %v3976_v52  ;;  %3764 = vmatprep.mubr.msk.bf16.mxu1 %vm4270_vm2, %v4268_v0 }
 0xd5f   :  { %3758 = vmatprep.subr.bf16.mxu1 %v4268_v0 }
 0xd62   :  { %3759 = vmatpush3.bf16.msra.mxu1 %v3977_v54 }
 0xd63   :  { %3760 = vmatprep.subr.bf16.mxu1 %v4268_v0 }
 0xd66   :  { %3761 = vmatpush3.bf16.msra.mxu1 %v3978_v14 }
 0xd67   :  { %3762 = vmatprep.subr.bf16.mxu1 %v4268_v0 }
 0xd6a   :  { %3763 = vmatpush3.bf16.msra.mxu1 %v3979_v15 }
 0xd6b   :  { %3774 = vmatprep.subr.bf16.mxu1 %v4268_v0 }
 0xd6d   :  { %3765 = vmatmul.mubr.msk.bf16.vlgmr.msra.gmra.mrb[52].mxu1 %vm474_vm6, %v1919_v12 }
 0xd6e   :  { %3776 = vmatprep.mubr.msk.bf16.mxu1 %vm4270_vm2, %v4268_v0 }
 0xe30   :  { %v1990_v13 = vpop.f32.mrb[48].mxu1 }
 0xe31   :  { %v3754_v16 = vpop.f32.mrb[49].mxu1 }
 0xe32   :  { %v1993_v17 = vpop.f32.mrb[50].mxu1 }
 0xe33   :  { %v1997_v18 = vpack.c.bf16 %v1993_v17, %v1990_v13  ;;  %v3755_v19 = vpop.f32.mrb[51].mxu1 }
 0xe35   :  { %v2082_v20 = vsel %vm245_vm4, %v1997_v18, 0  ;;  %v2202_v21 = vrot.slane %v1997_v18, 4 }
 0xe36   :  { %3769 = vmatpush3.bf16.xpose.msra.mxu0 %v2082_v20 }
 0xe37   :  { %3780 = vmatprep.subr.bf16.mxu0 %v4268_v0  ;;  %v2204_v22 = vsel %vm245_vm4, %v2202_v21, 0 }
 0xe3d   :  { %3771 = vmatmul.mubr.msk.bf16.vlgmr.msra.gmra.mrb[40].mxu0 %vm245_vm4, %v1997_v18 }
 0xe3e   :  { %3781 = vmatpush3.bf16.xpose.msra.mxu0 %v2204_v22  ;;  %3782 = vmatprep.mubr.msk.bf16.mxu0 %vm4270_vm2, %v4268_v0 }
 0xe3f   :  { %3792 = vmatprep.subr.bf16.mxu0 %v4268_v0 }
 0xe40   :  { %v2073_v24 = vpop.f32.mrb[52].mxu1 }
 0xe41   :  { %v3766_v25 = vpop.f32.mrb[53].mxu1  ;;  %v2074_v27 = vadd.f32 %v3389_v23, %v2073_v24 }
 0xe42   :  { %v2076_v26 = vpop.f32.mrb[54].mxu1 }
 0xe43   :  { %v2077_v28 = vadd.f32 %v3389_v23, %v2076_v26  ;;  %v3767_v29 = vpop.f32.mrb[55].mxu1 }
 0xe45   :  { %v2080_v30 = vpack.c.bf16 %v2077_v28, %v2074_v27  ;;  %3783 = vmatmul.mubr.msk.bf16.vlgmr.msra.gmra.mrb[44].mxu0 %vm245_vm4, %v2202_v21 }
 0xe46   :  { %3800 = vmatprep.mubr.msk.bf16.mxu0 %vm4270_vm2, %v4268_v0 }
 0xe47   :  { %v2157_v31 = vsel %vm935_vm7, %v2080_v30, 0  ;;  %v2276_v23 = vrot.slane %v2080_v30, 4 }
 0xe48   :  { %3775 = vmatpush3.bf16.msra.mxu1 %v2157_v31 }
 0xe49   :  { %3786 = vmatprep.subr.bf16.mxu1 %v4268_v0  ;;  %v2281_v26 = vsel %vm935_vm7, %v2276_v23, 0 }
 0xf10   :  { %v2118_v32 = vpop.f32.mrb[40].mxu0 }
 0xf11   :  { %v2124_v33 = vsel %vm902_vm8, %v2118_v32, -inf  ;;  %v3772_v34 = vpop.f32.mrb[41].mxu0 }
 0xf12   :  { %v2125_v35 = vrot.slane %v2124_v33, 4  ;;  %v2121_v38 = vpop.f32.mrb[42].mxu0  ;;  %v3980_v34 = vld [vmem:[#allocation13 + $0x40] sm:$0xff]  }
 0xf13   :  { %v3773_v39 = vpop.f32.mrb[43].mxu0  ;;  %3793 = vmatpush3.bf16.msra.mxu0 %v3980_v34  ;;  %v3982_v38 = vld [vmem:[#allocation13 + $0x50] sm:$0xff]  }
 0xf14   :  { %v2126_v40 = vmax.f32 %v2124_v33, %v2125_v35  ;;  %3794 = vmatprep.subr.bf16.mxu0 %v4268_v0  ;;  %v3981_v35 = vld [vmem:[#allocation13 + $0x48] sm:$0xff]   ;;  %v3983_v39 = vld [vmem:[#allocation13 + $0x58] sm:$0xff]  }
 0xf16   :  { %v2127_v41 = vrot.slane %v2126_v40, 2 }
 0xf17   :  { %3795 = vmatpush3.bf16.msra.mxu0 %v3981_v35 }
 0xf18   :  { %v2128_v42 = vmax.f32 %v2126_v40, %v2127_v41  ;;  %v2240_v43 = vpop.f32.mrb[44].mxu0  ;;  %3796 = vmatprep.subr.bf16.mxu0 %v4268_v0  ;;  %v3986_v40 = vld [vmem:[#allocation15 + $0x84] ss:$8 sps:$4 sm:$0xff]  }
 0xf19   :  { %v2246_v44 = vsel %vm902_vm8, %v2240_v43, -inf  ;;  %v3784_v45 = vpop.f32.mrb[45].mxu0 }
 0xf1a   :  { %v2129_v46 = vrot.slane %v2128_v42, 1  ;;  %v2247_v47 = vrot.slane %v2246_v44, 4  ;;  %v2243_v48 = vpop.f32.mrb[46].mxu0 }
 0xf1b   :  { %v3785_v50 = vpop.f32.mrb[47].mxu0  ;;  %3797 = vmatpush3.bf16.msra.mxu0 %v3982_v38 }
 0xf1c   :  { %v2130_v51 = vmax.f32 %v2128_v42, %v2129_v46  ;;  %v2248_v36 = vmax.f32 %v2246_v44, %v2247_v47  ;;  %3798 = vmatprep.subr.bf16.mxu0 %v4268_v0 }
 0xf1e   :  { %v2131_v55 = vsub.f32 %v2118_v32, %v2130_v51  ;;  %v2249_v37 = vrot.slane %v2248_v36, 2 }
 0xf1f   :  { %3799 = vmatpush3.bf16.msra.mxu0 %v3983_v39 }
 0xf20   :  { %v2132_v56 = vpack.c.bf16 %v2131_v55, %v2131_v55  ;;  %v2250_v57 = vmax.f32 %v2248_v36, %v2249_v37  ;;  %2477 = vmatprep.subr.bf16.mxu0 %v3986_v40 }
 0xf22   :  { %v2134_v58 = vmul.bf16 1069105081, %v2132_v56  ;;  %v2251_v53 = vrot.slane %v2250_v57, 1 }
 0xf24   :  { %4044 = vpow.bf16 %v2134_v58  ;;  %v2252_v59 = vmax.f32 %v2250_v57, %v2251_v53 }
 0xf26   :  { %v2253_v60 = vsub.f32 %v2240_v43, %v2252_v59 }
 0xf28   :  { %v2254_v61 = vpack.c.bf16 %v2253_v60, %v2253_v60 }
 0xf2a   :  { %v2256_v62 = vmul.bf16 1069105081, %v2254_v61 }
 0xf2c   :  { %4046 = vpow.bf16 %v2256_v62  ;;  %v3984_v62 = vld [vmem:[#allocation15 + $0x80] ss:$8 sps:$4 sm:$0xff]  }
 0xf2f   :  { %v4045_v63 = vpop.eup %4044 }
 0xf30   :  { %v2136_v1 = vunpack.c.l.bf16 %v4045_v63 }
 0xf32   :  { %v2137_v2 = vsel %vm902_vm8, %v2136_v1, 0.0  ;;  %v3989_v1 = vld [vmem:[#allocation15 + $0x94] ss:$8 sps:$4 sm:$0xff]  }
 0xf33   :  { %v2138_v3 = vrot.slane %v2137_v2, 4 }
 0xf35   :  { %v2139_v4 = vadd.f32 %v2138_v3, %v2137_v2  ;;  %v3987_v2 = vld [vmem:[#allocation15 + $0x90] ss:$8 sps:$4 sm:$0xff]   ;;  %v3992_v3 = vld [vmem:[#allocation15 + $0xa4] ss:$8 sps:$4 sm:$0xff]  }
 0xf37   :  { %v4047_v9 = vpop.eup %4046  ;;  %v2140_v52 = vrot.slane %v2139_v4, 2 }
 0xf38   :  { %v2258_v12 = vunpack.c.l.bf16 %v4047_v9 }
 0xf39   :  { %v2141_v54 = vadd.f32 %v2140_v52, %v2139_v4  ;;  %v3993_v4 = vld [vmem:[%s4945_s9 + $0x60] sm:$0xff]   ;;  %v3996_v52 = vld [vmem:[#allocation15 + $0xb4] ss:$8 sps:$4 sm:$0xff]  }
 0xf3a   :  { %v2259_v14 = vsel %vm902_vm8, %v2258_v12, 0.0  ;;  %v3997_v12 = vld [vmem:[%s4945_s9 + $0x68] sm:$0xff]  }
 0xf3b   :  { %v2260_v15 = vrot.slane %v2259_v14, 4  ;;  %v2142_v13 = vrot.slane %v2141_v54, 1 }
 0xf3d   :  { %v2261_v16 = vadd.f32 %v2260_v15, %v2259_v14  ;;  %v2143_v17 = vadd.f32 %v2142_v13, %v2141_v54  ;;  %v3994_v54 = vld [vmem:[#allocation15 + $0xb0] ss:$8 sps:$4 sm:$0xff]   ;;  %v3999_v15 = vld [vmem:[%s4945_s9 + $0x78] sm:$0xff]   ;;  %v3400_v13 = vld [vmem:[%s4949_s13 + $0x2] ss:$0 sm:$0xff] }
 0xf3e   :  { %v3998_v14 = vld [vmem:[%s4945_s9 + $0x70] sm:$0xff]  }
 0xf3f   :  { %v2262_v18 = vrot.slane %v2261_v16, 2  ;;  %4048 = vrcp.f32 %v2143_v17 }
 0xf41   :  { %v2263_v19 = vadd.f32 %v2262_v18, %v2261_v16 }
 0xf43   :  { %v2264_v20 = vrot.slane %v2263_v19, 1 }
 0xf45   :  { %v2265_v21 = vadd.f32 %v2264_v20, %v2263_v19 }
 0xf47   :  { %4050 = vrcp.f32 %v2265_v21 }
 0xf49   :  { %v4049_v22 = vpop.eup %4048 }
 0xf4a   :  { %v2145_v24 = vpack.c.bf16 %v4049_v22, %v4049_v22 }
 0xf4c   :  { %v2146_v25 = vmul.bf16 %v4045_v63, %v2145_v24 }
 0xf4e   :  { %3777 = vmatmul.mubr.msk.bf16.vlgmr.msra.gmra.mrb[56].mxu1 %vm902_vm8, %v2146_v25  ;;  %v2147_v27 = vunpack.c.l.bf16 %v2146_v25 }
 0xf4f   :  { %3787 = vmatpush3.bf16.msra.mxu1 %v2281_v26  ;;  %3788 = vmatprep.mubr.msk.bf16.mxu1 %vm4270_vm2, %v4268_v0 }
 0xf50   :  { %v2148_v28 = vsel %vm902_vm8, %v2147_v27, 0.0  ;;  %3804 = vmatprep.subr.bf16.mxu1 %v4268_v0 }
 0xf51   :  { %v4051_v29 = vpop.eup %4050  ;;  %2149 = vadd.xlane.f32.xlu0 %v2148_v28 }
 0xf52   :  { %v2267_v31 = vpack.c.bf16 %v4051_v29, %v4051_v29 }
 0xf54   :  { %v2268_v32 = vmul.bf16 %v4047_v9, %v2267_v31  ;;  %v3990_v9 = vld [vmem:[#allocation15 + $0xa0] ss:$8 sps:$4 sm:$0xff]   ;;  %v4002_v31 = vld [vmem:[%s4946_s10 + $0x70] sm:$0xff]  }
 0xf56   :  { %3789 = vmatmul.mubr.msk.bf16.vlgmr.msra.gmra.mrb[60].mxu1 %vm902_vm8, %v2268_v32  ;;  %v2269_v30 = vunpack.c.l.bf16 %v2268_v32  ;;  %v4003_v32 = vld [vmem:[%s4946_s10 + $0x78] sm:$0xff]  }
 0xf57   :  { %3812 = vmatprep.mubr.msk.bf16.mxu1 %vm4270_vm2, %v4268_v0  ;;  %3805 = vmatpush3.bf16.msra.mxu1 %v3993_v4 }
 0xf58   :  { %v2270_v33 = vsel %vm902_vm8, %v2269_v30, 0.0  ;;  %3806 = vmatprep.subr.bf16.mxu1 %v4268_v0 }
 0xf59   :  { %2271 = vadd.xlane.f32.xlu1 %v2270_v33 }
 0xf5b   :  { %3807 = vmatpush3.bf16.msra.mxu1 %v3997_v12 }
 0xf5c   :  { %3808 = vmatprep.subr.bf16.mxu1 %v4268_v0 }
 0xf5f   :  { %3809 = vmatpush3.bf16.msra.mxu1 %v3998_v14 }
 0xf60   :  { %3810 = vmatprep.subr.bf16.mxu1 %v4268_v0 }
 0xf63   :  { %3811 = vmatpush3.bf16.msra.mxu1 %v3999_v15 }
 0xf64   :  { %3816 = vmatprep.subr.bf16.mxu1 %v4268_v0 }
 0xfde   :  { %v2150_v41 = vpop.xlane.xlu0 %2149 }
 0xfdf   :  { %v2151_v42 = vadd.f32 1e-09, %v2150_v41 }
 0xfe1   :  { %4052 = vrcp.f32 %v2151_v42  ;;  %v3436_v42 = vld [vmem:[#allocation12 + $0x3] ss:$0 sm:$0xff] }
 0xfe6   :  { %v2272_v43 = vpop.xlane.xlu1 %2271 }
 0xfe7   :  { %v2273_v44 = vadd.f32 1e-09, %v2272_v43 }
 0xfe9   :  { %4054 = vrcp.f32 %v2273_v44 }
 0xfeb   :  { %v4053_v45 = vpop.eup %4052 }
 0xff3   :  { %v4055_v36 = vpop.eup %4054 }
0x1021   :  { %v2193_v46 = vpop.f32.mrb[56].mxu1 }
0x1022   :  { %v2199_v47 = vmul.f32 %v4053_v45, %v2193_v46  ;;  %v3778_v48 = vpop.f32.mrb[57].mxu1 }
0x1023   :  { %v2196_v50 = vpop.f32.mrb[58].mxu1 }
0x1024   :  { %2200 = vst.msk [vmem:[#allocation3] sm:$0xff] %vm474_vm6, %v2199_v47  ;;  %v3779_v51 = vpop.f32.mrb[59].mxu1 }
0x1029   :  { %v2317_v55 = vpop.f32.mrb[60].mxu1 }
0x102a   :  { %v2323_v37 = vmul.f32 %v4055_v36, %v2317_v55  ;;  %v3790_v56 = vpop.f32.mrb[61].mxu1 }
0x102b   :  { %v2320_v57 = vpop.f32.mrb[62].mxu1  ;;  %v2325_v53 = vld [vmem:[#allocation3] sm:$0xff] }
0x102c   :  { %2324 = vst.msk [vmem:[#allocation3 + $0x8] sm:$0xff] %vm474_vm6, %v2323_v37  ;;  %v3791_v58 = vpop.f32.mrb[63].mxu1  ;;  %v2327_v60 = vsub.f32 %v4768_v10, %v2325_v53 }
0x1033   :  { %v2326_v59 = vld [vmem:[#allocation3 + $0x8] sm:$0xff] }
0x1034   :  { %v2328_v61 = vsub.f32 %v4770_v11, %v2326_v59 }
0x1036   :  { %v2329_v63 = vpack.c.bf16 %v2328_v61, %v2327_v60 }
0x1038   :  { %3801 = vmatmul.mubr.msk.bf16.vlgmr.msra.gmra.mrb[48].mxu0 %vm474_vm6, %v2329_v63 }
0x1039   :  { %2478 = vmatpush1.bf16.msra.mxu0 %v3984_v62  ;;  %2509 = vmatprep.mubr.bf16.mxu0 %v4271_v49 }
0x103a   :  { %2479 = vmatprep.subr.bf16.mxu0 %v3989_v1 }
0x103d   :  { %2480 = vmatpush1.bf16.msra.mxu0 %v3987_v2 }
0x103e   :  { %2481 = vmatprep.subr.bf16.mxu0 %v3992_v3 }
0x1041   :  { %2482 = vmatpush1.bf16.msra.mxu0 %v3990_v9 }
0x1042   :  { %2483 = vmatprep.subr.bf16.mxu0 %v3996_v52 }
0x1045   :  { %2484 = vmatpush1.bf16.msra.mxu0 %v3994_v54 }
0x1046   :  { %3828 = vmatprep.subr.bf16.mxu0 %v4268_v0 }
0x110b   :  { %v2408_v16 = vpop.f32.mrb[48].mxu0 }
0x110c   :  { %v2409_v17 = vadd.f32 %v3400_v13, %v2408_v16  ;;  %v3802_v18 = vpop.f32.mrb[49].mxu0 }
0x110d   :  { %v2411_v19 = vpop.f32.mrb[50].mxu0 }
0x110e   :  { %v2415_v20 = vmax.f32 %v2409_v17, 0.0  ;;  %v2412_v21 = vadd.f32 %v3400_v13, %v2411_v19  ;;  %v3803_v22 = vpop.f32.mrb[51].mxu0 }
0x1110   :  { %v2417_v23 = vadd.f32 %v2415_v20, %v4768_v10  ;;  %v2416_v24 = vmax.f32 %v2412_v21, 0.0  ;;  %v4000_v10 = vld [vmem:[%s4946_s10 + $0x60] sm:$0xff]  }
0x1112   :  { %2419 = vst.msk [vmem:[#allocation2] sm:$0xff] %vm474_vm6, %v2417_v23  ;;  %v2418_v25 = vadd.f32 %v2416_v24, %v4770_v11  ;;  %v4001_v11 = vld [vmem:[%s4946_s10 + $0x68] sm:$0xff]  }
0x1114   :  { %2420 = vst.msk [vmem:[#allocation2 + $0x8] sm:$0xff] %vm474_vm6, %v2418_v25  ;;  %v2425_v26 = vpack.c.bf16 %v2418_v25, %v2417_v23 }
0x1116   :  { %3414 = vmatmul.mubr.msk.bf16.vlgmr.msra.gmra.mrb[24].mxu0 %vm474_vm6, %v2425_v26 }
0x1117   :  { %3830 = vmatprep.mubr.msk.bf16.mxu0 %vm4270_vm2, %v4268_v0 }
0x1119   :  { %v4858_v27 = vld [vmem:[#allocation2] sm:$0xff] }
0x111b   :  { %v4860_v28 = vld [vmem:[#allocation2 + $0x8] sm:$0xff] }
0x111c   :  { %v2530_v29 = vpack.c.bf16 %v4860_v28, %v4858_v27 }
0x111e   :  { %3813 = vmatmul.mubr.msk.bf16.vlgmr.msra.gmra.mrb[64].mxu1 %vm474_vm6, %v2530_v29 }
0x111f   :  { %3817 = vmatpush3.bf16.msra.mxu1 %v4000_v10  ;;  %3824 = vmatprep.mubr.msk.bf16.mxu1 %vm4270_vm2, %v4268_v0 }
0x1120   :  { %3818 = vmatprep.subr.bf16.mxu1 %v4268_v0 }
0x1123   :  { %3819 = vmatpush3.bf16.msra.mxu1 %v4001_v11 }
0x1124   :  { %3820 = vmatprep.subr.bf16.mxu1 %v4268_v0 }
0x1127   :  { %3821 = vmatpush3.bf16.msra.mxu1 %v4002_v31 }
0x1128   :  { %3822 = vmatprep.subr.bf16.mxu1 %v4268_v0 }
0x112b   :  { %3823 = vmatpush3.bf16.msra.mxu1 %v4003_v32 }
0x112c   :  { %3834 = vmatprep.subr.bf16.mxu1 %v4268_v0 }
0x112e   :  { %3825 = vmatmul.mubr.msk.bf16.vlgmr.msra.gmra.mrb[68].mxu1 %vm474_vm6, %v2530_v29 }
0x112f   :  { %3836 = vmatprep.mubr.msk.bf16.mxu1 %vm4270_vm2, %v4268_v0 }
0x11f1   :  { %v2601_v30 = vpop.f32.mrb[64].mxu1 }
0x11f2   :  { %v3814_v33 = vpop.f32.mrb[65].mxu1 }
0x11f3   :  { %v2604_v34 = vpop.f32.mrb[66].mxu1 }
0x11f4   :  { %v2608_v35 = vpack.c.bf16 %v2604_v34, %v2601_v30  ;;  %v3815_v38 = vpop.f32.mrb[67].mxu1 }
0x11f6   :  { %v2693_v39 = vsel %vm245_vm4, %v2608_v35, 0  ;;  %v2813_v40 = vrot.slane %v2608_v35, 4 }
0x11f7   :  { %3829 = vmatpush3.bf16.xpose.msra.mxu0 %v2693_v39 }
0x11f8   :  { %3840 = vmatprep.subr.bf16.mxu0 %v4268_v0  ;;  %v2815_v41 = vsel %vm245_vm4, %v2813_v40, 0 }
0x11fe   :  { %3831 = vmatmul.mubr.msk.bf16.vlgmr.msra.gmra.mrb[52].mxu0 %vm245_vm4, %v2608_v35 }
0x11ff   :  { %3841 = vmatpush3.bf16.xpose.msra.mxu0 %v2815_v41  ;;  %3842 = vmatprep.mubr.msk.bf16.mxu0 %vm4270_vm2, %v4268_v0 }
0x1200   :  { %3852 = vmatprep.subr.bf16.mxu0 %v4268_v0 }
0x1201   :  { %v2684_v43 = vpop.f32.mrb[68].mxu1 }
0x1202   :  { %v3826_v44 = vpop.f32.mrb[69].mxu1  ;;  %v2685_v46 = vadd.f32 %v3436_v42, %v2684_v43 }
0x1203   :  { %v2687_v45 = vpop.f32.mrb[70].mxu1 }
0x1204   :  { %v2688_v47 = vadd.f32 %v3436_v42, %v2687_v45  ;;  %v3827_v48 = vpop.f32.mrb[71].mxu1 }
0x1206   :  { %v2691_v50 = vpack.c.bf16 %v2688_v47, %v2685_v46  ;;  %3843 = vmatmul.mubr.msk.bf16.vlgmr.msra.gmra.mrb[56].mxu0 %vm245_vm4, %v2813_v40 }
0x1207   :  { %3860 = vmatprep.mubr.msk.bf16.mxu0 %vm4270_vm2, %v4268_v0 }
0x1208   :  { %v2768_v51 = vsel %vm935_vm7, %v2691_v50, 0  ;;  %v2887_v42 = vrot.slane %v2691_v50, 4 }
0x1209   :  { %3835 = vmatpush3.bf16.msra.mxu1 %v2768_v51 }
0x120a   :  { %3846 = vmatprep.subr.bf16.mxu1 %v4268_v0  ;;  %v2892_v45 = vsel %vm935_vm7, %v2887_v42, 0 }
0x12d1   :  { %v2729_v36 = vpop.f32.mrb[52].mxu0 }
0x12d2   :  { %v2735_v55 = vsel %vm902_vm8, %v2729_v36, -inf  ;;  %v3832_v37 = vpop.f32.mrb[53].mxu0 }
0x12d3   :  { %v2736_v56 = vrot.slane %v2735_v55, 4  ;;  %v2732_v57 = vpop.f32.mrb[54].mxu0  ;;  %v4004_v37 = vld [vmem:[#allocation13 + $0x60] sm:$0xff]  }
0x12d4   :  { %v3833_v58 = vpop.f32.mrb[55].mxu0  ;;  %3853 = vmatpush3.bf16.msra.mxu0 %v4004_v37  ;;  %v4006_v57 = vld [vmem:[#allocation13 + $0x70] sm:$0xff]  }
0x12d5   :  { %v2737_v53 = vmax.f32 %v2735_v55, %v2736_v56  ;;  %3854 = vmatprep.subr.bf16.mxu0 %v4268_v0  ;;  %v4005_v56 = vld [vmem:[#allocation13 + $0x68] sm:$0xff]   ;;  %v4007_v58 = vld [vmem:[#allocation13 + $0x78] sm:$0xff]  }
0x12d7   :  { %v2738_v59 = vrot.slane %v2737_v53, 2 }
0x12d8   :  { %3855 = vmatpush3.bf16.msra.mxu0 %v4005_v56 }
0x12d9   :  { %v2739_v60 = vmax.f32 %v2737_v53, %v2738_v59  ;;  %v2851_v61 = vpop.f32.mrb[56].mxu0  ;;  %3856 = vmatprep.subr.bf16.mxu0 %v4268_v0  ;;  %v4010_v53 = vld [vmem:[#allocation15 + $0xc4] ss:$8 sps:$4 sm:$0xff]  }
0x12da   :  { %v2857_v62 = vsel %vm902_vm8, %v2851_v61, -inf  ;;  %v3844_v63 = vpop.f32.mrb[57].mxu0 }
0x12db   :  { %v2740_v1 = vrot.slane %v2739_v60, 1  ;;  %v2858_v2 = vrot.slane %v2857_v62, 4  ;;  %v2854_v3 = vpop.f32.mrb[58].mxu0 }
0x12dc   :  { %v3845_v4 = vpop.f32.mrb[59].mxu0  ;;  %3857 = vmatpush3.bf16.msra.mxu0 %v4006_v57 }
0x12dd   :  { %v2741_v9 = vmax.f32 %v2739_v60, %v2740_v1  ;;  %v2859_v52 = vmax.f32 %v2857_v62, %v2858_v2  ;;  %3858 = vmatprep.subr.bf16.mxu0 %v4268_v0 }
0x12df   :  { %v2742_v12 = vsub.f32 %v2729_v36, %v2741_v9  ;;  %v2860_v54 = vrot.slane %v2859_v52, 2 }
0x12e0   :  { %3859 = vmatpush3.bf16.msra.mxu0 %v4007_v58 }
0x12e1   :  { %v2743_v14 = vpack.c.bf16 %v2742_v12, %v2742_v12  ;;  %v2861_v15 = vmax.f32 %v2859_v52, %v2860_v54  ;;  %3088 = vmatprep.subr.bf16.mxu0 %v4010_v53 }
0x12e3   :  { %v2745_v13 = vmul.bf16 1069105081, %v2743_v14  ;;  %v2862_v16 = vrot.slane %v2861_v15, 1 }
0x12e5   :  { %4056 = vpow.bf16 %v2745_v13  ;;  %v2863_v17 = vmax.f32 %v2861_v15, %v2862_v16 }
0x12e7   :  { %v2864_v18 = vsub.f32 %v2851_v61, %v2863_v17 }
0x12e9   :  { %v2865_v19 = vpack.c.bf16 %v2864_v18, %v2864_v18 }
0x12eb   :  { %v2867_v20 = vmul.bf16 1069105081, %v2865_v19  ;;  %v4008_v19 = vld [vmem:[#allocation15 + $0xc0] ss:$8 sps:$4 sm:$0xff]  }
0x12ed   :  { %4058 = vpow.bf16 %v2867_v20 }
0x12f0   :  { %v4057_v21 = vpop.eup %4056 }
0x12f1   :  { %v2747_v22 = vunpack.c.l.bf16 %v4057_v21 }
0x12f3   :  { %v2748_v23 = vsel %vm902_vm8, %v2747_v22, 0.0  ;;  %v4011_v22 = vld [vmem:[#allocation15 + $0xd0] ss:$8 sps:$4 sm:$0xff]  }
0x12f4   :  { %v2749_v24 = vrot.slane %v2748_v23, 4 }
0x12f6   :  { %v2750_v25 = vadd.f32 %v2749_v24, %v2748_v23  ;;  %v4016_v23 = vld [vmem:[#allocation15 + $0xe4] ss:$8 sps:$4 sm:$0xff]   ;;  %v4014_v24 = vld [vmem:[#allocation15 + $0xe0] ss:$8 sps:$4 sm:$0xff]  }
0x12f8   :  { %v4059_v26 = vpop.eup %4058  ;;  %v2751_v10 = vrot.slane %v2750_v25, 2 }
0x12f9   :  { %v2869_v29 = vunpack.c.l.bf16 %v4059_v26 }
0x12fa   :  { %v2752_v11 = vadd.f32 %v2751_v10, %v2750_v25  ;;  %v4019_v25 = vld [vmem:[#allocation15 + $0xf4] ss:$8 sps:$4 sm:$0xff]   ;;  %v3447_v10 = vld [vmem:[%s4949_s13 + $0x3] ss:$0 sm:$0xff] }
0x12fb   :  { %v2870_v31 = vsel %vm902_vm8, %v2869_v29, 0.0 }
0x12fc   :  { %v2871_v32 = vrot.slane %v2870_v31, 4  ;;  %v2753_v30 = vrot.slane %v2752_v11, 1 }
0x12fe   :  { %v2872_v33 = vadd.f32 %v2871_v32, %v2870_v31  ;;  %v2754_v34 = vadd.f32 %v2753_v30, %v2752_v11 }
0x1300   :  { %v2873_v35 = vrot.slane %v2872_v33, 2  ;;  %4060 = vrcp.f32 %v2754_v34 }
0x1302   :  { %v2874_v38 = vadd.f32 %v2873_v35, %v2872_v33 }
0x1304   :  { %v2875_v39 = vrot.slane %v2874_v38, 1 }
0x1306   :  { %v2876_v40 = vadd.f32 %v2875_v39, %v2874_v38 }
0x1308   :  { %4062 = vrcp.f32 %v2876_v40  ;;  %v3145_v40 = vlaneseq }
0x130a   :  { %v4061_v41 = vpop.eup %4060  ;;  %vm3203_vm13 = vcmp.lt.s32.totalorder %v3145_v40, 256 }
0x130b   :  { %v2756_v43 = vpack.c.bf16 %v4061_v41, %v4061_v41  ;;  %v3146_v41 = vshrl.u32 %v3145_v40, 7 }
0x130d   :  { %v2757_v44 = vmul.bf16 %v4057_v21, %v2756_v43  ;;  %v4013_v21 = vld [vmem:[#allocation15 + $0xd4] ss:$8 sps:$4 sm:$0xff]   ;;  %v3147_v42 = vsub.s32 0, %v3146_v41  ;;  %v3143_v43 = vld [vmem:[#allocation16] sm:$0x3] }
0x130f   :  { %3837 = vmatmul.mubr.msk.bf16.vlgmr.msra.gmra.mrb[72].mxu1 %vm902_vm8, %v2757_v44  ;;  %v2758_v46 = vunpack.c.l.bf16 %v2757_v44  ;;  %v3151_v44 = vsub.s32 1, %v3146_v41 }
0x1310   :  { %3847 = vmatpush3.bf16.msra.mxu1 %v2892_v45  ;;  %3848 = vmatprep.mubr.msk.bf16.mxu1 %vm4270_vm2, %v4268_v0  ;;  %v3148_v45 = vrot.slane %v3143_v43, %v3147_v42 }
0x1311   :  { %v2759_v47 = vsel %vm902_vm8, %v2758_v46, 0.0 }
0x1312   :  { %v4063_v48 = vpop.eup %4062  ;;  %2760 = vadd.xlane.f32.xlu0 %v2759_v47  ;;  %v3152_v47 = vrot.slane %v3143_v43, %v3151_v44 }
0x1313   :  { %v2878_v51 = vpack.c.bf16 %v4063_v48, %v4063_v48 }
0x1315   :  { %v2879_v36 = vmul.bf16 %v4059_v26, %v2878_v51  ;;  %v4017_v26 = vld [vmem:[#allocation15 + $0xf0] ss:$8 sps:$4 sm:$0xff]  }
0x1317   :  { %3849 = vmatmul.mubr.msk.bf16.vlgmr.msra.gmra.mrb[76].mxu1 %vm902_vm8, %v2879_v36  ;;  %v2880_v50 = vunpack.c.l.bf16 %v2879_v36 }
0x1319   :  { %v2881_v55 = vsel %vm902_vm8, %v2880_v50, 0.0 }
0x131a   :  { %2882 = vadd.xlane.f32.xlu1 %v2881_v55 }
0x139f   :  { %v2761_v59 = vpop.xlane.xlu0 %2760 }
0x13a0   :  { %v2762_v60 = vadd.f32 1e-09, %v2761_v59 }
0x13a2   :  { %4064 = vrcp.f32 %v2762_v60 }
0x13a7   :  { %v2883_v61 = vpop.xlane.xlu1 %2882 }
0x13a8   :  { %v2884_v62 = vadd.f32 1e-09, %v2883_v61 }
0x13aa   :  { %4066 = vrcp.f32 %v2884_v62 }
0x13ac   :  { %v4065_v63 = vpop.eup %4064 }
0x13b4   :  { %v4067_v52 = vpop.eup %4066 }
0x13e2   :  { %v2804_v1 = vpop.f32.mrb[72].mxu1 }
0x13e3   :  { %v2810_v2 = vmul.f32 %v4065_v63, %v2804_v1  ;;  %v3838_v3 = vpop.f32.mrb[73].mxu1 }
0x13e4   :  { %v2807_v4 = vpop.f32.mrb[74].mxu1 }
0x13e5   :  { %2811 = vst.msk [vmem:[#allocation3] sm:$0xff] %vm474_vm6, %v2810_v2  ;;  %v3839_v9 = vpop.f32.mrb[75].mxu1  ;;  %v4272_v4 = vmov 1966171168  }
0x13ea   :  { %v2928_v12 = vpop.f32.mrb[76].mxu1 }
0x13eb   :  { %v2934_v0 = vmul.f32 %v4067_v52, %v2928_v12  ;;  %v3850_v54 = vpop.f32.mrb[77].mxu1 }
0x13ec   :  { %v2931_v14 = vpop.f32.mrb[78].mxu1  ;;  %v2936_v13 = vld [vmem:[#allocation3] sm:$0xff] }
0x13ed   :  { %2935 = vst.msk [vmem:[#allocation3 + $0x8] sm:$0xff] %vm474_vm6, %v2934_v0  ;;  %v3851_v15 = vpop.f32.mrb[79].mxu1  ;;  %v2938_v17 = vsub.f32 %v4858_v27, %v2936_v13 }
0x13f4   :  { %v2937_v16 = vld [vmem:[#allocation3 + $0x8] sm:$0xff] }
0x13f5   :  { %v2939_v18 = vsub.f32 %v4860_v28, %v2937_v16 }
0x13f7   :  { %v2940_v20 = vpack.c.bf16 %v2939_v18, %v2938_v17 }
0x13f9   :  { %3861 = vmatmul.mubr.msk.bf16.vlgmr.msra.gmra.mrb[60].mxu0 %vm474_vm6, %v2940_v20 }
0x13fa   :  { %3089 = vmatpush1.bf16.msra.mxu0 %v4008_v19  ;;  %3120 = vmatprep.mubr.bf16.mxu0 %v4271_v49 }
0x13fb   :  { %3090 = vmatprep.subr.bf16.mxu0 %v4013_v21 }
0x13fe   :  { %3091 = vmatpush1.bf16.msra.mxu0 %v4011_v22 }
0x13ff   :  { %3092 = vmatprep.subr.bf16.mxu0 %v4016_v23 }
0x1402   :  { %3093 = vmatpush1.bf16.msra.mxu0 %v4014_v24 }
0x1403   :  { %3094 = vmatprep.subr.bf16.mxu0 %v4019_v25 }
0x1406   :  { %3095 = vmatpush1.bf16.msra.mxu0 %v4017_v26 }
0x14cc   :  { %v3019_v29 = vpop.f32.mrb[60].mxu0 }
0x14cd   :  { %v3020_v11 = vadd.f32 %v3447_v10, %v3019_v29  ;;  %v3862_v31 = vpop.f32.mrb[61].mxu0 }
0x14ce   :  { %v3022_v32 = vpop.f32.mrb[62].mxu0 }
0x14cf   :  { %v3026_v30 = vmax.f32 %v3020_v11, 0.0  ;;  %v3023_v49 = vadd.f32 %v3447_v10, %v3022_v32  ;;  %v3863_v33 = vpop.f32.mrb[63].mxu0 }
0x14d1   :  { %v3028_v34 = vadd.f32 %v3026_v30, %v4858_v27  ;;  %v3027_v35 = vmax.f32 %v3023_v49, 0.0 }
0x14d3   :  { %3030 = vst.msk [vmem:[#allocation2] sm:$0xff] %vm474_vm6, %v3028_v34  ;;  %v3029_v38 = vadd.f32 %v3027_v35, %v4860_v28 }
0x14d5   :  { %3031 = vst.msk [vmem:[#allocation2 + $0x8] sm:$0xff] %vm474_vm6, %v3029_v38  ;;  %v3036_v39 = vpack.c.bf16 %v3029_v38, %v3028_v34 }
0x14d7   :  { %3461 = vmatmul.mubr.msk.bf16.vlgmr.msra.gmra.mrb[24].mxu0 %vm474_vm6, %v3036_v39 }
0x15aa   :  { %v3122_v46 = vpop.f32.mrb[24].mxu0 }
0x15ab   :  { %v3864_v27 = vadd.f32 %v3122_v46, %v4549_v5  ;;  %v3124_v48 = vpop.f32.mrb[25].mxu0 }
0x15ac   :  { %v3865_v51 = vadd.f32 %v3124_v48, %v4551_v6  ;;  %v3126_v36 = vpop.f32.mrb[26].mxu0 }
0x15ad   :  { %v3155_v28 = vadd.f32 %v3864_v27, %v3148_v45  ;;  %v3866_v50 = vadd.f32 %v3126_v36, %v4553_v7  ;;  %v3128_v55 = vpop.f32.mrb[27].mxu0 }
0x15ae   :  { %v3156_v37 = vadd.f32 %v3865_v51, %v3152_v47  ;;  %v3867_v56 = vadd.f32 %v3128_v55, %v4555_v8  ;;  %v3187_v8 = vunpack.c.l.s4 %v4272_v4 }
0x15af   :  { %vm3159_vm9 = vcmp.gt.f32.partialorder %v3155_v28, 0.0  ;;  %v3163_v57 = vmul.f32 0.2, %v3155_v28  ;;  %v3157_v58 = vadd.f32 %v3866_v50, %v3148_v45 }
0x15b0   :  { %vm3160_vm10 = vcmp.gt.f32.partialorder %v3156_v37, 0.0  ;;  %v3164_v53 = vmul.f32 0.2, %v3156_v37  ;;  %v3158_v59 = vadd.f32 %v3867_v56, %v3152_v47  ;;  %v3188_v16 = vunpack.c.0.s8 %v3187_v8 }
0x15b1   :  { %v3167_v60 = vsel %vm3159_vm9, %v3155_v28, %v3163_v57  ;;  %vm3161_vm11 = vcmp.gt.f32.partialorder %v3157_v58, 0.0  ;;  %v3165_v5 = vmul.f32 0.2, %v3157_v58 }
0x15b2   :  { %v3171_v61 = vrot.slane %v3167_v60, 4  ;;  %v3168_v62 = vsel %vm3160_vm10, %v3156_v37, %v3164_v53  ;;  %vm3162_vm12 = vcmp.gt.f32.partialorder %v3158_v59, 0.0  ;;  %v3166_v6 = vmul.f32 0.2, %v3158_v59 }
0x15b3   :  { %v3177_v63 = vrot.slane %v3168_v62, 4  ;;  %v3169_v1 = vsel %vm3161_vm11, %v3157_v58, %v3165_v5  ;;  %v3191_v25 = vsub.s32 %v3188_v16, %v3146_v41 }
0x15b4   :  { %v3172_v7 = vmax.f32 %v3167_v60, %v3171_v61  ;;  %v3206_v2 = vrot.slane %v3169_v1, 4  ;;  %v3170_v3 = vsel %vm3162_vm12, %v3158_v59, %v3166_v6 }
0x15b5   :  { %v3178_v9 = vmax.f32 %v3168_v62, %v3177_v63  ;;  %v3212_v52 = vrot.slane %v3170_v3, 4 }
0x15b6   :  { %v3173_v12 = vrot.slane %v3172_v7, 2  ;;  %v3207_v0 = vmax.f32 %v3169_v1, %v3206_v2 }
0x15b7   :  { %v3179_v54 = vrot.slane %v3178_v9, 2  ;;  %v3213_v14 = vmax.f32 %v3170_v3, %v3212_v52 }
0x15b8   :  { %v3174_v15 = vmax.f32 %v3172_v7, %v3173_v12  ;;  %v3208_v13 = vrot.slane %v3207_v0, 2 }
0x15b9   :  { %v3180_v17 = vmax.f32 %v3178_v9, %v3179_v54  ;;  %v3214_v18 = vrot.slane %v3213_v14, 2 }
0x15ba   :  { %v3175_v19 = vrot.slane %v3174_v15, 1  ;;  %v3209_v20 = vmax.f32 %v3207_v0, %v3208_v13 }
0x15bb   :  { %v3181_v21 = vrot.slane %v3180_v17, 1  ;;  %v3215_v22 = vmax.f32 %v3213_v14, %v3214_v18 }
0x15bc   :  { %v3176_v23 = vmax.f32 %v3174_v15, %v3175_v19  ;;  %v3210_v24 = vrot.slane %v3209_v20, 1 }
0x15bd   :  { %v3182_v26 = vmax.f32 %v3180_v17, %v3181_v21  ;;  %v3216_v10 = vrot.slane %v3215_v22, 1 }
0x15be   :  { %v3211_v29 = vmax.f32 %v3209_v20, %v3210_v24 }
0x15bf   :  { %v3185_v11 = vcombine.low %v3176_v23, %v3182_v26  ;;  %v3217_v31 = vmax.f32 %v3215_v22, %v3216_v10 }
0x15c1   :  { %v3192_v32 = vrot.slane %v3185_v11, %v3191_v25  ;;  %v3220_v30 = vcombine.low %v3211_v29, %v3217_v31 }
0x15c3   :  { %v3199_v49 = vrot.slane %v3192_v32, %v3191_v25  ;;  %v3227_v33 = vrot.slane %v3220_v30, %v3191_v25 }
0x15c5   :  { %3205 = vst.msk [vmem:[%s4952_s16] ss:$2 sm:$0x3] %vm3203_vm13, %v3199_v49  ;;  %v3234_v34 = vrot.slane %v3227_v33, %v3191_v25 }
0x15c7   :  { %3462 = vst.msk [vmem:[%s4952_s16 + $0x1] ss:$2 sm:$0x3] %vm3203_vm13, %v3234_v34 }
0x15c8   :  { %3242 = vsyncpa [#allocation6], 1 }
0x15c9   :  { %3243 = vsyncpa [#allocation8], 1 }
0x15ca   :  { %3244 = vsyncpa [#allocation11], 1 }
0x15cb   :  { %3245 = vsyncpa [#allocation14], 1 }
0x15cc   :  { %3246 = vsyncpa [#allocation17], 1 }

</bundles_post_ra>
